<compile_context>
chip_gen: v6e
topology: v6e:2x2x1
jax: 0.10.0
libtpu: 0.0.40
codegen_flags: <defaults>
</compile_context>

<pallas_src>
import functools

import jax
import jax.numpy as jnp
from jax import lax
from jax.experimental import pallas as pl
from jax.experimental.pallas import tpu as pltpu

EPS = 1e-5


def linear_attention_kernel(x_ref, wqkv_ref, wout_ref, bout_ref, gamma_ref,
                            beta_ref, maskf_ref, maskb_ref, o_ref, *, heads,
                            dim_head):
    hidden = heads * dim_head
    bb = x_ref.shape[0]
    n_sp = x_ref.shape[2]

    # Shared (grid-constant) operands: load once per step, reuse for all samples.
    w_qkv = wqkv_ref[...]          # (3*hidden, C) bf16
    w_out = wout_ref[...]          # (C, hidden)  bf16, softmax scale pre-folded
    b_out = bout_ref[...]          # (C, 1) f32
    gamma = gamma_ref[...]         # (C, 1) f32
    beta = beta_ref[...]           # (C, 1) f32
    mask_f = maskf_ref[...]        # (hidden, hidden) f32 block-diagonal head mask
    mask_b = maskb_ref[...]        # (hidden, hidden) bf16 (same mask)

    for b in range(bb):            # bb is 1 or B (tiny) -> fully unrolled
        x = x_ref[b]               # (C, N) bf16

        # ---- 1x1 conv (no bias) -> qkv : (3*hidden, N), f32 accumulate ------
        qkv = lax.dot_general(w_qkv, x, (((1,), (0,)), ((), ())),
                              preferred_element_type=jnp.float32)

        q_raw = qkv[:hidden, :]                          # (hidden, N) f32
        k_raw = qkv[hidden:2 * hidden, :]                # (hidden, N) f32
        vb = qkv[2 * hidden:, :].astype(jnp.bfloat16)    # drop v to bf16 early

        # ---- k softmax over the spatial (lane) axis, f32 ---------------------
        k_exp = jnp.exp(k_raw - jnp.max(k_raw, axis=-1, keepdims=True))
        k_soft = k_exp * pl.reciprocal(
            jnp.sum(k_exp, axis=-1, keepdims=True), approx=True)
        kb = k_soft.astype(jnp.bfloat16)

        # ---- q softmax numerator with PER-HEAD max (dim=-2 in torch) ---------
        # The per-head denominator factors out of the block-diagonal sum and is
        # applied after the fused matmul, so no per-head slicing is needed here.
        q3 = q_raw.reshape(heads, dim_head, n_sp)
        q_exp = jnp.exp(q3 - jnp.max(q3, axis=1, keepdims=True))
        qb = q_exp.reshape(hidden, n_sp).astype(jnp.bfloat16)

        # ---- context[d, e] = sum_n k[d, n] v[e, n]; keep same-head pairs -----
        context = lax.dot_general(kb, vb, (((1,), (1,)), ((), ())),
                                  preferred_element_type=jnp.float32)
        ctx_m = (context * mask_f).astype(jnp.bfloat16)  # (hidden, hidden)

        # ---- fused (out, denom) matmul: one 256-wide MXU call ----------------
        # lhs = [masked_context | head_mask]  (hidden, 2*hidden), contract the
        # shared channel axis with q_exp; rows [:hidden] = out, [hidden:] = the
        # per-head softmax denominator (mask is symmetric).
        lhs = jnp.concatenate([ctx_m, mask_b], axis=1)
        fused = lax.dot_general(lhs, qb, (((0,), (0,)), ((), ())),
                                preferred_element_type=jnp.float32)  # (2h, N)
        out_hidden = fused[:hidden, :] * pl.reciprocal(fused[hidden:, :],
                                                       approx=True)

        # ---- output 1x1 conv (scale folded into w_out) + bias ----------------
        y = lax.dot_general(w_out, out_hidden.astype(jnp.bfloat16),
                            (((1,), (0,)), ((), ())),
                            preferred_element_type=jnp.float32)
        y = y + b_out

        # ---- GroupNorm(1, dim): two-pass stats over all (C, N) elements ------
        mean = jnp.mean(y)
        yc = y - mean
        var = jnp.mean(yc * yc)
        y_n = yc * lax.rsqrt(var + EPS)
        o_ref[b] = y_n * gamma + beta


def _default_samples_per_step(batch):
    """v7x has 2 TensorCores/chip -> keep one sample per ('parallel') grid step.
    v5e/v6e have a single TC, so a per-sample grid is just serial per-step
    overhead -> collapse the whole batch into one step."""
    try:
        kind = jax.devices()[0].device_kind.lower()
    except Exception:
        kind = ""
    if "v7" in kind and batch > 1:
        return 1
    return batch


def linear_attention(x, w_qkv, w_out, b_out, gamma, beta, *, heads=4,
                     dim_head=32, samples_per_step=None):
    """x: (B, C, H, W) float32 (NCHW, same as the PyTorch module)."""
    B, C, H, W = x.shape
    N = H * W
    hidden = heads * dim_head
    scale = dim_head ** -0.5

    if samples_per_step is None:
        samples_per_step = _default_samples_per_step(B)
    bb = samples_per_step
    assert B % bb == 0

    # bf16 for matmul operands (MXU-native); bias/affine/mask stay f32.
    x2 = x.reshape(B, C, N).astype(jnp.bfloat16)
    w_qkv_b = w_qkv.astype(jnp.bfloat16)
    # fold the softmax scale into the output 1x1 conv (linear -> identical)
    w_out_b = (w_out * scale).astype(jnp.bfloat16)
    b_out2 = b_out.reshape(C, 1).astype(jnp.float32)
    gamma2 = gamma.reshape(C, 1).astype(jnp.float32)
    beta2 = beta.reshape(C, 1).astype(jnp.float32)

    # block-diagonal same-head mask, hoisted out of the kernel (constant inputs)
    head_id = jnp.arange(hidden, dtype=jnp.int32) // dim_head
    mask_f = (head_id[:, None] == head_id[None, :]).astype(jnp.float32)
    mask_b = mask_f.astype(jnp.bfloat16)

    kernel = functools.partial(linear_attention_kernel, heads=heads,
                               dim_head=dim_head)

    out = pl.pallas_call(
        kernel,
        out_shape=jax.ShapeDtypeStruct((B, C, N), jnp.float32),
        grid=(B // bb,),
        in_specs=[
            pl.BlockSpec((bb, C, N), lambda i: (i, 0, 0)),          # x
            pl.BlockSpec((3 * hidden, C), lambda i: (0, 0)),        # w_qkv
            pl.BlockSpec((C, hidden), lambda i: (0, 0)),            # w_out
            pl.BlockSpec((C, 1), lambda i: (0, 0)),                 # b_out
            pl.BlockSpec((C, 1), lambda i: (0, 0)),                 # gamma
            pl.BlockSpec((C, 1), lambda i: (0, 0)),                 # beta
            pl.BlockSpec((hidden, hidden), lambda i: (0, 0)),       # mask f32
            pl.BlockSpec((hidden, hidden), lambda i: (0, 0)),       # mask bf16
        ],
        out_specs=pl.BlockSpec((bb, C, N), lambda i: (i, 0, 0)),
        compiler_params=pltpu.CompilerParams(
            dimension_semantics=("parallel",)),
    )(x2, w_qkv_b, w_out_b, b_out2, gamma2, beta2, mask_f, mask_b)

    return out.reshape(B, C, H, W)


def linear_attention_ref(x, w_qkv, w_out, b_out, gamma, beta, *, heads=4,
                         dim_head=32):
    """Pure-JAX f32 reference mirroring the PyTorch forward."""
    B, C, H, W = x.shape
    N = H * W
    hidden = heads * dim_head
    scale = dim_head ** -0.5

    x2 = x.reshape(B, C, N)
    qkv = jnp.einsum('oc,bcn->bon', w_qkv, x2)
    q, k, v = jnp.split(qkv, 3, axis=1)
    q = q.reshape(B, heads, dim_head, N)
    k = k.reshape(B, heads, dim_head, N)
    v = v.reshape(B, heads, dim_head, N)
    q = jax.nn.softmax(q, axis=-2) * scale
    k = jax.nn.softmax(k, axis=-1)
    context = jnp.einsum('bhdn,bhen->bhde', k, v)
    out = jnp.einsum('bhde,bhdn->bhen', context, q)
    out = out.reshape(B, hidden, N)
    y = jnp.einsum('oc,bcn->bon', w_out, out) + b_out.reshape(1, -1, 1)
    mean = jnp.mean(y, axis=(1, 2), keepdims=True)
    var = jnp.mean((y - mean) ** 2, axis=(1, 2), keepdims=True)
    y = (y - mean) / jnp.sqrt(var + EPS)
    y = y * gamma.reshape(1, -1, 1) + beta.reshape(1, -1, 1)
    return y.reshape(B, C, H, W)


if __name__ == "__main__":
    dim = 4
    heads = 4
    dim_head = 32
    hidden = heads * dim_head
    B, H, W = 2, 16, 16

    key = jax.random.PRNGKey(0)
    kx, kq, kw, kb = jax.random.split(key, 4)

    x = jax.random.normal(kx, (B, dim, H, W), dtype=jnp.float32)
    # Conv2d(dim, hidden*3, 1, bias=False) weight -> (3*hidden, dim)
    w_qkv = jax.random.normal(kq, (3 * hidden, dim), dtype=jnp.float32) * 0.1
    # Conv2d(hidden, dim, 1) weight/bias
    w_out = jax.random.normal(kw, (dim, hidden), dtype=jnp.float32) * 0.05
    b_out = jax.random.normal(kb, (dim,), dtype=jnp.float32) * 0.01
    # GroupNorm(1, dim) affine params (PyTorch default init)
    gamma = jnp.ones((dim,), dtype=jnp.float32)
    beta = jnp.zeros((dim,), dtype=jnp.float32)

    out = linear_attention(x, w_qkv, w_out, b_out, gamma, beta,
                           heads=heads, dim_head=dim_head)
    out = jax.block_until_ready(out)

    ref = linear_attention_ref(x, w_qkv, w_out, b_out, gamma, beta,
                               heads=heads, dim_head=dim_head)
    assert out.shape == (B, dim, H, W)
    # bf16 matmul operands + approx reciprocals -> ~1% relative error.
    assert jnp.allclose(out, ref, atol=5e-2, rtol=5e-2), (
        float(jnp.max(jnp.abs(out - ref))))

    print("KERNEL_OK")
</pallas_src>

<mosaic_0001>
module attributes {stable_mosaic.version = 11 : i64} {
  func.func @linear_attention_kernel(%arg0: i32, %arg1: memref<2x4x256xbf16, #tpu.memory_space<vmem>>, %arg2: memref<384x4xbf16, #tpu.memory_space<vmem>>, %arg3: memref<4x128xbf16, #tpu.memory_space<vmem>>, %arg4: memref<4x1xf32, #tpu.memory_space<vmem>>, %arg5: memref<4x1xf32, #tpu.memory_space<vmem>>, %arg6: memref<4x1xf32, #tpu.memory_space<vmem>>, %arg7: memref<128x128xf32, #tpu.memory_space<vmem>>, %arg8: memref<128x128xbf16, #tpu.memory_space<vmem>>, %arg9: memref<2x4x256xf32, #tpu.memory_space<vmem>>) attributes {dimension_semantics = [#tpu.dimension_semantics<parallel>], iteration_bounds = array<i64: 1>, scalar_prefetch = 0 : i64, scratch_operands = 0 : i64, tpu.core_type = #tpu.core_type<tc>, window_params = [{transform_indices = @transform_0, window_bounds = array<i64: 2, 4, 256>}, {pipeline_mode = #tpu.pipeline_mode<synchronous>, transform_indices = @transform_1, window_bounds = array<i64: 384, 4>}, {pipeline_mode = #tpu.pipeline_mode<synchronous>, transform_indices = @transform_2, window_bounds = array<i64: 4, 128>}, {pipeline_mode = #tpu.pipeline_mode<synchronous>, transform_indices = @transform_3, window_bounds = array<i64: 4, 1>}, {pipeline_mode = #tpu.pipeline_mode<synchronous>, transform_indices = @transform_4, window_bounds = array<i64: 4, 1>}, {pipeline_mode = #tpu.pipeline_mode<synchronous>, transform_indices = @transform_5, window_bounds = array<i64: 4, 1>}, {pipeline_mode = #tpu.pipeline_mode<synchronous>, transform_indices = @transform_6, window_bounds = array<i64: 128, 128>}, {pipeline_mode = #tpu.pipeline_mode<synchronous>, transform_indices = @transform_7, window_bounds = array<i64: 128, 128>}, {transform_indices = @transform_8, window_bounds = array<i64: 2, 4, 256>}]} {
    %c0 = arith.constant 0 : index
    %c0_0 = arith.constant 0 : index
    %0 = vector.load %arg2[%c0, %c0_0] : memref<384x4xbf16, #tpu.memory_space<vmem>>, vector<384x4xbf16>
    %c0_1 = arith.constant 0 : index
    %c0_2 = arith.constant 0 : index
    %1 = vector.load %arg3[%c0_1, %c0_2] : memref<4x128xbf16, #tpu.memory_space<vmem>>, vector<4x128xbf16>
    %c0_3 = arith.constant 0 : index
    %c0_4 = arith.constant 0 : index
    %2 = vector.load %arg4[%c0_3, %c0_4] : memref<4x1xf32, #tpu.memory_space<vmem>>, vector<4x1xf32>
    %c0_5 = arith.constant 0 : index
    %c0_6 = arith.constant 0 : index
    %3 = vector.load %arg5[%c0_5, %c0_6] : memref<4x1xf32, #tpu.memory_space<vmem>>, vector<4x1xf32>
    %c0_7 = arith.constant 0 : index
    %c0_8 = arith.constant 0 : index
    %4 = vector.load %arg6[%c0_7, %c0_8] : memref<4x1xf32, #tpu.memory_space<vmem>>, vector<4x1xf32>
    %c0_9 = arith.constant 0 : index
    %c0_10 = arith.constant 0 : index
    %5 = vector.load %arg7[%c0_9, %c0_10] : memref<128x128xf32, #tpu.memory_space<vmem>>, vector<128x128xf32>
    %c0_11 = arith.constant 0 : index
    %c0_12 = arith.constant 0 : index
    %6 = vector.load %arg8[%c0_11, %c0_12] : memref<128x128xbf16, #tpu.memory_space<vmem>>, vector<128x128xbf16>
    %c0_13 = arith.constant 0 : index
    %c0_14 = arith.constant 0 : index
    %c0_15 = arith.constant 0 : index
    %7 = vector.load %arg1[%c0_13, %c0_14, %c0_15] : memref<2x4x256xbf16, #tpu.memory_space<vmem>>, vector<1x4x256xbf16>
    %8 = vector.shape_cast %7 : vector<1x4x256xbf16> to vector<4x256xbf16>
    %cst = arith.constant dense<0.000000e+00> : vector<384x256xf32>
    %9 = tpu.matmul %0, %8, %cst {dimension_numbers = #tpu.dot_dimension_numbers<[1], [0], [0], [1], [0, 0, 1, 1], [], []>} : vector<384x4xbf16>, vector<4x256xbf16>, vector<384x256xf32> -> vector<384x256xf32>
    %10 = vector.extract_strided_slice %9 {offsets = [0, 0], sizes = [128, 256], strides = [1, 1]} : vector<384x256xf32> to vector<128x256xf32>
    %11 = vector.extract_strided_slice %9 {offsets = [128, 0], sizes = [128, 256], strides = [1, 1]} : vector<384x256xf32> to vector<128x256xf32>
    %12 = vector.extract_strided_slice %9 {offsets = [256, 0], sizes = [128, 256], strides = [1, 1]} : vector<384x256xf32> to vector<128x256xf32>
    %13 = arith.truncf %12 : vector<128x256xf32> to vector<128x256xbf16>
    %cst_16 = arith.constant dense<0xFF800000> : vector<128xf32>
    %14 = vector.multi_reduction <maximumf>, %11, %cst_16 [1] : vector<128x256xf32> to vector<128xf32>
    %15 = vector.shape_cast %14 : vector<128xf32> to vector<128x1xf32>
    %16 = vector.broadcast %15 : vector<128x1xf32> to vector<128x256xf32>
    %17 = arith.subf %11, %16 : vector<128x256xf32>
    %18 = math.exp %17 : vector<128x256xf32>
    %cst_17 = arith.constant dense<0.000000e+00> : vector<128xf32>
    %19 = vector.multi_reduction <add>, %18, %cst_17 [1] : vector<128x256xf32> to vector<128xf32>
    %20 = vector.shape_cast %19 : vector<128xf32> to vector<128x1xf32>
    %21 = tpu.reciprocal %20 {approx = true} : vector<128x1xf32> -> vector<128x1xf32>
    %22 = vector.broadcast %21 : vector<128x1xf32> to vector<128x256xf32>
    %23 = arith.mulf %18, %22 : vector<128x256xf32>
    %24 = arith.truncf %23 : vector<128x256xf32> to vector<128x256xbf16>
    %25 = vector.shape_cast %10 : vector<128x256xf32> to vector<4x32x256xf32>
    %cst_18 = arith.constant dense<0xFF800000> : vector<4x256xf32>
    %26 = vector.multi_reduction <maximumf>, %25, %cst_18 [1] : vector<4x32x256xf32> to vector<4x256xf32>
    %27 = vector.shape_cast %26 : vector<4x256xf32> to vector<4x1x256xf32>
    %28 = vector.broadcast %27 : vector<4x1x256xf32> to vector<4x32x256xf32>
    %29 = arith.subf %25, %28 : vector<4x32x256xf32>
    %30 = math.exp %29 : vector<4x32x256xf32>
    %31 = vector.shape_cast %30 : vector<4x32x256xf32> to vector<128x256xf32>
    %32 = arith.truncf %31 : vector<128x256xf32> to vector<128x256xbf16>
    %cst_19 = arith.constant dense<0.000000e+00> : vector<128x128xf32>
    %33 = tpu.matmul %24, %13, %cst_19 {dimension_numbers = #tpu.dot_dimension_numbers<[1], [1], [0], [0], [0, 0, 1, 0], [], []>} : vector<128x256xbf16>, vector<128x256xbf16>, vector<128x128xf32> -> vector<128x128xf32>
    %34 = arith.mulf %33, %5 : vector<128x128xf32>
    %35 = arith.truncf %34 : vector<128x128xf32> to vector<128x128xbf16>
    %36 = tpu.concatenate %35, %6 in 1 : vector<128x128xbf16>, vector<128x128xbf16> -> vector<128x256xbf16>
    %cst_20 = arith.constant dense<0.000000e+00> : vector<256x256xf32>
    %37 = tpu.matmul %36, %32, %cst_20 {dimension_numbers = #tpu.dot_dimension_numbers<[0], [0], [1], [1], [0, 1, 1, 1], [], []>} : vector<128x256xbf16>, vector<128x256xbf16>, vector<256x256xf32> -> vector<256x256xf32>
    %38 = vector.extract_strided_slice %37 {offsets = [0, 0], sizes = [128, 256], strides = [1, 1]} : vector<256x256xf32> to vector<128x256xf32>
    %39 = vector.extract_strided_slice %37 {offsets = [128, 0], sizes = [128, 256], strides = [1, 1]} : vector<256x256xf32> to vector<128x256xf32>
    %40 = tpu.reciprocal %39 {approx = true} : vector<128x256xf32> -> vector<128x256xf32>
    %41 = arith.mulf %38, %40 : vector<128x256xf32>
    %42 = arith.truncf %41 : vector<128x256xf32> to vector<128x256xbf16>
    %cst_21 = arith.constant dense<0.000000e+00> : vector<4x256xf32>
    %43 = tpu.matmul %1, %42, %cst_21 {dimension_numbers = #tpu.dot_dimension_numbers<[1], [0], [0], [1], [0, 0, 1, 1], [], []>} : vector<4x128xbf16>, vector<128x256xbf16>, vector<4x256xf32> -> vector<4x256xf32>
    %44 = vector.broadcast %2 : vector<4x1xf32> to vector<4x256xf32>
    %45 = arith.addf %43, %44 : vector<4x256xf32>
    %46 = vector.shape_cast %45 : vector<4x256xf32> to vector<1x4x256xf32>
    %cst_22 = arith.constant dense<0.000000e+00> : vector<1xf32>
    %47 = vector.multi_reduction <add>, %46, %cst_22 [1, 2] : vector<1x4x256xf32> to vector<1xf32>
    %48 = vector.shape_cast %47 : vector<1xf32> to vector<1x1x1xf32>
    %49 = vector.extract %48[0, 0, 0] : f32 from vector<1x1x1xf32>
    %cst_23 = arith.constant 1.024000e+03 : f32
    %50 = arith.divf %49, %cst_23 : f32
    %51 = vector.broadcast %50 : f32 to vector<4x256xf32>
    %52 = arith.subf %45, %51 : vector<4x256xf32>
    %53 = arith.mulf %52, %52 : vector<4x256xf32>
    %54 = vector.shape_cast %53 : vector<4x256xf32> to vector<1x4x256xf32>
    %cst_24 = arith.constant dense<0.000000e+00> : vector<1xf32>
    %55 = vector.multi_reduction <add>, %54, %cst_24 [1, 2] : vector<1x4x256xf32> to vector<1xf32>
    %56 = vector.shape_cast %55 : vector<1xf32> to vector<1x1x1xf32>
    %57 = vector.extract %56[0, 0, 0] : f32 from vector<1x1x1xf32>
    %cst_25 = arith.constant 1.024000e+03 : f32
    %58 = arith.divf %57, %cst_25 : f32
    %cst_26 = arith.constant 9.99999974E-6 : f32
    %59 = arith.addf %58, %cst_26 : f32
    %60 = math.rsqrt %59 : f32
    %61 = vector.broadcast %60 : f32 to vector<4x256xf32>
    %62 = arith.mulf %52, %61 : vector<4x256xf32>
    %63 = vector.broadcast %3 : vector<4x1xf32> to vector<4x256xf32>
    %64 = arith.mulf %62, %63 : vector<4x256xf32>
    %65 = vector.broadcast %4 : vector<4x1xf32> to vector<4x256xf32>
    %66 = arith.addf %64, %65 : vector<4x256xf32>
    %c0_27 = arith.constant 0 : index
    %c0_28 = arith.constant 0 : index
    %c0_29 = arith.constant 0 : index
    %67 = vector.load %arg9[%c0_27, %c0_28, %c0_29] : memref<2x4x256xf32, #tpu.memory_space<vmem>>, vector<1x4x256xf32>
    %68 = vector.shape_cast %67 : vector<1x4x256xf32> to vector<4x256xf32>
    %69 = vector.shape_cast %66 : vector<4x256xf32> to vector<1x4x256xf32>
    tpu.vector_store %arg9[%c0_27, %c0_28, %c0_29], %69 {strides = array<i32>} : memref<2x4x256xf32, #tpu.memory_space<vmem>>, vector<1x4x256xf32>,
    %c1 = arith.constant 1 : index
    %c0_30 = arith.constant 0 : index
    %c0_31 = arith.constant 0 : index
    %70 = vector.load %arg1[%c1, %c0_30, %c0_31] : memref<2x4x256xbf16, #tpu.memory_space<vmem>>, vector<1x4x256xbf16>
    %71 = vector.shape_cast %70 : vector<1x4x256xbf16> to vector<4x256xbf16>
    %cst_32 = arith.constant dense<0.000000e+00> : vector<384x256xf32>
    %72 = tpu.matmul %0, %71, %cst_32 {dimension_numbers = #tpu.dot_dimension_numbers<[1], [0], [0], [1], [0, 0, 1, 1], [], []>} : vector<384x4xbf16>, vector<4x256xbf16>, vector<384x256xf32> -> vector<384x256xf32>
    %73 = vector.extract_strided_slice %72 {offsets = [0, 0], sizes = [128, 256], strides = [1, 1]} : vector<384x256xf32> to vector<128x256xf32>
    %74 = vector.extract_strided_slice %72 {offsets = [128, 0], sizes = [128, 256], strides = [1, 1]} : vector<384x256xf32> to vector<128x256xf32>
    %75 = vector.extract_strided_slice %72 {offsets = [256, 0], sizes = [128, 256], strides = [1, 1]} : vector<384x256xf32> to vector<128x256xf32>
    %76 = arith.truncf %75 : vector<128x256xf32> to vector<128x256xbf16>
    %cst_33 = arith.constant dense<0xFF800000> : vector<128xf32>
    %77 = vector.multi_reduction <maximumf>, %74, %cst_33 [1] : vector<128x256xf32> to vector<128xf32>
    %78 = vector.shape_cast %77 : vector<128xf32> to vector<128x1xf32>
    %79 = vector.broadcast %78 : vector<128x1xf32> to vector<128x256xf32>
    %80 = arith.subf %74, %79 : vector<128x256xf32>
    %81 = math.exp %80 : vector<128x256xf32>
    %cst_34 = arith.constant dense<0.000000e+00> : vector<128xf32>
    %82 = vector.multi_reduction <add>, %81, %cst_34 [1] : vector<128x256xf32> to vector<128xf32>
    %83 = vector.shape_cast %82 : vector<128xf32> to vector<128x1xf32>
    %84 = tpu.reciprocal %83 {approx = true} : vector<128x1xf32> -> vector<128x1xf32>
    %85 = vector.broadcast %84 : vector<128x1xf32> to vector<128x256xf32>
    %86 = arith.mulf %81, %85 : vector<128x256xf32>
    %87 = arith.truncf %86 : vector<128x256xf32> to vector<128x256xbf16>
    %88 = vector.shape_cast %73 : vector<128x256xf32> to vector<4x32x256xf32>
    %cst_35 = arith.constant dense<0xFF800000> : vector<4x256xf32>
    %89 = vector.multi_reduction <maximumf>, %88, %cst_35 [1] : vector<4x32x256xf32> to vector<4x256xf32>
    %90 = vector.shape_cast %89 : vector<4x256xf32> to vector<4x1x256xf32>
    %91 = vector.broadcast %90 : vector<4x1x256xf32> to vector<4x32x256xf32>
    %92 = arith.subf %88, %91 : vector<4x32x256xf32>
    %93 = math.exp %92 : vector<4x32x256xf32>
    %94 = vector.shape_cast %93 : vector<4x32x256xf32> to vector<128x256xf32>
    %95 = arith.truncf %94 : vector<128x256xf32> to vector<128x256xbf16>
    %cst_36 = arith.constant dense<0.000000e+00> : vector<128x128xf32>
    %96 = tpu.matmul %87, %76, %cst_36 {dimension_numbers = #tpu.dot_dimension_numbers<[1], [1], [0], [0], [0, 0, 1, 0], [], []>} : vector<128x256xbf16>, vector<128x256xbf16>, vector<128x128xf32> -> vector<128x128xf32>
    %97 = arith.mulf %96, %5 : vector<128x128xf32>
    %98 = arith.truncf %97 : vector<128x128xf32> to vector<128x128xbf16>
    %99 = tpu.concatenate %98, %6 in 1 : vector<128x128xbf16>, vector<128x128xbf16> -> vector<128x256xbf16>
    %cst_37 = arith.constant dense<0.000000e+00> : vector<256x256xf32>
    %100 = tpu.matmul %99, %95, %cst_37 {dimension_numbers = #tpu.dot_dimension_numbers<[0], [0], [1], [1], [0, 1, 1, 1], [], []>} : vector<128x256xbf16>, vector<128x256xbf16>, vector<256x256xf32> -> vector<256x256xf32>
    %101 = vector.extract_strided_slice %100 {offsets = [0, 0], sizes = [128, 256], strides = [1, 1]} : vector<256x256xf32> to vector<128x256xf32>
    %102 = vector.extract_strided_slice %100 {offsets = [128, 0], sizes = [128, 256], strides = [1, 1]} : vector<256x256xf32> to vector<128x256xf32>
    %103 = tpu.reciprocal %102 {approx = true} : vector<128x256xf32> -> vector<128x256xf32>
    %104 = arith.mulf %101, %103 : vector<128x256xf32>
    %105 = arith.truncf %104 : vector<128x256xf32> to vector<128x256xbf16>
    %cst_38 = arith.constant dense<0.000000e+00> : vector<4x256xf32>
    %106 = tpu.matmul %1, %105, %cst_38 {dimension_numbers = #tpu.dot_dimension_numbers<[1], [0], [0], [1], [0, 0, 1, 1], [], []>} : vector<4x128xbf16>, vector<128x256xbf16>, vector<4x256xf32> -> vector<4x256xf32>
    %107 = vector.broadcast %2 : vector<4x1xf32> to vector<4x256xf32>
    %108 = arith.addf %106, %107 : vector<4x256xf32>
    %109 = vector.shape_cast %108 : vector<4x256xf32> to vector<1x4x256xf32>
    %cst_39 = arith.constant dense<0.000000e+00> : vector<1xf32>
    %110 = vector.multi_reduction <add>, %109, %cst_39 [1, 2] : vector<1x4x256xf32> to vector<1xf32>
    %111 = vector.shape_cast %110 : vector<1xf32> to vector<1x1x1xf32>
    %112 = vector.extract %111[0, 0, 0] : f32 from vector<1x1x1xf32>
    %cst_40 = arith.constant 1.024000e+03 : f32
    %113 = arith.divf %112, %cst_40 : f32
    %114 = vector.broadcast %113 : f32 to vector<4x256xf32>
    %115 = arith.subf %108, %114 : vector<4x256xf32>
    %116 = arith.mulf %115, %115 : vector<4x256xf32>
    %117 = vector.shape_cast %116 : vector<4x256xf32> to vector<1x4x256xf32>
    %cst_41 = arith.constant dense<0.000000e+00> : vector<1xf32>
    %118 = vector.multi_reduction <add>, %117, %cst_41 [1, 2] : vector<1x4x256xf32> to vector<1xf32>
    %119 = vector.shape_cast %118 : vector<1xf32> to vector<1x1x1xf32>
    %120 = vector.extract %119[0, 0, 0] : f32 from vector<1x1x1xf32>
    %cst_42 = arith.constant 1.024000e+03 : f32
    %121 = arith.divf %120, %cst_42 : f32
    %cst_43 = arith.constant 9.99999974E-6 : f32
    %122 = arith.addf %121, %cst_43 : f32
    %123 = math.rsqrt %122 : f32
    %124 = vector.broadcast %123 : f32 to vector<4x256xf32>
    %125 = arith.mulf %115, %124 : vector<4x256xf32>
    %126 = vector.broadcast %3 : vector<4x1xf32> to vector<4x256xf32>
    %127 = arith.mulf %125, %126 : vector<4x256xf32>
    %128 = vector.broadcast %4 : vector<4x1xf32> to vector<4x256xf32>
    %129 = arith.addf %127, %128 : vector<4x256xf32>
    %c1_44 = arith.constant 1 : index
    %c0_45 = arith.constant 0 : index
    %c0_46 = arith.constant 0 : index
    %130 = vector.load %arg9[%c1_44, %c0_45, %c0_46] : memref<2x4x256xf32, #tpu.memory_space<vmem>>, vector<1x4x256xf32>
    %131 = vector.shape_cast %130 : vector<1x4x256xf32> to vector<4x256xf32>
    %132 = vector.shape_cast %129 : vector<4x256xf32> to vector<1x4x256xf32>
    tpu.vector_store %arg9[%c1_44, %c0_45, %c0_46], %132 {strides = array<i32>} : memref<2x4x256xf32, #tpu.memory_space<vmem>>, vector<1x4x256xf32>,
    return
  }
  func.func @transform_0(%arg0: i32) -> (i32, i32, i32) {
    %c0_i32 = arith.constant 0 : i32
    %c0_i32_0 = arith.constant 0 : i32
    %c0_i32_1 = arith.constant 0 : i32
    return %arg0, %c0_i32, %c0_i32_0 : i32, i32, i32
  }
  func.func @transform_1(%arg0: i32) -> (i32, i32) {
    %c0_i32 = arith.constant 0 : i32
    %c0_i32_0 = arith.constant 0 : i32
    %c0_i32_1 = arith.constant 0 : i32
    return %c0_i32, %c0_i32_0 : i32, i32
  }
  func.func @transform_2(%arg0: i32) -> (i32, i32) {
    %c0_i32 = arith.constant 0 : i32
    %c0_i32_0 = arith.constant 0 : i32
    %c0_i32_1 = arith.constant 0 : i32
    return %c0_i32, %c0_i32_0 : i32, i32
  }
  func.func @transform_3(%arg0: i32) -> (i32, i32) {
    %c0_i32 = arith.constant 0 : i32
    %c0_i32_0 = arith.constant 0 : i32
    %c0_i32_1 = arith.constant 0 : i32
    return %c0_i32, %c0_i32_0 : i32, i32
  }
  func.func @transform_4(%arg0: i32) -> (i32, i32) {
    %c0_i32 = arith.constant 0 : i32
    %c0_i32_0 = arith.constant 0 : i32
    %c0_i32_1 = arith.constant 0 : i32
    return %c0_i32, %c0_i32_0 : i32, i32
  }
  func.func @transform_5(%arg0: i32) -> (i32, i32) {
    %c0_i32 = arith.constant 0 : i32
    %c0_i32_0 = arith.constant 0 : i32
    %c0_i32_1 = arith.constant 0 : i32
    return %c0_i32, %c0_i32_0 : i32, i32
  }
  func.func @transform_6(%arg0: i32) -> (i32, i32) {
    %c0_i32 = arith.constant 0 : i32
    %c0_i32_0 = arith.constant 0 : i32
    %c0_i32_1 = arith.constant 0 : i32
    return %c0_i32, %c0_i32_0 : i32, i32
  }
  func.func @transform_7(%arg0: i32) -> (i32, i32) {
    %c0_i32 = arith.constant 0 : i32
    %c0_i32_0 = arith.constant 0 : i32
    %c0_i32_1 = arith.constant 0 : i32
    return %c0_i32, %c0_i32_0 : i32, i32
  }
  func.func @transform_8(%arg0: i32) -> (i32, i32, i32) {
    %c0_i32 = arith.constant 0 : i32
    %c0_i32_0 = arith.constant 0 : i32
    %c0_i32_1 = arith.constant 0 : i32
    return %arg0, %c0_i32, %c0_i32_0 : i32, i32, i32
  }
}

</mosaic_0001>

<bundles_post_ra>
// kernel: tpu_custom_call.1
= control target key start
LH: loop header
LB: loop body
LE: loop exit
PB: predicated region body
PF: predicated region fallthrough
CT: control target
= control target key end

     0   :  { %vm318_vm0 = vcmask 1041408   ;;  %v5449_v3 = vmov 0   ;;  %vm245_vm1 = vcmask 31744   ;;  %s5440_s0 = inlined_call_operand.vmem [shape: bf16[2,4,256], index: 0, kind: input, shape index: {}]   ;;  %s5441_s1 = inlined_call_operand.vmem [shape: bf16[384,4], index: 1, kind: input, shape index: {}]   ;;  %s5442_s2 = inlined_call_operand.vmem [shape: bf16[4,128], index: 2, kind: input, shape index: {}]   ;;  %s5443_s3 = inlined_call_operand.vmem [shape: f32[4,1], index: 3, kind: input, shape index: {}]   ;;  %s5444_s4 = inlined_call_operand.vmem [shape: f32[4,1], index: 4, kind: input, shape index: {}]   ;;  %s5445_s5 = inlined_call_operand.vmem [shape: f32[4,1], index: 5, kind: input, shape index: {}]   ;;  %s5446_s6 = inlined_call_operand.vmem [shape: f32[128,128], index: 6, kind: input, shape index: {}]   ;;  %s5447_s7 = inlined_call_operand.vmem [shape: bf16[128,128], index: 7, kind: input, shape index: {}]   ;;  %s5448_s8 = inlined_call_operand.hbm [shape: f32[2,4,256], index: 8, kind: output, shape index: {}]  }
   0x1   :  { %v2925_v0 = vld.sshfl [vmem:[%s5440_s0] sm:$0x33 pattern:$0x76325410]  ;;  %357 = vmatprep.mubr.bf16.mxu0 %v5449_v3  ;;  %v3021_v5 = vld [vmem:[%s5441_s1 + $0x8] sm:$0xff]   ;;  %v3022_v6 = vld [vmem:[%s5441_s1 + $0x10] sm:$0xff]  }
   0x2   :  { %v244_v1 = vcombine.high %v2925_v0, %v2925_v0  ;;  %v320_v2 = vsel %vm318_vm0, %v2925_v0, 0  ;;  %v3020_v4 = vld [vmem:[%s5441_s1] sm:$0xff]   ;;  %v3023_v7 = vld [vmem:[%s5441_s1 + $0x18] sm:$0xff]  }
   0x4   :  { %2926 = vmatprep.subr.msk.bf16.mxu0 %vm318_vm0, %v244_v1 }
   0x5   :  { %340 = vmatpush1.bf16.msra.mxu0 %v320_v2 }
   0x8   :  { %2927 = vmatmul.mubr.msk.bf16.vlgmr.msra.gmra.mxu0 %vm245_vm1, %v3020_v4 }
   0x9   :  { %367 = vmatprep.mubr.bf16.mxu0 %v5449_v3 }
  0x10   :  { %2928 = vmatmul.mubr.msk.bf16.gmra.mxu0 %vm245_vm1, %v3021_v5 }
  0x11   :  { %377 = vmatprep.mubr.bf16.mxu0 %v5449_v3 }
  0x18   :  { %2929 = vmatmul.mubr.msk.bf16.gmra.mxu0 %vm245_vm1, %v3022_v6 }
  0x19   :  { %387 = vmatprep.mubr.bf16.mxu0 %v5449_v3 }
  0x1a   :  { %13 = vsyncpa [#allocation3], 0  ;;  %v3024_v8 = vld [vmem:[%s5441_s1 + $0x20] sm:$0xff]   ;;  %v3025_v9 = vld [vmem:[%s5441_s1 + $0x28] sm:$0xff]   ;;  %vm1574_vm2 = vcmask 1043456   ;;  %s3568_s13 = smov [#allocation2]  }
  0x1b   :  { %v3026_v10 = vld [vmem:[%s5441_s1 + $0x30] sm:$0xff]   ;;  %v3027_v11 = vld [vmem:[%s5441_s1 + $0x38] sm:$0xff]   ;;  %v3028_v12 = vld [vmem:[%s5441_s1 + $0x40] sm:$0xff]   ;;  %s2890_s14 = sshll.u32 %s3568_s13, 4  ;;  %s2891_s14 = int_to_ptr.vmem [resolvable:$true] %s2890_s14 }
  0x1c   :  { %v3029_v13 = vld [vmem:[%s5441_s1 + $0x48] sm:$0xff]   ;;  %v3030_v14 = vld [vmem:[%s5441_s1 + $0x50] sm:$0xff]   ;;  %v3031_v15 = vld [vmem:[%s5441_s1 + $0x58] sm:$0xff]   ;;  %s3545_s15 = scalar_lea.vmem %s2891_s14, 256  ;;  %p3550_p1 = scmp.lt.s32.totalorder %s2891_s14, %s2891_s14 }
  0x1d   :  { %v3032_v16 = vld [vmem:[%s5441_s1 + $0x60] sm:$0xff]   ;;  %v3033_v17 = vld [vmem:[%s5441_s1 + $0x68] sm:$0xff]   ;;  %v3034_v18 = vld [vmem:[%s5441_s1 + $0x70] sm:$0xff]   ;;  %p3546_p0 = scmp.ne.s32.totalorder %s2891_s14, %s3545_s15  ;;  %p3551_p2 = scmp.lt.s32.totalorder %s3545_s15, %s3545_s15 }
  0x1e   :  { %v3035_v19 = vld [vmem:[%s5441_s1 + $0x78] sm:$0xff]   ;;  %v3036_v20 = vld [vmem:[%s5441_s1 + $0x80] sm:$0xff]   ;;  %v3037_v21 = vld [vmem:[%s5441_s1 + $0x88] sm:$0xff]  }
  0x1f   :  { %v3038_v22 = vld [vmem:[%s5441_s1 + $0x90] sm:$0xff]   ;;  %v3039_v23 = vld [vmem:[%s5441_s1 + $0x98] sm:$0xff]   ;;  %v3040_v24 = vld [vmem:[%s5441_s1 + $0xa0] sm:$0xff]   ;;  %p3552_p3 = por %p3551_p2, %p3550_p1 }
  0x20   :  { %2930 = vmatmul.mubr.msk.bf16.gmra.mxu0 %vm245_vm1, %v3023_v7  ;;  %v3041_v25 = vld [vmem:[%s5441_s1 + $0xa8] sm:$0xff]   ;;  %v3042_v26 = vld [vmem:[%s5441_s1 + $0xb0] sm:$0xff]   ;;  %v3043_v27 = vld [vmem:[%s5441_s1 + $0xb8] sm:$0xff]  }
  0x21   :  { %397 = vmatprep.mubr.bf16.mxu0 %v5449_v3  ;;  %p3553_p4 = pnand %p3552_p3, %p3546_p0 }
  0x28   :  { %2931 = vmatmul.mubr.msk.bf16.gmra.mxu0 %vm245_vm1, %v3024_v8 }
  0x29   :  { %407 = vmatprep.mubr.bf16.mxu0 %v5449_v3 }
  0x30   :  { %2932 = vmatmul.mubr.msk.bf16.gmra.mxu0 %vm245_vm1, %v3025_v9 }
  0x31   :  { %417 = vmatprep.mubr.bf16.mxu0 %v5449_v3 }
  0x38   :  { %2933 = vmatmul.mubr.msk.bf16.gmra.mxu0 %vm245_vm1, %v3026_v10 }
  0x39   :  { %427 = vmatprep.mubr.bf16.mxu0 %v5449_v3 }
  0x40   :  { %2934 = vmatmul.mubr.msk.bf16.gmra.mxu0 %vm245_vm1, %v3027_v11 }
  0x41   :  { %437 = vmatprep.mubr.bf16.mxu0 %v5449_v3 }
  0x48   :  { %2935 = vmatmul.mubr.msk.bf16.gmra.mxu0 %vm245_vm1, %v3028_v12 }
  0x49   :  { %447 = vmatprep.mubr.bf16.mxu0 %v5449_v3 }
  0x50   :  { %2936 = vmatmul.mubr.msk.bf16.gmra.mxu0 %vm245_vm1, %v3029_v13 }
  0x51   :  { %457 = vmatprep.mubr.bf16.mxu0 %v5449_v3 }
  0x58   :  { %2937 = vmatmul.mubr.msk.bf16.gmra.mxu0 %vm245_vm1, %v3030_v14 }
  0x59   :  { %467 = vmatprep.mubr.bf16.mxu0 %v5449_v3 }
  0x60   :  { %2938 = vmatmul.mubr.msk.bf16.gmra.mxu0 %vm245_vm1, %v3031_v15 }
  0x61   :  { %477 = vmatprep.mubr.bf16.mxu0 %v5449_v3 }
  0x68   :  { %2939 = vmatmul.mubr.msk.bf16.gmra.mxu0 %vm245_vm1, %v3032_v16 }
  0x69   :  { %487 = vmatprep.mubr.bf16.mxu0 %v5449_v3 }
  0x70   :  { %2940 = vmatmul.mubr.msk.bf16.gmra.mxu0 %vm245_vm1, %v3033_v17 }
  0x71   :  { %497 = vmatprep.mubr.bf16.mxu0 %v5449_v3 }
  0x78   :  { %2941 = vmatmul.mubr.msk.bf16.gmra.mxu0 %vm245_vm1, %v3034_v18 }
  0x79   :  { %507 = vmatprep.mubr.bf16.mxu0 %v5449_v3 }
  0x80   :  { %2942 = vmatmul.mubr.msk.bf16.gmra.mxu0 %vm245_vm1, %v3035_v19 }
  0x81   :  { %517 = vmatprep.mubr.bf16.mxu0 %v5449_v3 }
  0x88   :  { %2943 = vmatmul.mubr.msk.bf16.gmra.mxu0 %vm245_vm1, %v3036_v20 }
  0x89   :  { %527 = vmatprep.mubr.bf16.mxu0 %v5449_v3 }
  0x90   :  { %2944 = vmatmul.mubr.msk.bf16.gmra.mxu0 %vm245_vm1, %v3037_v21 }
  0x91   :  { %537 = vmatprep.mubr.bf16.mxu0 %v5449_v3 }
  0x98   :  { %2945 = vmatmul.mubr.msk.bf16.gmra.mxu0 %vm245_vm1, %v3038_v22 }
  0x99   :  { %547 = vmatprep.mubr.bf16.mxu0 %v5449_v3 }
  0xa0   :  { %2946 = vmatmul.mubr.msk.bf16.gmra.mxu0 %vm245_vm1, %v3039_v23 }
  0xa1   :  { %557 = vmatprep.mubr.bf16.mxu0 %v5449_v3 }
  0xa8   :  { %2947 = vmatmul.mubr.msk.bf16.gmra.mxu0 %vm245_vm1, %v3040_v24 }
  0xa9   :  { %567 = vmatprep.mubr.bf16.mxu0 %v5449_v3 }
  0xb0   :  { %2948 = vmatmul.mubr.msk.bf16.gmra.mxu0 %vm245_vm1, %v3041_v25 }
  0xb1   :  { %577 = vmatprep.mubr.bf16.mxu0 %v5449_v3 }
  0xb8   :  { %2949 = vmatmul.mubr.msk.bf16.gmra.mxu0 %vm245_vm1, %v3042_v26 }
  0xb9   :  { %587 = vmatprep.mubr.bf16.mxu0 %v5449_v3 }
  0xc0   :  { %2950 = vmatmul.mubr.msk.bf16.gmra.mxu0 %vm245_vm1, %v3043_v27 }
  0xc8   :  { %v359_v28 = vpop.f32.mrf.mxu0 }
  0xca   :  { %v361_v29 = vpop.f32.mrf.mxu0 }
  0xcc   :  { %v363_v30 = vpop.f32.mrf.mxu0 }
  0xcd   :  { %v870_v31 = vmax.f32 %v359_v28, %v363_v30 }
  0xce   :  { %v365_v32 = vpop.f32.mrf.mxu0 }
  0xcf   :  { %v879_v34 = vmax.f32 %v361_v29, %v365_v32 }
  0xd0   :  { %v369_v33 = vpop.f32.mrf.mxu0 }
  0xd1   :  { %v871_v35 = vmax.f32 %v870_v31, %v369_v33 }
  0xd2   :  { %v371_v36 = vpop.f32.mrf.mxu0 }
  0xd3   :  { %v880_v37 = vmax.f32 %v879_v34, %v371_v36 }
  0xd4   :  { %v373_v38 = vpop.f32.mrf.mxu0 }
  0xd5   :  { %v872_v39 = vmax.f32 %v871_v35, %v373_v38 }
  0xd6   :  { %v375_v40 = vpop.f32.mrf.mxu0 }
  0xd7   :  { %v873_v41 = vrot.slane %v872_v39, 4  ;;  %v881_v42 = vmax.f32 %v880_v37, %v375_v40 }
  0xd8   :  { %v3741_v43 = vpop.f32.mrf.mxu0 }
  0xd9   :  { %v874_v44 = vmax.f32 %v872_v39, %v873_v41  ;;  %v882_v45 = vrot.slane %v881_v42, 4 }
  0xda   :  { %v3743_v46 = vpop.f32.mrf.mxu0 }
  0xdb   :  { %v875_v47 = vrot.slane %v874_v44, 2  ;;  %v883_v48 = vmax.f32 %v881_v42, %v882_v45 }
  0xdc   :  { %v3745_v49 = vpop.f32.mrf.mxu0 }
  0xdd   :  { %v876_v50 = vmax.f32 %v874_v44, %v875_v47  ;;  %v884_v51 = vrot.slane %v883_v48, 2  ;;  %v888_v52 = vmax.f32 %v3741_v43, %v3745_v49 }
  0xde   :  { %v3749_v53 = vpop.f32.mrf.mxu0 }
  0xdf   :  { %v877_v54 = vrot.slane %v876_v50, 1  ;;  %v885_v55 = vmax.f32 %v883_v48, %v884_v51  ;;  %v897_v60 = vmax.f32 %v3743_v46, %v3749_v53 }
  0xe0   :  { %v3751_v56 = vpop.f32.mrf.mxu0 }
  0xe1   :  { %v878_v57 = vmax.f32 %v876_v50, %v877_v54  ;;  %v886_v58 = vrot.slane %v885_v55, 1  ;;  %v889_v59 = vmax.f32 %v888_v52, %v3751_v56 }
  0xe2   :  { %v3756_v61 = vpop.f32.mrf.mxu0 }
  0xe3   :  { %v942_v62 = vsub.f32 %v359_v28, %v878_v57  ;;  %v944_v63 = vsub.f32 %v363_v30, %v878_v57  ;;  %v946_v0 = vsub.f32 %v369_v33, %v878_v57  ;;  %v948_v1 = vsub.f32 %v373_v38, %v878_v57 }
  0xe4   :  { %v887_v2 = vmax.f32 %v885_v55, %v886_v58  ;;  %v898_v4 = vmax.f32 %v897_v60, %v3756_v61  ;;  %v393_v5 = vpop.f32.mrf.mxu0 }
  0xe5   :  { %v974_v6 = vmul.f32 1.442695, %v942_v62  ;;  %v978_v7 = vmul.f32 1.442695, %v944_v63  ;;  %v982_v8 = vmul.f32 1.442695, %v946_v0  ;;  %v890_v9 = vmax.f32 %v889_v59, %v393_v5 }
  0xe6   :  { %v986_v10 = vmul.f32 1.442695, %v948_v1  ;;  %v943_v11 = vsub.f32 %v361_v29, %v887_v2  ;;  %v945_v12 = vsub.f32 %v365_v32, %v887_v2  ;;  %v947_v13 = vsub.f32 %v371_v36, %v887_v2  ;;  %v3759_v14 = vpop.f32.mrf.mxu0 }
  0xe7   :  { %3052 = vpow2.f32 %v974_v6  ;;  %v949_v15 = vsub.f32 %v375_v40, %v887_v2  ;;  %v891_v16 = vrot.slane %v890_v9, 4  ;;  %v899_v17 = vmax.f32 %v898_v4, %v3759_v14 }
  0xe8   :  { %3054 = vpow2.f32 %v978_v7  ;;  %v976_v18 = vmul.f32 1.442695, %v943_v11  ;;  %v984_v19 = vmul.f32 1.442695, %v947_v13  ;;  %v3762_v20 = vpop.f32.mrf.mxu0  ;;  %v980_v24 = vmul.f32 1.442695, %v945_v12 }
  0xe9   :  { %3056 = vpow2.f32 %v982_v8  ;;  %v988_v21 = vmul.f32 1.442695, %v949_v15  ;;  %v892_v22 = vmax.f32 %v890_v9, %v891_v16  ;;  %v900_v23 = vrot.slane %v899_v17, 4 }
  0xea   :  { %3058 = vpow2.f32 %v986_v10  ;;  %v3764_v25 = vpop.f32.mrf.mxu0 }
  0xeb   :  { %3060 = vpow2.f32 %v988_v21  ;;  %v893_v26 = vrot.slane %v892_v22, 2  ;;  %v901_v27 = vmax.f32 %v899_v17, %v900_v23 }
  0xec   :  { %v3766_v28 = vpop.f32.mrf.mxu0  ;;  %3062 = vpow2.f32 %v984_v19 }
  0xed   :  { %v894_v29 = vmax.f32 %v892_v22, %v893_v26  ;;  %v902_v30 = vrot.slane %v901_v27, 2  ;;  %v906_v31 = vmax.f32 %v3762_v20, %v3766_v28  ;;  %3064 = vpow2.f32 %v976_v18 }
  0xee   :  { %v3770_v32 = vpop.f32.mrf.mxu0  ;;  %3066 = vpow2.f32 %v980_v24 }
  0xef   :  { %v895_v33 = vrot.slane %v894_v29, 1  ;;  %v903_v34 = vmax.f32 %v901_v27, %v902_v30  ;;  %v915_v39 = vmax.f32 %v3764_v25, %v3770_v32 }
  0xf0   :  { %v3772_v35 = vpop.f32.mrf.mxu0 }
  0xf1   :  { %v896_v36 = vmax.f32 %v894_v29, %v895_v33  ;;  %v904_v37 = vrot.slane %v903_v34, 1  ;;  %v907_v38 = vmax.f32 %v906_v31, %v3772_v35 }
  0xf2   :  { %v3777_v40 = vpop.f32.mrf.mxu0 }
  0xf3   :  { %v950_v41 = vsub.f32 %v3741_v43, %v896_v36  ;;  %v952_v42 = vsub.f32 %v3745_v49, %v896_v36  ;;  %v954_v44 = vsub.f32 %v3751_v56, %v896_v36  ;;  %v956_v45 = vsub.f32 %v393_v5, %v896_v36 }
  0xf4   :  { %v3782_v47 = vpop.eup %3052  ;;  %v905_v48 = vmax.f32 %v903_v34, %v904_v37  ;;  %v916_v50 = vmax.f32 %v915_v39, %v3777_v40  ;;  %v3785_v51 = vpop.f32.mrf.mxu0 }
  0xf5   :  { %5540 = vst [vmem:[#allocation5_spill] sm:$0xff] %v3782_v47  ;;  %v3787_v52 = vpop.eup %3054  ;;  %v990_v54 = vmul.f32 1.442695, %v950_v41  ;;  %v994_v55 = vmul.f32 1.442695, %v952_v42  ;;  %v908_v58 = vmax.f32 %v907_v38, %v3785_v51 }
  0xf6   :  { %5541 = vst [vmem:[#allocation6_spill] sm:$0xff] %v3787_v52  ;;  %v998_v57 = vmul.f32 1.442695, %v954_v44  ;;  %v3790_v43 = vpop.eup %3056  ;;  %v1002_v49 = vmul.f32 1.442695, %v956_v45  ;;  %v951_v56 = vsub.f32 %v3743_v46, %v905_v48  ;;  %v953_v59 = vsub.f32 %v3749_v53, %v905_v48  ;;  %v3795_v62 = vpop.f32.mrf.mxu0 }
  0xf7   :  { %5542 = vst [vmem:[#allocation7_spill] sm:$0xff] %v3790_v43  ;;  %v955_v60 = vsub.f32 %v3756_v61, %v905_v48  ;;  %v3797_v63 = vpop.eup %3058  ;;  %3068 = vpow2.f32 %v990_v54  ;;  %v957_v0 = vsub.f32 %v3759_v14, %v905_v48  ;;  %v909_v1 = vrot.slane %v908_v58, 4 }
  0xf8   :  { %5543 = vst [vmem:[#allocation8_spill] sm:$0xff] %v3797_v63  ;;  %v917_v2 = vmax.f32 %v916_v50, %v3795_v62  ;;  %v3801_v4 = vpop.eup %3060  ;;  %3070 = vpow2.f32 %v994_v55  ;;  %v992_v5 = vmul.f32 1.442695, %v951_v56  ;;  %v996_v6 = vmul.f32 1.442695, %v953_v59  ;;  %v3803_v7 = vpop.f32.mrf.mxu0 }
  0xf9   :  { %5544 = vst [vmem:[#allocation9_spill] sm:$0xff] %v3801_v4  ;;  %v1000_v46 = vmul.f32 1.442695, %v955_v60  ;;  %v3805_v53 = vpop.eup %3062  ;;  %3072 = vpow2.f32 %v998_v57  ;;  %v1004_v61 = vmul.f32 1.442695, %v957_v0  ;;  %v910_v8 = vmax.f32 %v908_v58, %v909_v1 }
  0xfa   :  { %5545 = vst [vmem:[#allocation10_spill] sm:$0xff] %v3805_v53  ;;  %v918_v9 = vrot.slane %v917_v2, 4  ;;  %v3807_v10 = vpop.eup %3064  ;;  %3074 = vpow2.f32 %v1002_v49  ;;  %v3809_v11 = vpop.f32.mrf.mxu0 }
  0xfb   :  { %5546 = vst [vmem:[#allocation11_spill] sm:$0xff] %v3807_v10  ;;  %v3817_v15 = vpop.eup %3066  ;;  %3076 = vpow2.f32 %v1004_v61  ;;  %v911_v16 = vrot.slane %v910_v8, 2 }
  0xfc   :  { %5547 = vst [vmem:[#allocation12_spill] sm:$0xff] %v3817_v15  ;;  %v919_v17 = vmax.f32 %v917_v2, %v918_v9  ;;  %v3819_v18 = vpop.f32.mrf.mxu0  ;;  %3078 = vpow2.f32 %v1000_v46 }
  0xfd   :  { %v912_v21 = vmax.f32 %v910_v8, %v911_v16  ;;  %v924_v23 = vmax.f32 %v3803_v7, %v3819_v18  ;;  %3080 = vpow2.f32 %v992_v5 }
  0xfe   :  { %v920_v22 = vrot.slane %v919_v17, 2  ;;  %v3825_v24 = vpop.f32.mrf.mxu0  ;;  %3082 = vpow2.f32 %v996_v6 }
  0xff   :  { %v913_v26 = vrot.slane %v912_v21, 1  ;;  %v933_v34 = vmax.f32 %v3809_v11, %v3825_v24 }
 0x100   :  { %v921_v27 = vmax.f32 %v919_v17, %v920_v22  ;;  %v3827_v29 = vpop.f32.mrf.mxu0 }
 0x101   :  { %v914_v30 = vmax.f32 %v912_v21, %v913_v26  ;;  %v925_v33 = vmax.f32 %v924_v23, %v3827_v29 }
 0x102   :  { %v922_v31 = vrot.slane %v921_v27, 1  ;;  %v3832_v36 = vpop.f32.mrf.mxu0 }
 0x103   :  { %v958_v37 = vsub.f32 %v3762_v20, %v914_v30  ;;  %v960_v38 = vsub.f32 %v3766_v28, %v914_v30  ;;  %v962_v39 = vsub.f32 %v3772_v35, %v914_v30  ;;  %v964_v41 = vsub.f32 %v3785_v51, %v914_v30 }
 0x104   :  { %v3838_v42 = vpop.eup %3068  ;;  %v923_v44 = vmax.f32 %v921_v27, %v922_v31  ;;  %v934_v45 = vmax.f32 %v933_v34, %v3832_v36  ;;  %v3841_v48 = vpop.f32.mrf.mxu0 }
 0x105   :  { %5548 = vst [vmem:[#allocation13_spill] sm:$0xff] %v3838_v42  ;;  %v3843_v50 = vpop.eup %3070  ;;  %v1006_v54 = vmul.f32 1.442695, %v958_v37  ;;  %v1010_v55 = vmul.f32 1.442695, %v960_v38  ;;  %v926_v20 = vmax.f32 %v925_v33, %v3841_v48 }
 0x106   :  { %5549 = vst [vmem:[#allocation14_spill] sm:$0xff] %v3843_v50  ;;  %v1014_v57 = vmul.f32 1.442695, %v962_v39  ;;  %v3846_v58 = vpop.eup %3072  ;;  %v1018_v28 = vmul.f32 1.442695, %v964_v41  ;;  %v959_v35 = vsub.f32 %v3764_v25, %v923_v44  ;;  %v961_v51 = vsub.f32 %v3770_v32, %v923_v44  ;;  %v3851_v56 = vpop.f32.mrf.mxu0 }
 0x107   :  { %5550 = vst [vmem:[#allocation15_spill] sm:$0xff] %v3846_v58  ;;  %v963_v49 = vsub.f32 %v3777_v40, %v923_v44  ;;  %v3853_v59 = vpop.eup %3074  ;;  %3084 = vpow2.f32 %v1006_v54  ;;  %v965_v60 = vsub.f32 %v3795_v62, %v923_v44  ;;  %v927_v0 = vrot.slane %v926_v20, 4 }
 0x108   :  { %5551 = vst [vmem:[#allocation16_spill] sm:$0xff] %v3853_v59  ;;  %v935_v1 = vmax.f32 %v934_v45, %v3851_v56  ;;  %v3857_v2 = vpop.eup %3076  ;;  %3086 = vpow2.f32 %v1010_v55  ;;  %v1008_v5 = vmul.f32 1.442695, %v959_v35  ;;  %v1012_v6 = vmul.f32 1.442695, %v961_v51  ;;  %v3859_v46 = vpop.f32.mrf.mxu0 }
 0x109   :  { %5552 = vst [vmem:[#allocation17_spill] sm:$0xff] %v3857_v2  ;;  %v1016_v25 = vmul.f32 1.442695, %v963_v49  ;;  %v3861_v32 = vpop.eup %3078  ;;  %3088 = vpow2.f32 %v1014_v57  ;;  %v1020_v40 = vmul.f32 1.442695, %v965_v60  ;;  %v928_v61 = vmax.f32 %v926_v20, %v927_v0 }
 0x10a   :  { %5553 = vst [vmem:[#allocation18_spill] sm:$0xff] %v3861_v32  ;;  %v936_v8 = vrot.slane %v935_v1, 4  ;;  %v3863_v9 = vpop.eup %3080  ;;  %3090 = vpow2.f32 %v1018_v28  ;;  %v3865_v62 = vpop.f32.mrf.mxu0 }
 0x10b   :  { %5554 = vst [vmem:[#allocation19_spill] sm:$0xff] %v3863_v9  ;;  %v3873_v22 = vpop.eup %3082  ;;  %3092 = vpow2.f32 %v1020_v40  ;;  %v929_v23 = vrot.slane %v928_v61, 2  ;;  %v614_v27 = vmax.f32 %v3859_v46, %v3865_v62 }
 0x10c   :  { %5555 = vst [vmem:[#allocation20_spill] sm:$0xff] %v3873_v22  ;;  %v937_v26 = vmax.f32 %v935_v1, %v936_v8  ;;  %v3877_v30 = vpop.f32.mrf.mxu0  ;;  %3094 = vpow2.f32 %v1016_v25 }
 0x10d   :  { %v930_v33 = vmax.f32 %v928_v61, %v929_v23  ;;  %615 = vmax.xlane.f32.xlu0 %v614_v27  ;;  %3096 = vpow2.f32 %v1008_v5 }
 0x10e   :  { %v938_v34 = vrot.slane %v937_v26, 2  ;;  %v3881_v37 = vpop.f32.mrf.mxu0  ;;  %3098 = vpow2.f32 %v1012_v6 }
 0x10f   :  { %v931_v38 = vrot.slane %v930_v33, 1  ;;  %v617_v41 = vmax.f32 %v3877_v30, %v3881_v37 }
 0x110   :  { %v939_v39 = vmax.f32 %v937_v26, %v938_v34  ;;  %v3885_v44 = vpop.f32.mrf.mxu0 }
 0x111   :  { %v932_v45 = vmax.f32 %v930_v33, %v931_v38  ;;  %618 = vmax.xlane.f32.xlu0 %v617_v41 }
 0x112   :  { %v940_v54 = vrot.slane %v939_v39, 1  ;;  %v3887_v55 = vpop.f32.mrf.mxu0 }
 0x113   :  { %v966_v57 = vsub.f32 %v3803_v7, %v932_v45  ;;  %v968_v20 = vsub.f32 %v3819_v18, %v932_v45  ;;  %v970_v28 = vsub.f32 %v3827_v29, %v932_v45  ;;  %v972_v35 = vsub.f32 %v3841_v48, %v932_v45 }
 0x114   :  { %v3893_v51 = vpop.eup %3084  ;;  %v941_v49 = vmax.f32 %v939_v39, %v940_v54  ;;  %v3895_v60 = vpop.f32.mrf.mxu0  ;;  %v620_v0 = vmax.f32 %v3885_v44, %v3887_v55 }
 0x115   :  { %5556 = vst [vmem:[#allocation21_spill] sm:$0xff] %v3893_v51  ;;  %v3899_v1 = vpop.eup %3086  ;;  %v1022_v5 = vmul.f32 1.442695, %v966_v57  ;;  %v1026_v6 = vmul.f32 1.442695, %v968_v20 }
 0x116   :  { %5557 = vst [vmem:[#allocation22_spill] sm:$0xff] %v3899_v1  ;;  %v1030_v25 = vmul.f32 1.442695, %v970_v28  ;;  %v3901_v7 = vpop.eup %3088  ;;  %v1034_v18 = vmul.f32 1.442695, %v972_v35  ;;  %v967_v29 = vsub.f32 %v3809_v11, %v941_v49  ;;  %v969_v48 = vsub.f32 %v3825_v24, %v941_v49  ;;  %621 = vmax.xlane.f32.xlu1 %v620_v0  ;;  %v3906_v61 = vpop.f32.mrf.mxu0 }
 0x117   :  { %5558 = vst [vmem:[#allocation23_spill] sm:$0xff] %v3901_v7  ;;  %v971_v40 = vsub.f32 %v3832_v36, %v941_v49  ;;  %v3908_v8 = vpop.eup %3090  ;;  %3100 = vpow2.f32 %v1022_v5  ;;  %v973_v23 = vsub.f32 %v3851_v56, %v941_v49  ;;  %v623_v26 = vmax.f32 %v3895_v60, %v3906_v61 }
 0x118   :  { %5559 = vst [vmem:[#allocation24_spill] sm:$0xff] %v3908_v8  ;;  %v3915_v33 = vpop.eup %3092  ;;  %3102 = vpow2.f32 %v1026_v6  ;;  %v3917_v24 = vpop.f32.mrf.mxu0  ;;  %v1024_v34 = vmul.f32 1.442695, %v967_v29  ;;  %v1028_v41 = vmul.f32 1.442695, %v969_v48 }
 0x119   :  { %5560 = vst [vmem:[#allocation25_spill] sm:$0xff] %v3915_v33  ;;  %v1032_v11 = vmul.f32 1.442695, %v971_v40  ;;  %v3919_v36 = vpop.eup %3094  ;;  %3104 = vpow2.f32 %v1030_v25  ;;  %v1036_v38 = vmul.f32 1.442695, %v973_v23 }
 0x11a   :  { %5561 = vst [vmem:[#allocation26_spill] sm:$0xff] %v3919_v36  ;;  %v3923_v39 = vpop.eup %3096  ;;  %3106 = vpow2.f32 %v1034_v18  ;;  %624 = vmax.xlane.f32.xlu1 %v623_v26  ;;  %v3925_v45 = vpop.f32.mrf.mxu0 }
 0x11b   :  { %5562 = vst [vmem:[#allocation27_spill] sm:$0xff] %v3923_v39  ;;  %v3929_v57 = vpop.eup %3098  ;;  %3108 = vpow2.f32 %v1036_v38  ;;  %v626_v17 = vmax.f32 %v3917_v24, %v3925_v45 }
 0x11c   :  { %5563 = vst [vmem:[#allocation28_spill] sm:$0xff] %v3929_v57  ;;  %v3931_v20 = vpop.f32.mrf.mxu0  ;;  %3110 = vpow2.f32 %v1032_v11 }
 0x11d   :  { %3112 = vpow2.f32 %v1024_v34 }
 0x11e   :  { %v3935_v35 = vpop.f32.mrf.mxu0  ;;  %3114 = vpow2.f32 %v1028_v41 }
 0x11f   :  { %v629_v28 = vmax.f32 %v3931_v20, %v3935_v35 }
 0x120   :  { %v3937_v49 = vpop.f32.mrf.mxu0 }
 0x122   :  { %v3939_v0 = vpop.f32.mrf.mxu0 }
 0x123   :  { %v632_v48 = vmax.f32 %v3937_v49, %v3939_v0 }
 0x124   :  { %v3941_v5 = vpop.eup %3100  ;;  %v3943_v6 = vpop.f32.mrf.mxu0 }
 0x125   :  { %5564 = vst [vmem:[#allocation29_spill] sm:$0xff] %v3941_v5  ;;  %v3945_v25 = vpop.eup %3102 }
 0x126   :  { %5565 = vst [vmem:[#allocation30_spill] sm:$0xff] %v3945_v25  ;;  %v3947_v18 = vpop.eup %3104  ;;  %v3949_v29 = vpop.f32.mrf.mxu0 }
 0x127   :  { %5566 = vst [vmem:[#allocation31_spill] sm:$0xff] %v3947_v18  ;;  %v3953_v40 = vpop.eup %3106  ;;  %v635_v11 = vmax.f32 %v3943_v6, %v3949_v29 }
 0x128   :  { %5567 = vst [vmem:[#allocation32_spill] sm:$0xff] %v3953_v40  ;;  %v3955_v23 = vpop.eup %3108  ;;  %v3957_v26 = vpop.f32.mrf.mxu0 }
 0x129   :  { %v3961_v34 = vpop.eup %3110 }
 0x12a   :  { %v3963_v38 = vpop.eup %3112  ;;  %v3965_v41 = vpop.f32.mrf.mxu0 }
 0x12b   :  { %5568 = vst [vmem:[#allocation33_spill] sm:$0xff] %v3963_v38  ;;  %v3969_v19 = vpop.eup %3114  ;;  %v638_v13 = vmax.f32 %v3957_v26, %v3965_v41 }
 0x12c   :  { %5569 = vst [vmem:[#allocation34_spill] sm:$0xff] %v3969_v19  ;;  %v3973_v12 = vpop.f32.mrf.mxu0 }
 0x12d   :  { %639 = vmax.xlane.f32.xlu0 %v638_v13 }
 0x12e   :  { %v3977_v31 = vpop.f32.mrf.mxu0 }
 0x12f   :  { %v641_v16 = vmax.f32 %v3973_v12, %v3977_v31 }
 0x130   :  { %v3983_v3 = vpop.f32.mrf.mxu0 }
 0x131   :  { %627 = vmax.xlane.f32.xlu0 %v626_v17  ;;  %642 = vmax.xlane.f32.xlu1 %v641_v16 }
 0x132   :  { %v3985_v27 = vpop.f32.mrf.mxu0 }
 0x133   :  { %v644_v13 = vmax.f32 %v3983_v3, %v3985_v27 }
 0x134   :  { %v3991_v56 = vpop.f32.mrf.mxu0 }
 0x135   :  { %630 = vmax.xlane.f32.xlu1 %v629_v28  ;;  %645 = vmax.xlane.f32.xlu0 %v644_v13 }
 0x136   :  { %v3993_v54 = vpop.f32.mrf.mxu0 }
 0x137   :  { %v647_v16 = vmax.f32 %v3991_v56, %v3993_v54 }
 0x138   :  { %v3999_v17 = vpop.f32.mrf.mxu0 }
 0x139   :  { %633 = vmax.xlane.f32.xlu0 %v632_v48  ;;  %648 = vmax.xlane.f32.xlu1 %v647_v16 }
 0x13a   :  { %v4001_v21 = vpop.f32.mrf.mxu0 }
 0x13b   :  { %v650_v28 = vmax.f32 %v3999_v17, %v4001_v21 }
 0x13c   :  { %v4007_v13 = vpop.f32.mrf.mxu0 }
 0x13d   :  { %5570 = vst [vmem:[#allocation35_spill] sm:$0xff] %v4007_v13  ;;  %636 = vmax.xlane.f32.xlu1 %v635_v11  ;;  %651 = vmax.xlane.f32.xlu0 %v650_v28 }
 0x13e   :  { %v4009_v14 = vpop.f32.mrf.mxu0 }
 0x13f   :  { %5571 = vst [vmem:[#allocation36_spill] sm:$0xff] %v4009_v14  ;;  %v653_v47 = vmax.f32 %v4007_v13, %v4009_v14 }
 0x140   :  { %v4013_v52 = vpop.f32.mrf.mxu0 }
 0x141   :  { %5572 = vst [vmem:[#allocation37_spill] sm:$0xff] %v4013_v52  ;;  %654 = vmax.xlane.f32.xlu1 %v653_v47 }
 0x142   :  { %v4015_v48 = vpop.f32.mrf.mxu0 }
 0x143   :  { %5573 = vst [vmem:[#allocation38_spill] sm:$0xff] %v4015_v48  ;;  %v656_v16 = vmax.f32 %v4013_v52, %v4015_v48 }
 0x144   :  { %v4019_v10 = vpop.f32.mrf.mxu0 }
 0x145   :  { %5574 = vst [vmem:[#allocation39_spill] sm:$0xff] %v4019_v10  ;;  %657 = vmax.xlane.f32.xlu0 %v656_v16 }
 0x146   :  { %v4021_v15 = vpop.f32.mrf.mxu0 }
 0x147   :  { %5575 = vst [vmem:[#allocation40_spill] sm:$0xff] %v4021_v15  ;;  %v659_v11 = vmax.f32 %v4019_v10, %v4021_v15 }
 0x148   :  { %v519_v28 = vpop.f32.mrf.mxu0 }
 0x149   :  { %660 = vmax.xlane.f32.xlu1 %v659_v11 }
 0x14a   :  { %v4025_v43 = vpop.f32.mrf.mxu0 }
 0x14c   :  { %v523_v63 = vpop.f32.mrf.mxu0 }
 0x14d   :  { %v4027_v53 = vpack.c.bf16 %v523_v63, %v519_v28 }
 0x14e   :  { %v4029_v47 = vpop.f32.mrf.mxu0 }
 0x150   :  { %v529_v4 = vpop.f32.mrf.mxu0 }
 0x152   :  { %v4031_v42 = vpop.f32.mrf.mxu0 }
 0x154   :  { %v533_v50 = vpop.f32.mrf.mxu0 }
 0x155   :  { %v4033_v9 = vpack.c.bf16 %v533_v50, %v529_v4 }
 0x156   :  { %v4035_v16 = vpop.f32.mrf.mxu0 }
 0x158   :  { %v539_v22 = vpop.f32.mrf.mxu0 }
 0x15a   :  { %v4037_v58 = vpop.f32.mrf.mxu0 }
 0x15c   :  { %v543_v59 = vpop.f32.mrf.mxu0 }
 0x15d   :  { %v4039_v11 = vpack.c.bf16 %v543_v59, %v539_v22 }
 0x15e   :  { %v4041_v32 = vpop.f32.mrf.mxu0 }
 0x160   :  { %v549_v63 = vpop.f32.mrf.mxu0 }
 0x162   :  { %v551_v28 = vpop.f32.mrf.mxu0 }
 0x164   :  { %v553_v2 = vpop.f32.mrf.mxu0 }
 0x165   :  { %v4043_v51 = vpack.c.bf16 %v553_v2, %v549_v63 }
 0x166   :  { %v555_v1 = vpop.f32.mrf.mxu0 }
 0x168   :  { %v559_v39 = vpop.f32.mrf.mxu0 }
 0x16a   :  { %v561_v57 = vpop.f32.mrf.mxu0 }
 0x16c   :  { %v563_v4 = vpop.f32.mrf.mxu0 }
 0x16e   :  { %v565_v50 = vpop.f32.mrf.mxu0 }
 0x16f   :  { %v607_v13 = vpack.c.bf16 %v565_v50, %v561_v57 }
 0x170   :  { %v569_v7 = vpop.f32.mrf.mxu0 }
 0x172   :  { %v571_v8 = vpop.f32.mrf.mxu0 }
 0x174   :  { %v573_v36 = vpop.f32.mrf.mxu0 }
 0x175   :  { %v608_v52 = vpack.c.bf16 %v573_v36, %v569_v7  ;;  %v605_v36 = vpack.c.bf16 %v555_v1, %v551_v28 }
 0x176   :  { %v575_v33 = vpop.f32.mrf.mxu0 }
 0x177   :  { %v609_v48 = vpack.c.bf16 %v575_v33, %v571_v8  ;;  %v606_v33 = vpack.c.bf16 %v563_v4, %v559_v39 }
 0x178   :  { %v579_v5 = vpop.f32.mrf.mxu0 }
 0x17a   :  { %v581_v25 = vpop.f32.mrf.mxu0 }
 0x17c   :  { %v583_v59 = vpop.f32.mrf.mxu0 }
 0x17d   :  { %v610_v10 = vpack.c.bf16 %v583_v59, %v579_v5 }
 0x17e   :  { %v585_v22 = vpop.f32.mrf.mxu0 }
 0x17f   :  { %v611_v2 = vpack.c.bf16 %v585_v22, %v581_v25 }
 0x180   :  { %v589_v38 = vpop.f32.mrf.mxu0 }
 0x182   :  { %v591_v19 = vpop.f32.mrf.mxu0 }
 0x184   :  { %v593_v18 = vpop.f32.mrf.mxu0 }
 0x185   :  { %v612_v40 = vpack.c.bf16 %v593_v18, %v589_v38 }
 0x186   :  { %v595_v15 = vpop.f32.mrf.mxu0 }
 0x187   :  { %v613_v63 = vpack.c.bf16 %v595_v15, %v591_v19 }
 0x189   :  { %1054 = vmatprep.subr.bf16.mxu0 %v613_v63  ;;  %2986 = vmatprep.subr.bf16.mxu1 %v613_v63 }
 0x18a   :  { %1055 = vmatpush1.bf16.xpose.msra.mxu0 %v612_v40  ;;  %2994 = vmatpush1.bf16.xpose.msra.mxu1 %v612_v40 }
 0x18b   :  { %1056 = vmatprep.subr.bf16.mxu0 %v611_v2  ;;  %2987 = vmatprep.subr.bf16.mxu1 %v611_v2 }
 0x192   :  { %1057 = vmatpush1.bf16.xpose.msra.mxu0 %v610_v10  ;;  %2995 = vmatpush1.bf16.xpose.msra.mxu1 %v610_v10 }
 0x193   :  { %1058 = vmatprep.subr.bf16.mxu0 %v609_v48  ;;  %2988 = vmatprep.subr.bf16.mxu1 %v609_v48 }
 0x196   :  { %v616_v14 = vpop.xlane.xlu0 %615 }
 0x197   :  { %v662_v18 = vsub.f32 %v3859_v46, %v616_v14  ;;  %v663_v25 = vsub.f32 %v3865_v62, %v616_v14 }
 0x199   :  { %v694_v15 = vmul.f32 1.442695, %v662_v18  ;;  %v696_v19 = vmul.f32 1.442695, %v663_v25 }
 0x19a   :  { %v619_v38 = vpop.xlane.xlu0 %618  ;;  %1059 = vmatpush1.bf16.xpose.msra.mxu0 %v608_v52  ;;  %2996 = vmatpush1.bf16.xpose.msra.mxu1 %v608_v52 }
 0x19b   :  { %3116 = vpow2.f32 %v694_v15  ;;  %v664_v5 = vsub.f32 %v3877_v30, %v619_v38  ;;  %v665_v8 = vsub.f32 %v3881_v37, %v619_v38  ;;  %1060 = vmatprep.subr.bf16.mxu0 %v607_v13  ;;  %2989 = vmatprep.subr.bf16.mxu1 %v607_v13 }
 0x19c   :  { %3118 = vpow2.f32 %v696_v19 }
 0x19d   :  { %v698_v10 = vmul.f32 1.442695, %v664_v5  ;;  %v700_v7 = vmul.f32 1.442695, %v665_v8 }
 0x19f   :  { %3120 = vpow2.f32 %v698_v10  ;;  %v622_v46 = vpop.xlane.xlu1 %621 }
 0x1a0   :  { %3122 = vpow2.f32 %v700_v7  ;;  %v666_v14 = vsub.f32 %v3885_v44, %v622_v46  ;;  %v667_v62 = vsub.f32 %v3887_v55, %v622_v46  ;;  %v603_v44 = vpack.c.bf16 %v4041_v32, %v4037_v58 }
 0x1a1   :  { %v601_v32 = vpack.c.bf16 %v4035_v16, %v4031_v42  ;;  %v599_v16 = vpack.c.bf16 %v4029_v47, %v4025_v43 }
 0x1a2   :  { %v702_v52 = vmul.f32 1.442695, %v666_v14  ;;  %v704_v57 = vmul.f32 1.442695, %v667_v62  ;;  %1061 = vmatpush1.bf16.xpose.msra.mxu0 %v606_v33  ;;  %2997 = vmatpush1.bf16.xpose.msra.mxu1 %v606_v33 }
 0x1a3   :  { %v625_v30 = vpop.xlane.xlu1 %624  ;;  %1062 = vmatprep.subr.bf16.mxu0 %v605_v36  ;;  %2990 = vmatprep.subr.bf16.mxu1 %v605_v36 }
 0x1a4   :  { %3124 = vpow2.f32 %v702_v52  ;;  %v668_v37 = vsub.f32 %v3895_v60, %v625_v30  ;;  %v669_v39 = vsub.f32 %v3906_v61, %v625_v30 }
 0x1a5   :  { %3126 = vpow2.f32 %v704_v57 }
 0x1a6   :  { %v706_v1 = vmul.f32 1.442695, %v668_v37  ;;  %v708_v40 = vmul.f32 1.442695, %v669_v39 }
 0x1a8   :  { %v4055_v13 = vpop.eup %3116  ;;  %3128 = vpow2.f32 %v706_v1 }
 0x1a9   :  { %v4057_v55 = vpop.eup %3118  ;;  %3130 = vpow2.f32 %v708_v40 }
 0x1aa   :  { %1063 = vmatpush1.bf16.xpose.msra.mxu0 %v4043_v51  ;;  %2998 = vmatpush1.bf16.xpose.msra.mxu1 %v4043_v51  ;;  %v758_v60 = vadd.f32 %v4057_v55, %v4055_v13 }
 0x1ab   :  { %1064 = vmatprep.subr.bf16.mxu0 %v603_v44  ;;  %2991 = vmatprep.subr.bf16.mxu1 %v603_v44 }
 0x1ac   :  { %v4063_v61 = vpop.eup %3120  ;;  %759 = vadd.xlane.f32.xlu0 %v758_v60 }
 0x1ad   :  { %v4065_v48 = vpop.eup %3122 }
 0x1ae   :  { %v761_v58 = vadd.f32 %v4065_v48, %v4063_v61 }
 0x1b0   :  { %762 = vadd.xlane.f32.xlu1 %v761_v58 }
 0x1b1   :  { %v4071_v28 = vpop.eup %3124 }
 0x1b2   :  { %v4073_v51 = vpop.eup %3126  ;;  %1065 = vmatpush1.bf16.xpose.msra.mxu0 %v4039_v11  ;;  %2999 = vmatpush1.bf16.xpose.msra.mxu1 %v4039_v11 }
 0x1b3   :  { %v764_v4 = vadd.f32 %v4073_v51, %v4071_v28  ;;  %1066 = vmatprep.subr.bf16.mxu0 %v601_v32  ;;  %2992 = vmatprep.subr.bf16.mxu1 %v601_v32 }
 0x1b5   :  { %v4079_v50 = vpop.eup %3128  ;;  %765 = vadd.xlane.f32.xlu0 %v764_v4  ;;  %v5578_v4 = vld [vmem:[#allocation36_spill] sm:$0xff] }
 0x1b6   :  { %v4081_v59 = vpop.eup %3130  ;;  %v640_v42 = vpop.xlane.xlu0 %639 }
 0x1b7   :  { %v678_v22 = vsub.f32 %v3957_v26, %v640_v42  ;;  %v679_v2 = vsub.f32 %v3965_v41, %v640_v42  ;;  %v767_v11 = vadd.f32 %v4081_v59, %v4079_v50 }
 0x1b9   :  { %v726_v63 = vmul.f32 1.442695, %v678_v22  ;;  %v728_v18 = vmul.f32 1.442695, %v679_v2  ;;  %768 = vadd.xlane.f32.xlu1 %v767_v11 }
 0x1ba   :  { %v628_v25 = vpop.xlane.xlu0 %627  ;;  %v643_v15 = vpop.xlane.xlu1 %642  ;;  %1067 = vmatpush1.bf16.xpose.msra.mxu0 %v4033_v9  ;;  %3000 = vmatpush1.bf16.xpose.msra.mxu1 %v4033_v9 }
 0x1bb   :  { %3132 = vpow2.f32 %v726_v63  ;;  %v670_v19 = vsub.f32 %v3917_v24, %v628_v25  ;;  %v671_v43 = vsub.f32 %v3925_v45, %v628_v25  ;;  %v680_v26 = vsub.f32 %v3973_v12, %v643_v15  ;;  %1068 = vmatprep.subr.bf16.mxu0 %v599_v16  ;;  %2993 = vmatprep.subr.bf16.mxu1 %v599_v16 }
 0x1bc   :  { %3134 = vpow2.f32 %v728_v18  ;;  %v681_v41 = vsub.f32 %v3977_v31, %v643_v15  ;;  %v5579_v15 = vld [vmem:[#allocation37_spill] sm:$0xff] }
 0x1bd   :  { %v710_v47 = vmul.f32 1.442695, %v670_v19  ;;  %v712_v38 = vmul.f32 1.442695, %v671_v43  ;;  %v730_v5 = vmul.f32 1.442695, %v680_v26 }
 0x1be   :  { %v732_v8 = vmul.f32 1.442695, %v681_v41  ;;  %v631_v10 = vpop.xlane.xlu1 %630  ;;  %v646_v7 = vpop.xlane.xlu0 %645  ;;  %v5580_v43 = vld [vmem:[#allocation38_spill] sm:$0xff] }
 0x1bf   :  { %3136 = vpow2.f32 %v710_v47  ;;  %v672_v9 = vsub.f32 %v3931_v20, %v631_v10  ;;  %v673_v24 = vsub.f32 %v3935_v35, %v631_v10  ;;  %v682_v45 = vsub.f32 %v3983_v3, %v646_v7 }
 0x1c0   :  { %3138 = vpow2.f32 %v712_v38  ;;  %v683_v12 = vsub.f32 %v3985_v27, %v646_v7  ;;  %v5576_v27 = vpack.c.bf16 %v3955_v23, %v3961_v34 }
 0x1c1   :  { %3140 = vpow2.f32 %v730_v5  ;;  %v714_v33 = vmul.f32 1.442695, %v672_v9  ;;  %v716_v36 = vmul.f32 1.442695, %v673_v24  ;;  %v734_v31 = vmul.f32 1.442695, %v682_v45 }
 0x1c2   :  { %3142 = vpow2.f32 %v732_v8  ;;  %v736_v46 = vmul.f32 1.442695, %v683_v12  ;;  %v634_v14 = vpop.xlane.xlu0 %633  ;;  %v649_v62 = vpop.xlane.xlu1 %648  ;;  %1069 = vmatpush1.bf16.xpose.msra.mxu0 %v4027_v53  ;;  %3001 = vmatpush1.bf16.xpose.msra.mxu1 %v4027_v53  ;;  %v5581_v45 = vld [vmem:[#allocation39_spill] sm:$0xff] }
 0x1c3   :  { %3144 = vpow2.f32 %v714_v33  ;;  %v674_v20 = vsub.f32 %v3937_v49, %v634_v14  ;;  %v675_v3 = vsub.f32 %v3939_v0, %v634_v14  ;;  %v684_v35 = vsub.f32 %v3991_v56, %v649_v62  ;;  %1255 = vmatprep.subr.bf16.mxu1 %v5576_v27  ;;  %v5582_v33 = vld [vmem:[#allocation40_spill] sm:$0xff] }
 0x1c4   :  { %3146 = vpow2.f32 %v716_v36  ;;  %v685_v52 = vsub.f32 %v3993_v54, %v649_v62 }
 0x1c5   :  { %3148 = vpow2.f32 %v734_v31  ;;  %v718_v57 = vmul.f32 1.442695, %v674_v20  ;;  %v720_v30 = vmul.f32 1.442695, %v675_v3  ;;  %v738_v37 = vmul.f32 1.442695, %v684_v35 }
 0x1c6   :  { %3150 = vpow2.f32 %v736_v46  ;;  %v740_v53 = vmul.f32 1.442695, %v685_v52  ;;  %v637_v39 = vpop.xlane.xlu1 %636  ;;  %v652_v1 = vpop.xlane.xlu0 %651 }
 0x1c7   :  { %3152 = vpow2.f32 %v718_v57  ;;  %v676_v49 = vsub.f32 %v3943_v6, %v637_v39  ;;  %v677_v56 = vsub.f32 %v3949_v29, %v637_v39  ;;  %v686_v0 = vsub.f32 %v3999_v17, %v652_v1  ;;  %v5577_v29 = vld [vmem:[#allocation35_spill] sm:$0xff] }
 0x1c8   :  { %v4111_v23 = vpop.eup %3132  ;;  %3154 = vpow2.f32 %v720_v30  ;;  %v687_v54 = vsub.f32 %v4001_v21, %v652_v1 }
 0x1c9   :  { %v4114_v34 = vpop.eup %3134  ;;  %3156 = vpow2.f32 %v738_v37  ;;  %v722_v40 = vmul.f32 1.442695, %v676_v49  ;;  %v724_v44 = vmul.f32 1.442695, %v677_v56  ;;  %v742_v60 = vmul.f32 1.442695, %v686_v0 }
 0x1ca   :  { %3158 = vpow2.f32 %v740_v53  ;;  %v744_v58 = vmul.f32 1.442695, %v687_v54  ;;  %v655_v32 = vpop.xlane.xlu1 %654  ;;  %v782_v6 = vadd.f32 %v4114_v34, %v4111_v23 }
 0x1cb   :  { %3160 = vpow2.f32 %v722_v40  ;;  %v688_v17 = vsub.f32 %v5577_v29, %v655_v32  ;;  %v689_v42 = vsub.f32 %v5578_v4, %v655_v32 }
 0x1cc   :  { %v4120_v16 = vpop.eup %3136  ;;  %3162 = vpow2.f32 %v724_v44  ;;  %783 = vadd.xlane.f32.xlu0 %v782_v6 }
 0x1cd   :  { %v4122_v21 = vpop.eup %3138  ;;  %3164 = vpow2.f32 %v742_v60  ;;  %v746_v22 = vmul.f32 1.442695, %v688_v17  ;;  %v748_v2 = vmul.f32 1.442695, %v689_v42 }
 0x1ce   :  { %v4124_v11 = vpop.eup %3140  ;;  %3166 = vpow2.f32 %v744_v58  ;;  %v658_v63 = vpop.xlane.xlu0 %657  ;;  %v770_v18 = vadd.f32 %v4122_v21, %v4120_v16 }
 0x1cf   :  { %v4128_v25 = vpop.eup %3142  ;;  %3168 = vpow2.f32 %v746_v22  ;;  %v690_v19 = vsub.f32 %v5579_v15, %v658_v63  ;;  %v691_v26 = vsub.f32 %v5580_v43, %v658_v63 }
 0x1d0   :  { %v4132_v41 = vpop.eup %3144  ;;  %3170 = vpow2.f32 %v748_v2  ;;  %771 = vadd.xlane.f32.xlu0 %v770_v18  ;;  %v785_v47 = vadd.f32 %v4128_v25, %v4124_v11 }
 0x1d1   :  { %v4136_v38 = vpop.eup %3146  ;;  %v750_v5 = vmul.f32 1.442695, %v690_v19  ;;  %v752_v8 = vmul.f32 1.442695, %v691_v26 }
 0x1d2   :  { %v4138_v10 = vpop.eup %3148  ;;  %786 = vadd.xlane.f32.xlu1 %v785_v47  ;;  %v661_v7 = vpop.xlane.xlu1 %660  ;;  %v773_v9 = vadd.f32 %v4136_v38, %v4132_v41 }
 0x1d3   :  { %v4142_v24 = vpop.eup %3150  ;;  %3172 = vpow2.f32 %v750_v5  ;;  %v692_v12 = vsub.f32 %v5581_v45, %v661_v7  ;;  %v693_v36 = vsub.f32 %v5582_v33, %v661_v7 }
 0x1d4   :  { %v4146_v31 = vpop.eup %3152  ;;  %3174 = vpow2.f32 %v752_v8  ;;  %v788_v46 = vadd.f32 %v4142_v24, %v4138_v10 }
 0x1d5   :  { %v4150_v14 = vpop.eup %3154  ;;  %v754_v62 = vmul.f32 1.442695, %v692_v12  ;;  %v756_v20 = vmul.f32 1.442695, %v693_v36 }
 0x1d6   :  { %v4152_v3 = vpop.eup %3156  ;;  %789 = vadd.xlane.f32.xlu0 %v788_v46  ;;  %774 = vadd.xlane.f32.xlu1 %v773_v9  ;;  %v776_v35 = vadd.f32 %v4150_v14, %v4146_v31 }
 0x1d7   :  { %v4156_v27 = vpop.eup %3158  ;;  %3176 = vpow2.f32 %v754_v62 }
 0x1d8   :  { %v4158_v52 = vpop.eup %3160  ;;  %3178 = vpow2.f32 %v756_v20  ;;  %v791_v57 = vadd.f32 %v4156_v27, %v4152_v3 }
 0x1d9   :  { %v4162_v30 = vpop.eup %3162 }
 0x1da   :  { %v4164_v37 = vpop.eup %3164  ;;  %777 = vadd.xlane.f32.xlu0 %v776_v35  ;;  %792 = vadd.xlane.f32.xlu1 %v791_v57  ;;  %v779_v53 = vadd.f32 %v4162_v30, %v4158_v52 }
 0x1db   :  { %v4168_v39 = vpop.eup %3166 }
 0x1dc   :  { %v4170_v1 = vpop.eup %3168  ;;  %v794_v49 = vadd.f32 %v4168_v39, %v4164_v37 }
 0x1dd   :  { %v4174_v56 = vpop.eup %3170 }
 0x1de   :  { %795 = vadd.xlane.f32.xlu0 %v794_v49  ;;  %780 = vadd.xlane.f32.xlu1 %v779_v53  ;;  %v797_v0 = vadd.f32 %v4174_v56, %v4170_v1 }
 0x1e0   :  { %v4178_v54 = vpop.eup %3172 }
 0x1e1   :  { %v4180_v40 = vpop.eup %3174 }
 0x1e2   :  { %798 = vadd.xlane.f32.xlu1 %v797_v0  ;;  %v800_v44 = vadd.f32 %v4180_v40, %v4178_v54 }
 0x1e4   :  { %v4184_v60 = vpop.eup %3176  ;;  %801 = vadd.xlane.f32.xlu0 %v800_v44 }
 0x1e5   :  { %v4186_v58 = vpop.eup %3178 }
 0x1e6   :  { %v803_v32 = vadd.f32 %v4186_v58, %v4184_v60 }
 0x1e8   :  { %804 = vadd.xlane.f32.xlu1 %v803_v32 }
 0x235   :  { %v760_v6 = vpop.xlane.xlu0 %759 }
 0x236   :  { %3180 = vrcp.f32 %v760_v6 }
 0x239   :  { %v763_v29 = vpop.xlane.xlu1 %762 }
 0x23a   :  { %3182 = vrcp.f32 %v763_v29 }
 0x23e   :  { %v766_v17 = vpop.xlane.xlu0 %765 }
 0x23f   :  { %3184 = vrcp.f32 %v766_v17 }
 0x242   :  { %v769_v4 = vpop.xlane.xlu1 %768 }
 0x243   :  { %3186 = vrcp.f32 %v769_v4  ;;  %v3181_v42 = vpop.eup %3180  ;;  %v5584_v4 = vld [vmem:[#allocation31_spill] sm:$0xff] }
 0x244   :  { %v823_v2 = vmul.f32 %v3181_v42, %v4057_v55  ;;  %v822_v18 = vmul.f32 %v3181_v42, %v4055_v13 }
 0x247   :  { %v3183_v22 = vpop.eup %3182 }
 0x248   :  { %v825_v63 = vmul.f32 %v3183_v22, %v4065_v48  ;;  %v824_v15 = vmul.f32 %v3183_v22, %v4063_v61  ;;  %v5586_v22 = vld [vmem:[#allocation34_spill] sm:$0xff] }
 0x24a   :  { %v855_v19 = vpack.c.bf16 %v825_v63, %v823_v2  ;;  %v854_v43 = vpack.c.bf16 %v824_v15, %v822_v18  ;;  %v5587_v2 = vld [vmem:[#allocation33_spill] sm:$0xff] }
 0x24b   :  { %v5588_v63 = vpack.c.bf16 %v5586_v22, %v5587_v2 }
 0x24c   :  { %1086 = vmatprep.mubr.bf16.mxu0 %v855_v19  ;;  %v3185_v26 = vpop.eup %3184 }
 0x24d   :  { %1087 = vmatmul.mubr.bf16.vlgmr.msra.gmra.mxu0 %v854_v43  ;;  %v827_v5 = vmul.f32 %v3185_v26, %v4073_v51  ;;  %v826_v7 = vmul.f32 %v3185_v26, %v4071_v28 }
 0x250   :  { %v3187_v47 = vpop.eup %3186 }
 0x251   :  { %v829_v8 = vmul.f32 %v3187_v47, %v4081_v59  ;;  %v828_v55 = vmul.f32 %v3187_v47, %v4079_v50  ;;  %v5589_v47 = vld [vmem:[#allocation30_spill] sm:$0xff] }
 0x253   :  { %v857_v9 = vpack.c.bf16 %v829_v8, %v827_v5  ;;  %v856_v48 = vpack.c.bf16 %v828_v55, %v826_v7  ;;  %v5590_v5 = vld [vmem:[#allocation29_spill] sm:$0xff]  ;;  %v5593_v55 = vld [vmem:[#allocation26_spill] sm:$0xff] }
 0x254   :  { %v5591_v8 = vpack.c.bf16 %v5589_v47, %v5590_v5  ;;  %v5592_v7 = vld [vmem:[#allocation25_spill] sm:$0xff]  ;;  %v3044_v5 = vld [vmem:[%s5447_s7] sm:$0xff]  }
 0x255   :  { %1094 = vmatprep.mubr.bf16.mxu0 %v857_v9  ;;  %v784_v13 = vpop.xlane.xlu0 %783  ;;  %v5594_v9 = vpack.c.bf16 %v5592_v7, %v5593_v55  ;;  %1239 = vxpose.xlu1.c.b16.start [1/8] %v3044_v5, 128  ;;  %v3046_v7 = vld [vmem:[%s5447_s7 + $0x10] sm:$0xff]   ;;  %v3047_v55 = vld [vmem:[%s5447_s7 + $0x18] sm:$0xff]  }
 0x256   :  { %1095 = vmatmul.mubr.bf16.gmra.mxu0 %v856_v48  ;;  %3188 = vrcp.f32 %v784_v13 }
 0x259   :  { %v772_v61 = vpop.xlane.xlu0 %771 }
 0x25b   :  { %v787_v45 = vpop.xlane.xlu1 %786 }
 0x25c   :  { %3190 = vrcp.f32 %v787_v45 }
 0x25d   :  { %3192 = vrcp.f32 %v772_v61 }
 0x25f   :  { %v790_v12 = vpop.xlane.xlu0 %789  ;;  %v775_v33 = vpop.xlane.xlu1 %774 }
 0x260   :  { %3194 = vrcp.f32 %v775_v33  ;;  %v5595_v33 = vld [vmem:[#allocation24_spill] sm:$0xff] }
 0x261   :  { %3196 = vrcp.f32 %v790_v12 }
 0x263   :  { %v778_v51 = vpop.xlane.xlu0 %777  ;;  %v793_v59 = vpop.xlane.xlu1 %792 }
 0x264   :  { %3198 = vrcp.f32 %v793_v59  ;;  %v3189_v28 = vpop.eup %3188 }
 0x265   :  { %3200 = vrcp.f32 %v778_v51  ;;  %v839_v62 = vmul.f32 %v3189_v28, %v4114_v34  ;;  %v838_v35 = vmul.f32 %v3189_v28, %v4111_v23  ;;  %v5596_v51 = vld [vmem:[#allocation23_spill] sm:$0xff] }
 0x266   :  { %v5597_v59 = vpack.c.bf16 %v5595_v33, %v5596_v51 }
 0x267   :  { %v796_v50 = vpop.xlane.xlu0 %795  ;;  %v781_v36 = vpop.xlane.xlu1 %780 }
 0x268   :  { %3202 = vrcp.f32 %v781_v36  ;;  %v5598_v36 = vld [vmem:[#allocation28_spill] sm:$0xff] }
 0x269   :  { %v3191_v46 = vpop.eup %3190  ;;  %3204 = vrcp.f32 %v796_v50 }
 0x26a   :  { %v841_v20 = vmul.f32 %v3191_v46, %v4128_v25  ;;  %v840_v57 = vmul.f32 %v3191_v46, %v4124_v11  ;;  %v3193_v49 = vpop.eup %3192  ;;  %v5583_v11 = vld [vmem:[#allocation32_spill] sm:$0xff]  ;;  %v5599_v46 = vld [vmem:[#allocation27_spill] sm:$0xff] }
 0x26b   :  { %v799_v53 = vpop.xlane.xlu1 %798  ;;  %v831_v29 = vmul.f32 %v3193_v49, %v4122_v21  ;;  %v830_v17 = vmul.f32 %v3193_v49, %v4120_v16  ;;  %v5585_v42 = vpack.c.bf16 %v5583_v11, %v5584_v4  ;;  %v5602_v49 = vld [vmem:[#allocation21_spill] sm:$0xff]  ;;  %v5612_v11 = vld [vmem:[#allocation19_spill] sm:$0xff] }
 0x26c   :  { %3206 = vrcp.f32 %v799_v53  ;;  %v863_v0 = vpack.c.bf16 %v841_v20, %v839_v62  ;;  %v862_v44 = vpack.c.bf16 %v840_v57, %v838_v35  ;;  %v5600_v62 = vpack.c.bf16 %v5598_v36, %v5599_v46  ;;  %v5601_v53 = vld [vmem:[#allocation22_spill] sm:$0xff] }
 0x26d   :  { %v802_v32 = vpop.xlane.xlu0 %801  ;;  %v3195_v6 = vpop.eup %3194  ;;  %v86_v46 = vld [vmem:[%s5446_s6 + $0x18] sm:$0xff] }
 0x26e   :  { %1118 = vmatprep.mubr.bf16.mxu1 %v863_v0  ;;  %v833_v34 = vmul.f32 %v3195_v6, %v4136_v38  ;;  %v832_v25 = vmul.f32 %v3195_v6, %v4132_v41  ;;  %v3197_v23 = vpop.eup %3196  ;;  %3208 = vrcp.f32 %v802_v32  ;;  %v5603_v0 = vpack.c.bf16 %v5601_v53, %v5602_v49  ;;  %v5605_v32 = vld [vmem:[#allocation17_spill] sm:$0xff]  ;;  %v5606_v6 = vld [vmem:[#allocation18_spill] sm:$0xff] }
 0x26f   :  { %1119 = vmatmul.mubr.bf16.vlgmr.msra.gmra.mxu1 %v862_v44  ;;  %v843_v16 = vmul.f32 %v3197_v23, %v4142_v24  ;;  %v842_v38 = vmul.f32 %v3197_v23, %v4138_v10  ;;  %v5604_v44 = vmov 0   ;;  %v5611_v23 = vld [vmem:[#allocation20_spill] sm:$0xff] }
 0x270   :  { %1256 = vmatpush1.bf16.msra.mxu1 %v5585_v42  ;;  %v859_v18 = vpack.c.bf16 %v833_v34, %v831_v29  ;;  %v858_v19 = vpack.c.bf16 %v832_v25, %v830_v17  ;;  %v5608_v34 = vld [vmem:[#allocation16_spill] sm:$0xff]  ;;  %v5609_v17 = vld [vmem:[#allocation15_spill] sm:$0xff]  ;;  %v5613_v4 = vpack.c.bf16 %v5611_v23, %v5612_v11  ;;  %v89_v11 = vld [vmem:[%s5446_s6 + $0x30] sm:$0xff] }
 0x271   :  { %1257 = vmatprep.subr.bf16.mxu1 %v5588_v63  ;;  %v805_v15 = vpop.xlane.xlu1 %804  ;;  %v3199_v21 = vpop.eup %3198  ;;  %v5610_v25 = vpack.c.bf16 %v5608_v34, %v5609_v17  ;;  %v5614_v63 = vld [vmem:[#allocation14_spill] sm:$0xff] }
 0x272   :  { %3210 = vrcp.f32 %v805_v15  ;;  %1102 = vmatprep.mubr.bf16.mxu0 %v859_v18  ;;  %v845_v41 = vmul.f32 %v3199_v21, %v4156_v27  ;;  %v844_v43 = vmul.f32 %v3199_v21, %v4152_v3  ;;  %v3201_v26 = vpop.eup %3200  ;;  %v5615_v18 = vld [vmem:[#allocation13_spill] sm:$0xff]  ;;  %v5618_v15 = vld [vmem:[#allocation10_spill] sm:$0xff]  ;;  %v5621_v21 = vld [vmem:[#allocation7_spill] sm:$0xff] }
 0x273   :  { %1103 = vmatmul.mubr.bf16.gmra.mxu0 %v858_v19  ;;  %v835_v27 = vmul.f32 %v3201_v26, %v4150_v14  ;;  %v834_v3 = vmul.f32 %v3201_v26, %v4146_v31  ;;  %v5620_v19 = vld [vmem:[#allocation8_spill] sm:$0xff]  ;;  %v5627_v26 = vld [vmem:[#allocation5_spill] sm:$0xff] }
 0x274   :  { %1258 = vmatpush1.bf16.msra.mxu1 %v5591_v8  ;;  %v865_v48 = vpack.c.bf16 %v845_v41, %v843_v16  ;;  %v864_v13 = vpack.c.bf16 %v844_v43, %v842_v38  ;;  %v5622_v16 = vpack.c.bf16 %v5620_v19, %v5621_v21  ;;  %v5623_v41 = vld [vmem:[#allocation12_spill] sm:$0xff]  ;;  %v5624_v38 = vld [vmem:[#allocation11_spill] sm:$0xff]  ;;  %v5626_v43 = vld [vmem:[#allocation6_spill] sm:$0xff] }
 0x275   :  { %1259 = vmatprep.subr.bf16.mxu1 %v5594_v9  ;;  %v3203_v61 = vpop.eup %3202  ;;  %v5628_v47 = vpack.c.bf16 %v5626_v43, %v5627_v26  ;;  %v3045_v8 = vld [vmem:[%s5447_s7 + $0x8] sm:$0xff]   ;;  %v3048_v9 = vld [vmem:[%s5447_s7 + $0x20] sm:$0xff]   ;;  %v93_v43 = vld [vmem:[%s5446_s6 + $0x50] sm:$0xff] }
 0x276   :  { %v3205_v24 = vpop.eup %3204  ;;  %1126 = vmatprep.mubr.bf16.mxu1 %v865_v48  ;;  %v837_v10 = vmul.f32 %v3203_v61, %v4162_v30  ;;  %v836_v45 = vmul.f32 %v3203_v61, %v4158_v52  ;;  %1240 = vxpose.xlu1.c.b16.cont [2/8] %v3045_v8, 128  ;;  %v3049_v48 = vld [vmem:[%s5447_s7 + $0x28] sm:$0xff]   ;;  %v3051_v61 = vld [vmem:[%s5447_s7 + $0x38] sm:$0xff]  }
 0x277   :  { %1127 = vmatmul.mubr.bf16.gmra.mxu1 %v864_v13  ;;  %v847_v14 = vmul.f32 %v3205_v24, %v4168_v39  ;;  %v846_v31 = vmul.f32 %v3205_v24, %v4164_v37  ;;  %v5607_v39 = vpack.c.bf16 %v5605_v32, %v5606_v6  ;;  %v3050_v13 = vld [vmem:[%s5447_s7 + $0x30] sm:$0xff]   ;;  %v88_v6 = vld [vmem:[%s5446_s6 + $0x28] sm:$0xff] }
 0x278   :  { %1260 = vmatpush1.bf16.msra.mxu1 %v5597_v59  ;;  %v861_v28 = vpack.c.bf16 %v837_v10, %v835_v27  ;;  %v860_v50 = vpack.c.bf16 %v836_v45, %v834_v3  ;;  %v83_v27 = vld [vmem:[%s5446_s6] sm:$0xff]  ;;  %v84_v3 = vld [vmem:[%s5446_s6 + $0x8] sm:$0xff] }
 0x279   :  { %v3207_v12 = vpop.eup %3206  ;;  %1261 = vmatprep.subr.bf16.mxu1 %v5600_v62  ;;  %v96_v8 = vld [vmem:[%s5446_s6 + $0x68] sm:$0xff] }
 0x27a   :  { %v849_v30 = vmul.f32 %v3207_v12, %v4174_v56  ;;  %v848_v52 = vmul.f32 %v3207_v12, %v4170_v1  ;;  %1110 = vmatprep.mubr.bf16.mxu0 %v861_v28  ;;  %1241 = vxpose.xlu1.c.b16.cont [3/8] %v3046_v7, 128 }
 0x27b   :  { %1111 = vmatmul.mubr.bf16.gmra.mxu0 %v860_v50  ;;  %v3209_v57 = vpop.eup %3208  ;;  %v85_v50 = vld [vmem:[%s5446_s6 + $0x10] sm:$0xff] }
 0x27c   :  { %v867_v20 = vpack.c.bf16 %v849_v30, %v847_v14  ;;  %v866_v35 = vpack.c.bf16 %v848_v52, %v846_v31  ;;  %1262 = vmatpush1.bf16.msra.mxu1 %v5603_v0  ;;  %1565 = vmatprep.mubr.bf16.mxu0 %v5604_v44  ;;  %v851_v37 = vmul.f32 %v3209_v57, %v4180_v40  ;;  %v87_v0 = vld [vmem:[%s5446_s6 + $0x20] sm:$0xff] }
 0x27d   :  { %1263 = vmatprep.subr.bf16.mxu1 %v5607_v39  ;;  %v850_v22 = vmul.f32 %v3209_v57, %v4178_v54  ;;  %v5616_v40 = vpack.c.bf16 %v5614_v63, %v5615_v18  ;;  %v5625_v54 = vpack.c.bf16 %v5623_v41, %v5624_v38  ;;  %v94_v41 = vld [vmem:[%s5446_s6 + $0x58] sm:$0xff] }
 0x27e   :  { %1134 = vmatprep.mubr.bf16.mxu1 %v867_v20  ;;  %1242 = vxpose.xlu1.c.b16.cont [4/8] %v3047_v55, 128 }
 0x27f   :  { %v3211_v56 = vpop.eup %3210  ;;  %1135 = vmatmul.mubr.bf16.gmra.mxu1 %v866_v35 }
 0x280   :  { %v853_v1 = vmul.f32 %v3211_v56, %v4186_v58  ;;  %v852_v29 = vmul.f32 %v3211_v56, %v4184_v60  ;;  %1264 = vmatpush1.bf16.msra.mxu1 %v5610_v25  ;;  %v5617_v58 = vld [vmem:[#allocation9_spill] sm:$0xff] }
 0x281   :  { %1265 = vmatprep.subr.bf16.mxu1 %v5613_v4  ;;  %v5619_v60 = vpack.c.bf16 %v5617_v58, %v5618_v15  ;;  %v91_v15 = vld [vmem:[%s5446_s6 + $0x40] sm:$0xff] }
 0x282   :  { %v869_v42 = vpack.c.bf16 %v853_v1, %v851_v37  ;;  %v868_v2 = vpack.c.bf16 %v852_v29, %v850_v22  ;;  %1243 = vxpose.xlu1.c.b16.cont [5/8] %v3048_v9, 128  ;;  %v90_v22 = vld [vmem:[%s5446_s6 + $0x38] sm:$0xff]  ;;  %v95_v9 = vld [vmem:[%s5446_s6 + $0x60] sm:$0xff] }
 0x284   :  { %1142 = vmatprep.mubr.bf16.mxu1 %v869_v42  ;;  %1266 = vmatpush1.bf16.msra.mxu1 %v5616_v40 }
 0x285   :  { %1267 = vmatprep.subr.bf16.mxu1 %v5619_v60 }
 0x286   :  { %1244 = vxpose.xlu1.c.b16.cont [6/8] %v3049_v48, 128 }
 0x287   :  { %1143 = vmatmul.mubr.bf16.gmra.mxu1 %v868_v2  ;;  %v92_v2 = vld [vmem:[%s5446_s6 + $0x48] sm:$0xff] }
 0x288   :  { %1268 = vmatpush1.bf16.msra.mxu1 %v5622_v16  ;;  %1287 = vmatprep.mubr.bf16.mxu1 %v5604_v44 }
 0x289   :  { %1269 = vmatprep.subr.bf16.mxu1 %v5625_v54 }
 0x28a   :  { %1245 = vxpose.xlu1.c.b16.cont [7/8] %v3050_v13, 128 }
 0x28c   :  { %1270 = vmatpush1.bf16.msra.mxu1 %v5628_v47 }
 0x28e   :  { %1246 = vxpose.xlu1.c.b16.end [8/8] %v3051_v61, 128 }
 0x292   :  { %3018 = vset.pattern.permute.xlu1 %v5604_v44 }
 0x30d   :  { %v1088_v24 = vpop.f32.mrf.mxu0 }
 0x30e   :  { %v1151_v12 = vmul.f32 %v1088_v24, %v83_v27  ;;  %v98_v24 = vld [vmem:[%s5446_s6 + $0x78] sm:$0xff] }
 0x30f   :  { %v1090_v10 = vpop.f32.mrf.mxu0 }
 0x311   :  { %v1091_v45 = vpop.f32.mrf.mxu0 }
 0x312   :  { %v1152_v33 = vmul.f32 %v1091_v45, %v84_v3  ;;  %v97_v3 = vld [vmem:[%s5446_s6 + $0x70] sm:$0xff] }
 0x313   :  { %v1093_v51 = vpop.f32.mrf.mxu0 }
 0x314   :  { %v1167_v59 = vpack.c.bf16 %v1152_v33, %v1151_v12 }
 0x316   :  { %v1096_v28 = vpop.f32.mrf.mxu0  ;;  %1223 = vxpose.xlu0.c.b16.start [1/8] %v1167_v59, 128 }
 0x317   :  { %v1153_v14 = vmul.f32 %v1096_v28, %v85_v50 }
 0x318   :  { %v1098_v36 = vpop.f32.mrf.mxu0 }
 0x31a   :  { %v1099_v62 = vpop.f32.mrf.mxu0 }
 0x31b   :  { %v1154_v30 = vmul.f32 %v1099_v62, %v86_v46 }
 0x31c   :  { %v1101_v31 = vpop.f32.mrf.mxu0 }
 0x31d   :  { %v1168_v52 = vpack.c.bf16 %v1154_v30, %v1153_v14 }
 0x31f   :  { %1224 = vxpose.xlu0.c.b16.cont [2/8] %v1168_v52, 128  ;;  %v4350_v52 = vpop.trf.xlu1 }
 0x320   :  { %5629 = vst [vmem:[#allocation35_spill] sm:$0xff] %v4350_v52 }
 0x32f   :  { %v1120_v20 = vpop.f32.mrf.mxu1 }
 0x330   :  { %v1159_v54 = vmul.f32 %v1120_v20, %v91_v15  ;;  %v4354_v20 = vpop.trf.xlu1 }
 0x331   :  { %v1122_v35 = vpop.f32.mrf.mxu1  ;;  %5630 = vst [vmem:[#allocation36_spill] sm:$0xff] %v4354_v20 }
 0x333   :  { %v1123_v57 = vpop.f32.mrf.mxu1  ;;  %v1104_v53 = vpop.f32.mrf.mxu0 }
 0x334   :  { %v1155_v37 = vmul.f32 %v1104_v53, %v87_v0  ;;  %v1160_v21 = vmul.f32 %v1123_v57, %v92_v2  ;;  %v4358_v35 = vpop.trf.xlu1 }
 0x335   :  { %v1125_v49 = vpop.f32.mrf.mxu1  ;;  %v1106_v32 = vpop.f32.mrf.mxu0  ;;  %5631 = vst [vmem:[#allocation37_spill] sm:$0xff] %v4358_v35 }
 0x336   :  { %v1171_v47 = vpack.c.bf16 %v1160_v21, %v1159_v54 }
 0x337   :  { %v1107_v39 = vpop.f32.mrf.mxu0  ;;  %v1128_v56 = vpop.f32.mrf.mxu1 }
 0x338   :  { %v1156_v1 = vmul.f32 %v1107_v39, %v88_v6  ;;  %v1161_v55 = vmul.f32 %v1128_v56, %v93_v43  ;;  %v4362_v57 = vpop.trf.xlu1 }
 0x339   :  { %v1109_v29 = vpop.f32.mrf.mxu0  ;;  %v1130_v34 = vpop.f32.mrf.mxu1  ;;  %5632 = vst [vmem:[#allocation38_spill] sm:$0xff] %v4362_v57 }
 0x33a   :  { %v1169_v17 = vpack.c.bf16 %v1156_v1, %v1155_v37 }
 0x33b   :  { %v1112_v25 = vpop.f32.mrf.mxu0  ;;  %v1131_v23 = vpop.f32.mrf.mxu1 }
 0x33c   :  { %1225 = vxpose.xlu0.c.b16.cont [3/8] %v1169_v17, 128  ;;  %v1157_v40 = vmul.f32 %v1112_v25, %v89_v11  ;;  %v1162_v5 = vmul.f32 %v1131_v23, %v94_v41  ;;  %v4366_v53 = vpop.trf.xlu1 }
 0x33d   :  { %v1114_v4 = vpop.f32.mrf.mxu0  ;;  %v1133_v42 = vpop.f32.mrf.mxu1  ;;  %5633 = vst [vmem:[#allocation39_spill] sm:$0xff] %v4366_v53 }
 0x33e   :  { %v1172_v13 = vpack.c.bf16 %v1162_v5, %v1161_v55 }
 0x33f   :  { %v1115_v63 = vpop.f32.mrf.mxu0  ;;  %v1136_v18 = vpop.f32.mrf.mxu1 }
 0x340   :  { %v1158_v58 = vmul.f32 %v1115_v63, %v90_v22  ;;  %v1163_v10 = vmul.f32 %v1136_v18, %v95_v9  ;;  %v4370_v49 = vpop.trf.xlu1 }
 0x341   :  { %v1117_v60 = vpop.f32.mrf.mxu0  ;;  %v1138_v19 = vpop.f32.mrf.mxu1  ;;  %5634 = vst [vmem:[#allocation40_spill] sm:$0xff] %v4370_v49 }
 0x342   :  { %v1170_v16 = vpack.c.bf16 %v1158_v58, %v1157_v40 }
 0x343   :  { %v1139_v38 = vpop.f32.mrf.mxu1 }
 0x344   :  { %1226 = vxpose.xlu0.c.b16.cont [4/8] %v1170_v16, 128  ;;  %v1164_v61 = vmul.f32 %v1139_v38, %v96_v8  ;;  %v4374_v0 = vpop.trf.xlu1 }
 0x345   :  { %v1141_v26 = vpop.f32.mrf.mxu1  ;;  %5635 = vst [vmem:[#allocation32_spill] sm:$0xff] %v4374_v0 }
 0x346   :  { %v1173_v12 = vpack.c.bf16 %v1164_v61, %v1163_v10 }
 0x347   :  { %v1144_v7 = vpop.f32.mrf.mxu1 }
 0x348   :  { %1227 = vxpose.xlu0.c.b16.cont [5/8] %v1171_v47, 128  ;;  %v1165_v51 = vmul.f32 %v1144_v7, %v97_v3  ;;  %v4378_v32 = vpop.trf.xlu1 }
 0x349   :  { %v1146_v48 = vpop.f32.mrf.mxu1  ;;  %5636 = vst [vmem:[#allocation31_spill] sm:$0xff] %v4378_v32 }
 0x34b   :  { %v1147_v27 = vpop.f32.mrf.mxu1 }
 0x34c   :  { %1228 = vxpose.xlu0.c.b16.cont [6/8] %v1172_v13, 128  ;;  %v1166_v33 = vmul.f32 %v1147_v27, %v98_v24 }
 0x34d   :  { %v1149_v45 = vpop.f32.mrf.mxu1 }
 0x34e   :  { %v1174_v59 = vpack.c.bf16 %v1166_v33, %v1165_v51 }
 0x350   :  { %1229 = vxpose.xlu0.c.b16.cont [7/8] %v1173_v12, 128 }
 0x354   :  { %1230 = vxpose.xlu0.c.b16.end [8/8] %v1174_v59, 128 }
 0x39a   :  { %v1231_v28 = vpop.trf.xlu0 }
 0x39b   :  { %1288 = vmatmul.mubr.bf16.vlgmr.msra.gmra.mxu1 %v1231_v28 }
 0x39c   :  { %1297 = vmatprep.mubr.bf16.mxu1 %v5604_v44 }
 0x39e   :  { %v1232_v50 = vpop.trf.xlu0 }
 0x3a2   :  { %v1233_v36 = vpop.trf.xlu0 }
 0x3a3   :  { %1298 = vmatmul.mubr.bf16.gmra.mxu1 %v1232_v50 }
 0x3a4   :  { %1307 = vmatprep.mubr.bf16.mxu1 %v5604_v44 }
 0x3a6   :  { %v1234_v46 = vpop.trf.xlu0 }
 0x3aa   :  { %v1235_v62 = vpop.trf.xlu0 }
 0x3ab   :  { %1308 = vmatmul.mubr.bf16.gmra.mxu1 %v1233_v36 }
 0x3ac   :  { %1317 = vmatprep.mubr.bf16.mxu1 %v5604_v44 }
 0x3ae   :  { %v1236_v14 = vpop.trf.xlu0 }
 0x3b2   :  { %v1237_v30 = vpop.trf.xlu0 }
 0x3b3   :  { %1318 = vmatmul.mubr.bf16.gmra.mxu1 %v1234_v46 }
 0x3b4   :  { %1327 = vmatprep.mubr.bf16.mxu1 %v5604_v44 }
 0x3b6   :  { %v1238_v31 = vpop.trf.xlu0 }
 0x3bb   :  { %1328 = vmatmul.mubr.bf16.gmra.mxu1 %v1235_v62 }
 0x3bc   :  { %1337 = vmatprep.mubr.bf16.mxu1 %v5604_v44 }
 0x3c3   :  { %1338 = vmatmul.mubr.bf16.gmra.mxu1 %v1236_v14 }
 0x3c4   :  { %1347 = vmatprep.mubr.bf16.mxu1 %v5604_v44 }
 0x3cb   :  { %1348 = vmatmul.mubr.bf16.gmra.mxu1 %v1237_v30 }
 0x3cc   :  { %1357 = vmatprep.mubr.bf16.mxu1 %v5604_v44 }
 0x3d3   :  { %1358 = vmatmul.mubr.bf16.gmra.mxu1 %v1238_v31 }
 0x3d4   :  { %1367 = vmatprep.mubr.bf16.mxu1 %v5604_v44 }
 0x3db   :  { %1368 = vmatmul.mubr.bf16.gmra.mxu1 %v4350_v52 }
 0x3dc   :  { %1377 = vmatprep.mubr.bf16.mxu1 %v5604_v44 }
 0x3e3   :  { %1378 = vmatmul.mubr.bf16.gmra.mxu1 %v4354_v20 }
 0x3e4   :  { %1387 = vmatprep.mubr.bf16.mxu1 %v5604_v44 }
 0x3eb   :  { %1388 = vmatmul.mubr.bf16.gmra.mxu1 %v4358_v35 }
 0x3ec   :  { %1397 = vmatprep.mubr.bf16.mxu1 %v5604_v44 }
 0x3f3   :  { %1398 = vmatmul.mubr.bf16.gmra.mxu1 %v4362_v57 }
 0x3f4   :  { %1407 = vmatprep.mubr.bf16.mxu1 %v5604_v44 }
 0x3fb   :  { %1408 = vmatmul.mubr.bf16.gmra.mxu1 %v4366_v53 }
 0x3fc   :  { %1417 = vmatprep.mubr.bf16.mxu1 %v5604_v44 }
 0x403   :  { %1418 = vmatmul.mubr.bf16.gmra.mxu1 %v4370_v49 }
 0x404   :  { %1427 = vmatprep.mubr.bf16.mxu1 %v5604_v44 }
 0x40b   :  { %1428 = vmatmul.mubr.bf16.gmra.mxu1 %v4374_v0 }
 0x40c   :  { %1437 = vmatprep.mubr.bf16.mxu1 %v5604_v44 }
 0x413   :  { %1438 = vmatmul.mubr.bf16.gmra.mxu1 %v4378_v32 }
 0x45b   :  { %v1289_v6 = vpop.f32.mrf.mxu1 }
 0x45d   :  { %v4381_v39 = vpop.f32.mrf.mxu1 }
 0x45f   :  { %v1293_v56 = vpop.f32.mrf.mxu1 }
 0x461   :  { %v4383_v37 = vpop.f32.mrf.mxu1 }
 0x463   :  { %v1299_v1 = vpop.f32.mrf.mxu1 }
 0x465   :  { %v4385_v29 = vpop.f32.mrf.mxu1 }
 0x467   :  { %v1303_v34 = vpop.f32.mrf.mxu1 }
 0x469   :  { %v4387_v17 = vpop.f32.mrf.mxu1 }
 0x46b   :  { %v4389_v25 = vpop.f32.mrf.mxu1 }
 0x46d   :  { %v4391_v23 = vpop.f32.mrf.mxu1 }
 0x46f   :  { %v4393_v11 = vpop.f32.mrf.mxu1 }
 0x471   :  { %v4395_v4 = vpop.f32.mrf.mxu1 }
 0x473   :  { %v4397_v42 = vpop.f32.mrf.mxu1 }
 0x475   :  { %v4399_v22 = vpop.f32.mrf.mxu1 }
 0x477   :  { %v4401_v2 = vpop.f32.mrf.mxu1 }
 0x479   :  { %v4403_v63 = vpop.f32.mrf.mxu1 }
 0x47b   :  { %v4405_v18 = vpop.f32.mrf.mxu1 }
 0x47d   :  { %v4407_v40 = vpop.f32.mrf.mxu1 }
 0x47f   :  { %v4409_v58 = vpop.f32.mrf.mxu1 }
 0x481   :  { %v4411_v15 = vpop.f32.mrf.mxu1 }
 0x483   :  { %v4413_v60 = vpop.f32.mrf.mxu1 }
 0x485   :  { %v4415_v19 = vpop.f32.mrf.mxu1 }
 0x487   :  { %v4417_v21 = vpop.f32.mrf.mxu1 }
 0x489   :  { %v4419_v16 = vpop.f32.mrf.mxu1 }
 0x48b   :  { %v4421_v41 = vpop.f32.mrf.mxu1 }
 0x48d   :  { %v4423_v38 = vpop.f32.mrf.mxu1 }
 0x48f   :  { %v4425_v54 = vpop.f32.mrf.mxu1 }
 0x491   :  { %v4427_v43 = vpop.f32.mrf.mxu1 }
 0x493   :  { %v4429_v26 = vpop.f32.mrf.mxu1 }
 0x495   :  { %v4431_v47 = vpop.f32.mrf.mxu1 }
 0x497   :  { %v4433_v5 = vpop.f32.mrf.mxu1 }
 0x499   :  { %v4435_v8 = vpop.f32.mrf.mxu1 }
 0x49b   :  { %v1369_v7 = vpop.f32.mrf.mxu1 }
 0x49c   :  { %3212 = vrcp.f32 %v1369_v7 }
 0x49d   :  { %v4437_v55 = vpop.f32.mrf.mxu1 }
 0x49f   :  { %v1373_v9 = vpop.f32.mrf.mxu1 }
 0x4a0   :  { %3214 = vrcp.f32 %v1373_v9 }
 0x4a1   :  { %v4439_v48 = vpop.f32.mrf.mxu1 }
 0x4a3   :  { %v1379_v13 = vpop.f32.mrf.mxu1 }
 0x4a4   :  { %3216 = vrcp.f32 %v1379_v13 }
 0x4a5   :  { %v4441_v61 = vpop.f32.mrf.mxu1 }
 0x4a7   :  { %v1383_v24 = vpop.f32.mrf.mxu1 }
 0x4a8   :  { %3218 = vrcp.f32 %v1383_v24 }
 0x4a9   :  { %v4443_v27 = vpop.f32.mrf.mxu1  ;;  %v3213_v10 = vpop.eup %3212 }
 0x4aa   :  { %v4449_v33 = vmul.f32 %v3213_v10, %v1289_v6 }
 0x4ab   :  { %v4445_v3 = vpop.f32.mrf.mxu1 }
 0x4ad   :  { %v3215_v45 = vpop.eup %3214  ;;  %v4447_v12 = vpop.f32.mrf.mxu1 }
 0x4ae   :  { %v4451_v51 = vmul.f32 %v3215_v45, %v1293_v56 }
 0x4af   :  { %v4453_v59 = vpop.f32.mrf.mxu1 }
 0x4b1   :  { %v1395_v50 = vpop.f32.mrf.mxu1  ;;  %v3217_v36 = vpop.eup %3216 }
 0x4b2   :  { %v4457_v30 = vmul.f32 %v3217_v36, %v1299_v1 }
 0x4b3   :  { %v1399_v46 = vpop.f32.mrf.mxu1 }
 0x4b5   :  { %v3219_v62 = vpop.eup %3218  ;;  %v1401_v14 = vpop.f32.mrf.mxu1 }
 0x4b6   :  { %v4459_v31 = vmul.f32 %v3219_v62, %v1303_v34 }
 0x4b7   :  { %v1403_v7 = vpop.f32.mrf.mxu1 }
 0x4b9   :  { %v1405_v56 = vpop.f32.mrf.mxu1 }
 0x4bb   :  { %v1409_v9 = vpop.f32.mrf.mxu1 }
 0x4bd   :  { %v1411_v13 = vpop.f32.mrf.mxu1 }
 0x4bf   :  { %v1413_v24 = vpop.f32.mrf.mxu1 }
 0x4c1   :  { %v1415_v10 = vpop.f32.mrf.mxu1 }
 0x4c3   :  { %v1419_v45 = vpop.f32.mrf.mxu1 }
 0x4c5   :  { %v1421_v28 = vpop.f32.mrf.mxu1 }
 0x4c7   :  { %v1423_v32 = vpop.f32.mrf.mxu1 }
 0x4c9   :  { %v1425_v0 = vpop.f32.mrf.mxu1 }
 0x4cb   :  { %v1429_v49 = vpop.f32.mrf.mxu1 }
 0x4cd   :  { %v1431_v53 = vpop.f32.mrf.mxu1 }
 0x4ce   :  { %3220 = vrcp.f32 %v1431_v53 }
 0x4cf   :  { %v1433_v57 = vpop.f32.mrf.mxu1 }
 0x4d1   :  { %v1435_v1 = vpop.f32.mrf.mxu1 }
 0x4d2   :  { %3222 = vrcp.f32 %v1435_v1 }
 0x4d3   :  { %v1439_v36 = vpop.f32.mrf.mxu1 }
 0x4d5   :  { %v1441_v34 = vpop.f32.mrf.mxu1 }
 0x4d6   :  { %3224 = vrcp.f32 %v1441_v34 }
 0x4d7   :  { %v1443_v62 = vpop.f32.mrf.mxu1 }
 0x4d8   :  { %3226 = vrcp.f32 %v1443_v62 }
 0x4d9   :  { %3228 = vrcp.f32 %v1439_v36  ;;  %v1445_v6 = vpop.f32.mrf.mxu1 }
 0x4da   :  { %3230 = vrcp.f32 %v1445_v6 }
 0x4db   :  { %3232 = vrcp.f32 %v1433_v57  ;;  %v3221_v35 = vpop.eup %3220 }
 0x4dc   :  { %3234 = vrcp.f32 %v1425_v0 }
 0x4dd   :  { %3236 = vrcp.f32 %v1429_v49 }
 0x4de   :  { %3238 = vrcp.f32 %v1421_v28 }
 0x4df   :  { %3240 = vrcp.f32 %v1423_v32  ;;  %v3223_v20 = vpop.eup %3222 }
 0x4e0   :  { %3242 = vrcp.f32 %v1415_v10  ;;  %v1507_v28 = vmul.f32 %v3223_v20, %v4427_v43 }
 0x4e1   :  { %3244 = vrcp.f32 %v1419_v45 }
 0x4e2   :  { %3246 = vrcp.f32 %v1411_v13 }
 0x4e3   :  { %3248 = vrcp.f32 %v1413_v24  ;;  %v3225_v53 = vpop.eup %3224 }
 0x4e4   :  { %3250 = vrcp.f32 %v1405_v56  ;;  %v1509_v49 = vmul.f32 %v3225_v53, %v4431_v47 }
 0x4e5   :  { %v3227_v1 = vpop.eup %3226  ;;  %3252 = vrcp.f32 %v1409_v9 }
 0x4e6   :  { %v3229_v34 = vpop.eup %3228  ;;  %3254 = vrcp.f32 %v1401_v14  ;;  %v1510_v57 = vmul.f32 %v3227_v1, %v4433_v5 }
 0x4e7   :  { %v3231_v36 = vpop.eup %3230  ;;  %3256 = vrcp.f32 %v1403_v7  ;;  %v1508_v56 = vmul.f32 %v3229_v34, %v4429_v26  ;;  %v1505_v7 = vmul.f32 %v3221_v35, %v4423_v38 }
 0x4e8   :  { %v3233_v0 = vpop.eup %3232  ;;  %3258 = vrcp.f32 %v1395_v50  ;;  %v1511_v32 = vmul.f32 %v3231_v36, %v4435_v8 }
 0x4e9   :  { %v3235_v6 = vpop.eup %3234  ;;  %3260 = vrcp.f32 %v1399_v46  ;;  %v1526_v5 = vpack.c.bf16 %v1510_v57, %v1508_v56  ;;  %v1506_v47 = vmul.f32 %v3233_v0, %v4425_v54  ;;  %v1525_v20 = vpack.c.bf16 %v1507_v28, %v1505_v7 }
 0x4ea   :  { %v3237_v13 = vpop.eup %3236  ;;  %3262 = vrcp.f32 %v4447_v12  ;;  %v1527_v14 = vpack.c.bf16 %v1511_v32, %v1509_v49  ;;  %v1503_v43 = vmul.f32 %v3235_v6, %v4419_v16 }
 0x4eb   :  { %v3239_v9 = vpop.eup %3238  ;;  %3264 = vrcp.f32 %v4453_v59  ;;  %v1504_v8 = vmul.f32 %v3237_v13, %v4421_v41 }
 0x4ec   :  { %v3241_v50 = vpop.eup %3240  ;;  %3266 = vrcp.f32 %v4443_v27  ;;  %1533 = vmatprep.subr.bf16.mxu0 %v1527_v14  ;;  %v1501_v38 = vmul.f32 %v3239_v9, %v4415_v19 }
 0x4ed   :  { %v3243_v26 = vpop.eup %3242  ;;  %3268 = vrcp.f32 %v4445_v3  ;;  %1534 = vmatpush1.bf16.msra.mxu0 %v1526_v5  ;;  %v1524_v12 = vpack.c.bf16 %v1506_v47, %v1504_v8  ;;  %v1502_v27 = vmul.f32 %v3241_v50, %v4417_v21  ;;  %v5638_v5 = vpack.c.bf16 %v4451_v51, %v4449_v33  ;;  %v3505_v33 = vld [vmem:[%s5441_s1 + $0x8] sm:$0xff]   ;;  %v3506_v51 = vld [vmem:[%s5441_s1 + $0x10] sm:$0xff]   ;;  %v3508_v47 = vld [vmem:[%s5441_s1 + $0x20] sm:$0xff]  }
 0x4ee   :  { %v3245_v35 = vpop.eup %3244  ;;  %3270 = vrcp.f32 %v4441_v61  ;;  %1535 = vmatprep.subr.bf16.mxu0 %v1525_v20  ;;  %v1523_v16 = vpack.c.bf16 %v1503_v43, %v1501_v38  ;;  %v1499_v46 = vmul.f32 %v3243_v26, %v4411_v15  ;;  %v3509_v50 = vld [vmem:[%s5441_s1 + $0x28] sm:$0xff]   ;;  %v3510_v20 = vld [vmem:[%s5441_s1 + $0x30] sm:$0xff]   ;;  %v3511_v43 = vld [vmem:[%s5441_s1 + $0x38] sm:$0xff]  }
 0x4ef   :  { %v3247_v54 = vpop.eup %3246  ;;  %3272 = vrcp.f32 %v4439_v48  ;;  %v1500_v41 = vmul.f32 %v3245_v35, %v4413_v60  ;;  %v3512_v26 = vld [vmem:[%s5441_s1 + $0x40] sm:$0xff]   ;;  %v3513_v8 = vld [vmem:[%s5441_s1 + $0x48] sm:$0xff]   ;;  %v3514_v35 = vld [vmem:[%s5441_s1 + $0x50] sm:$0xff]  }
 0x4f0   :  { %v3249_v59 = vpop.eup %3248  ;;  %3274 = vrcp.f32 %v4437_v55  ;;  %v1497_v19 = vmul.f32 %v3247_v54, %v4407_v40  ;;  %v3515_v38 = vld [vmem:[%s5441_s1 + $0x58] sm:$0xff]   ;;  %v3516_v54 = vld [vmem:[%s5441_s1 + $0x60] sm:$0xff]  }
 0x4f1   :  { %v3251_v3 = vpop.eup %3250  ;;  %1536 = vmatpush1.bf16.msra.mxu0 %v1524_v12  ;;  %v1522_v10 = vpack.c.bf16 %v1502_v27, %v1500_v41  ;;  %v1498_v21 = vmul.f32 %v3249_v59, %v4409_v58  ;;  %v3517_v12 = vld [vmem:[%s5441_s1 + $0x68] sm:$0xff]   ;;  %v3518_v27 = vld [vmem:[%s5441_s1 + $0x70] sm:$0xff]   ;;  %v3519_v59 = vld [vmem:[%s5441_s1 + $0x78] sm:$0xff]  }
 0x4f2   :  { %v3253_v24 = vpop.eup %3252  ;;  %1537 = vmatprep.subr.bf16.mxu0 %v1523_v16  ;;  %v1521_v62 = vpack.c.bf16 %v1499_v46, %v1497_v19  ;;  %v1495_v48 = vmul.f32 %v3251_v3, %v4403_v63  ;;  %v3520_v16 = vld [vmem:[%s5441_s1 + $0x80] sm:$0xff]   ;;  %v3521_v46 = vld [vmem:[%s5441_s1 + $0x88] sm:$0xff]   ;;  %v3522_v3 = vld [vmem:[%s5441_s1 + $0x90] sm:$0xff]  }
 0x4f3   :  { %v3255_v61 = vpop.eup %3254  ;;  %v1496_v15 = vmul.f32 %v3253_v24, %v4405_v18  ;;  %v3523_v41 = vld [vmem:[%s5441_s1 + $0x98] sm:$0xff]   ;;  %v3524_v24 = vld [vmem:[%s5441_s1 + $0xa0] sm:$0xff]   ;;  %v3525_v19 = vld [vmem:[%s5441_s1 + $0xa8] sm:$0xff]  }
 0x4f4   :  { %v3257_v45 = vpop.eup %3256  ;;  %v1493_v60 = vmul.f32 %v3255_v61, %v4399_v22  ;;  %v3526_v61 = vld [vmem:[%s5441_s1 + $0xb0] sm:$0xff]  }
 0x4f5   :  { %v3259_v53 = vpop.eup %3258  ;;  %1538 = vmatpush1.bf16.msra.mxu0 %v1522_v10  ;;  %v1520_v34 = vpack.c.bf16 %v1498_v21, %v1496_v15  ;;  %v1494_v40 = vmul.f32 %v3257_v45, %v4401_v2  ;;  %v3527_v21 = vld [vmem:[%s5441_s1 + $0xb8] sm:$0xff]  }
 0x4f6   :  { %v3261_v1 = vpop.eup %3260  ;;  %1539 = vmatprep.subr.bf16.mxu0 %v1521_v62  ;;  %v1519_v57 = vpack.c.bf16 %v1495_v48, %v1493_v60  ;;  %v1491_v58 = vmul.f32 %v3259_v53, %v4395_v4 }
 0x4f7   :  { %v3263_v55 = vpop.eup %3262  ;;  %v1492_v63 = vmul.f32 %v3261_v1, %v4397_v42 }
 0x4f8   :  { %v3265_v36 = vpop.eup %3264  ;;  %v1489_v18 = vmul.f32 %v3263_v55, %v4391_v23 }
 0x4f9   :  { %v3267_v0 = vpop.eup %3266  ;;  %1540 = vmatpush1.bf16.msra.mxu0 %v1520_v34  ;;  %v1518_v28 = vpack.c.bf16 %v1494_v40, %v1492_v63  ;;  %v1490_v22 = vmul.f32 %v3265_v36, %v4393_v11 }
 0x4fa   :  { %v3269_v49 = vpop.eup %3268  ;;  %1541 = vmatprep.subr.bf16.mxu0 %v1519_v57  ;;  %v1517_v6 = vpack.c.bf16 %v1491_v58, %v1489_v18  ;;  %v1487_v56 = vmul.f32 %v3267_v0, %v4387_v17  ;;  %v2960_v17 = vld.sshfl [vmem:[%s5440_s0 + $0x4] sm:$0x33 pattern:$0x76325410] }
 0x4fb   :  { %v3271_v32 = vpop.eup %3270  ;;  %v1488_v13 = vmul.f32 %v3269_v49, %v4389_v25  ;;  %v5637_v25 = vpack.c.bf16 %v4459_v31, %v4457_v30  ;;  %v3504_v30 = vld [vmem:[%s5441_s1] sm:$0xff]   ;;  %v3507_v31 = vld [vmem:[%s5441_s1 + $0x18] sm:$0xff]  }
 0x4fc   :  { %v3273_v2 = vpop.eup %3272  ;;  %v1485_v4 = vmul.f32 %v3271_v32, %v4385_v29  ;;  %v1646_v29 = vcombine.high %v2960_v17, %v2960_v17 }
 0x4fd   :  { %1542 = vmatpush1.bf16.msra.mxu0 %v1518_v28  ;;  %v3275_v14 = vpop.eup %3274  ;;  %v1516_v42 = vpack.c.bf16 %v1490_v22, %v1488_v13  ;;  %v1483_v9 = vmul.f32 %v3273_v2, %v4383_v37  ;;  %v79_v37 = vld [vmem:[%s5442_s2] sm:$0x3] }
 0x4fe   :  { %1543 = vmatprep.subr.bf16.mxu0 %v1517_v6  ;;  %v1515_v7 = vpack.c.bf16 %v1487_v56, %v1485_v4  ;;  %v1481_v23 = vmul.f32 %v3275_v14, %v4381_v39  ;;  %v1648_v39 = vsel %vm318_vm0, %v2960_v17, 0 }
 0x500   :  { %v1513_v11 = vpack.c.bf16 %v1483_v9, %v1481_v23 }
 0x501   :  { %1544 = vmatpush1.bf16.msra.mxu0 %v1516_v42 }
 0x502   :  { %1545 = vmatprep.subr.bf16.mxu0 %v1515_v7 }
 0x505   :  { %1546 = vmatpush1.bf16.msra.mxu0 %v5637_v25 }
 0x506   :  { %1547 = vmatprep.subr.bf16.mxu0 %v1513_v11 }
 0x509   :  { %1548 = vmatpush1.bf16.msra.mxu0 %v5638_v5 }
 0x50a   :  { %2961 = vmatprep.subr.msk.bf16.mxu0 %vm318_vm0, %v1646_v29 }
 0x50c   :  { %1566 = vmatmul.mubr.bf16.vlgmr.msra.gmra.mxu0 %v79_v37 }
 0x50d   :  { %1668 = vmatpush1.bf16.msra.mxu0 %v1648_v39  ;;  %1685 = vmatprep.mubr.bf16.mxu0 %v5604_v44 }
 0x514   :  { %2962 = vmatmul.mubr.msk.bf16.vlgmr.msra.gmra.mxu0 %vm245_vm1, %v3504_v30 }
 0x515   :  { %1695 = vmatprep.mubr.bf16.mxu0 %v5604_v44 }
 0x51c   :  { %2963 = vmatmul.mubr.msk.bf16.gmra.mxu0 %vm245_vm1, %v3505_v33 }
 0x51d   :  { %1705 = vmatprep.mubr.bf16.mxu0 %v5604_v44 }
 0x524   :  { %2964 = vmatmul.mubr.msk.bf16.gmra.mxu0 %vm245_vm1, %v3506_v51 }
 0x525   :  { %1715 = vmatprep.mubr.bf16.mxu0 %v5604_v44 }
 0x52c   :  { %2965 = vmatmul.mubr.msk.bf16.gmra.mxu0 %vm245_vm1, %v3507_v31 }
 0x52d   :  { %1725 = vmatprep.mubr.bf16.mxu0 %v5604_v44 }
 0x534   :  { %2966 = vmatmul.mubr.msk.bf16.gmra.mxu0 %vm245_vm1, %v3508_v47 }
 0x535   :  { %1735 = vmatprep.mubr.bf16.mxu0 %v5604_v44 }
 0x53c   :  { %2967 = vmatmul.mubr.msk.bf16.gmra.mxu0 %vm245_vm1, %v3509_v50 }
 0x53d   :  { %1745 = vmatprep.mubr.bf16.mxu0 %v5604_v44 }
 0x544   :  { %2968 = vmatmul.mubr.msk.bf16.gmra.mxu0 %vm245_vm1, %v3510_v20 }
 0x545   :  { %1755 = vmatprep.mubr.bf16.mxu0 %v5604_v44 }
 0x54c   :  { %2969 = vmatmul.mubr.msk.bf16.gmra.mxu0 %vm245_vm1, %v3511_v43 }
 0x54d   :  { %1765 = vmatprep.mubr.bf16.mxu0 %v5604_v44 }
 0x554   :  { %2970 = vmatmul.mubr.msk.bf16.gmra.mxu0 %vm245_vm1, %v3512_v26 }
 0x555   :  { %1775 = vmatprep.mubr.bf16.mxu0 %v5604_v44 }
 0x55c   :  { %2971 = vmatmul.mubr.msk.bf16.gmra.mxu0 %vm245_vm1, %v3513_v8 }
 0x55d   :  { %1785 = vmatprep.mubr.bf16.mxu0 %v5604_v44 }
 0x564   :  { %2972 = vmatmul.mubr.msk.bf16.gmra.mxu0 %vm245_vm1, %v3514_v35 }
 0x565   :  { %1795 = vmatprep.mubr.bf16.mxu0 %v5604_v44 }
 0x56c   :  { %2973 = vmatmul.mubr.msk.bf16.gmra.mxu0 %vm245_vm1, %v3515_v38 }
 0x56d   :  { %1805 = vmatprep.mubr.bf16.mxu0 %v5604_v44 }
 0x574   :  { %2974 = vmatmul.mubr.msk.bf16.gmra.mxu0 %vm245_vm1, %v3516_v54 }
 0x575   :  { %1815 = vmatprep.mubr.bf16.mxu0 %v5604_v44 }
 0x57c   :  { %2975 = vmatmul.mubr.msk.bf16.gmra.mxu0 %vm245_vm1, %v3517_v12 }
 0x57d   :  { %1825 = vmatprep.mubr.bf16.mxu0 %v5604_v44 }
 0x584   :  { %2976 = vmatmul.mubr.msk.bf16.gmra.mxu0 %vm245_vm1, %v3518_v27 }
 0x585   :  { %1835 = vmatprep.mubr.bf16.mxu0 %v5604_v44 }
 0x58c   :  { %2977 = vmatmul.mubr.msk.bf16.gmra.mxu0 %vm245_vm1, %v3519_v59 }
 0x58d   :  { %1845 = vmatprep.mubr.bf16.mxu0 %v5604_v44 }
 0x594   :  { %2978 = vmatmul.mubr.msk.bf16.gmra.mxu0 %vm245_vm1, %v3520_v16 }
 0x595   :  { %1855 = vmatprep.mubr.bf16.mxu0 %v5604_v44 }
 0x59c   :  { %2979 = vmatmul.mubr.msk.bf16.gmra.mxu0 %vm245_vm1, %v3521_v46 }
 0x59d   :  { %1865 = vmatprep.mubr.bf16.mxu0 %v5604_v44 }
 0x5a4   :  { %2980 = vmatmul.mubr.msk.bf16.gmra.mxu0 %vm245_vm1, %v3522_v3 }
 0x5a5   :  { %1875 = vmatprep.mubr.bf16.mxu0 %v5604_v44 }
 0x5ac   :  { %2981 = vmatmul.mubr.msk.bf16.gmra.mxu0 %vm245_vm1, %v3523_v41 }
 0x5ad   :  { %1885 = vmatprep.mubr.bf16.mxu0 %v5604_v44 }
 0x5b4   :  { %2982 = vmatmul.mubr.msk.bf16.gmra.mxu0 %vm245_vm1, %v3524_v24 }
 0x5b5   :  { %1895 = vmatprep.mubr.bf16.mxu0 %v5604_v44 }
 0x5bc   :  { %2983 = vmatmul.mubr.msk.bf16.gmra.mxu0 %vm245_vm1, %v3525_v19 }
 0x5bd   :  { %1905 = vmatprep.mubr.bf16.mxu0 %v5604_v44 }
 0x5c4   :  { %2984 = vmatmul.mubr.msk.bf16.gmra.mxu0 %vm245_vm1, %v3526_v61 }
 0x5c5   :  { %1915 = vmatprep.mubr.bf16.mxu0 %v5604_v44 }
 0x5cc   :  { %v4628_v10 = vpop.f32.mrf.mxu0  ;;  %2985 = vmatmul.mubr.msk.bf16.gmra.mxu0 %vm245_vm1, %v3527_v21 }
 0x5cd   :  { %5639 = vst [vmem:[#allocation34_spill] sm:$0xff] %v4628_v10 }
 0x5ce   :  { %v4634_v45 = vpop.f32.mrf.mxu0 }
 0x5cf   :  { %5640 = vst [vmem:[#allocation33_spill] sm:$0xff] %v4634_v45 }
 0x5d0   :  { %v1571_v62 = vpop.f32.mrf.mxu0 }
 0x5d2   :  { %v1572_v48 = vpop.f32.mrf.mxu0 }
 0x5d4   :  { %v1687_v53 = vpop.f32.mrf.mxu0 }
 0x5d6   :  { %v1689_v15 = vpop.f32.mrf.mxu0 }
 0x5d8   :  { %v1691_v1 = vpop.f32.mrf.mxu0 }
 0x5d9   :  { %v2198_v60 = vmax.f32 %v1687_v53, %v1691_v1 }
 0x5da   :  { %v1693_v55 = vpop.f32.mrf.mxu0 }
 0x5db   :  { %v2207_v34 = vmax.f32 %v1689_v15, %v1693_v55 }
 0x5dc   :  { %v1697_v40 = vpop.f32.mrf.mxu0 }
 0x5dd   :  { %v2199_v36 = vmax.f32 %v2198_v60, %v1697_v40 }
 0x5de   :  { %v1699_v57 = vpop.f32.mrf.mxu0 }
 0x5df   :  { %v2208_v58 = vmax.f32 %v2207_v34, %v1699_v57 }
 0x5e0   :  { %v1701_v0 = vpop.f32.mrf.mxu0 }
 0x5e1   :  { %v2200_v63 = vmax.f32 %v2199_v36, %v1701_v0 }
 0x5e2   :  { %v1703_v49 = vpop.f32.mrf.mxu0 }
 0x5e3   :  { %v2201_v18 = vrot.slane %v2200_v63, 4  ;;  %v2209_v32 = vmax.f32 %v2208_v58, %v1703_v49 }
 0x5e4   :  { %v4636_v28 = vpop.f32.mrf.mxu0 }
 0x5e5   :  { %v2202_v22 = vmax.f32 %v2200_v63, %v2201_v18  ;;  %v2210_v6 = vrot.slane %v2209_v32, 4 }
 0x5e6   :  { %v4638_v56 = vpop.f32.mrf.mxu0 }
 0x5e7   :  { %v2203_v2 = vrot.slane %v2202_v22, 2  ;;  %v2211_v13 = vmax.f32 %v2209_v32, %v2210_v6 }
 0x5e8   :  { %v4640_v4 = vpop.f32.mrf.mxu0 }
 0x5e9   :  { %v2204_v14 = vmax.f32 %v2202_v22, %v2203_v2  ;;  %v2212_v42 = vrot.slane %v2211_v13, 2  ;;  %v2216_v7 = vmax.f32 %v4636_v28, %v4640_v4 }
 0x5ea   :  { %v4644_v9 = vpop.f32.mrf.mxu0 }
 0x5eb   :  { %v2205_v23 = vrot.slane %v2204_v14, 1  ;;  %v2213_v17 = vmax.f32 %v2211_v13, %v2212_v42  ;;  %v2225_v11 = vmax.f32 %v4638_v56, %v4644_v9 }
 0x5ec   :  { %v4648_v25 = vpop.f32.mrf.mxu0 }
 0x5ed   :  { %v2206_v29 = vmax.f32 %v2204_v14, %v2205_v23  ;;  %v2214_v5 = vrot.slane %v2213_v17, 1  ;;  %v2217_v37 = vmax.f32 %v2216_v7, %v4648_v25 }
 0x5ee   :  { %v4651_v39 = vpop.f32.mrf.mxu0 }
 0x5ef   :  { %v2270_v30 = vsub.f32 %v1687_v53, %v2206_v29  ;;  %v2272_v33 = vsub.f32 %v1691_v1, %v2206_v29  ;;  %v2274_v51 = vsub.f32 %v1697_v40, %v2206_v29  ;;  %v2276_v31 = vsub.f32 %v1701_v0, %v2206_v29 }
 0x5f0   :  { %v2215_v47 = vmax.f32 %v2213_v17, %v2214_v5  ;;  %v2226_v50 = vmax.f32 %v2225_v11, %v4651_v39  ;;  %v1721_v20 = vpop.f32.mrf.mxu0 }
 0x5f1   :  { %v2302_v43 = vmul.f32 1.442695, %v2270_v30  ;;  %v2306_v26 = vmul.f32 1.442695, %v2272_v33  ;;  %v2310_v8 = vmul.f32 1.442695, %v2274_v51  ;;  %v2218_v35 = vmax.f32 %v2217_v37, %v1721_v20 }
 0x5f2   :  { %v2314_v38 = vmul.f32 1.442695, %v2276_v31  ;;  %v2271_v54 = vsub.f32 %v1689_v15, %v2215_v47  ;;  %v2273_v12 = vsub.f32 %v1693_v55, %v2215_v47  ;;  %v2275_v27 = vsub.f32 %v1699_v57, %v2215_v47  ;;  %v4654_v59 = vpop.f32.mrf.mxu0 }
 0x5f3   :  { %3276 = vpow2.f32 %v2302_v43  ;;  %v2277_v16 = vsub.f32 %v1703_v49, %v2215_v47  ;;  %v2219_v46 = vrot.slane %v2218_v35, 4  ;;  %v2227_v3 = vmax.f32 %v2226_v50, %v4654_v59 }
 0x5f4   :  { %3278 = vpow2.f32 %v2306_v26  ;;  %v2304_v41 = vmul.f32 1.442695, %v2271_v54  ;;  %v2308_v24 = vmul.f32 1.442695, %v2273_v12  ;;  %v4657_v19 = vpop.f32.mrf.mxu0  ;;  %v2312_v61 = vmul.f32 1.442695, %v2275_v27 }
 0x5f5   :  { %3280 = vpow2.f32 %v2310_v8  ;;  %v2220_v21 = vmax.f32 %v2218_v35, %v2219_v46  ;;  %v2228_v62 = vrot.slane %v2227_v3, 4  ;;  %v2316_v48 = vmul.f32 1.442695, %v2277_v16 }
 0x5f6   :  { %3282 = vpow2.f32 %v2314_v38  ;;  %v4659_v53 = vpop.f32.mrf.mxu0 }
 0x5f7   :  { %3284 = vpow2.f32 %v2304_v41  ;;  %v2221_v15 = vrot.slane %v2220_v21, 2  ;;  %v2229_v1 = vmax.f32 %v2227_v3, %v2228_v62 }
 0x5f8   :  { %3286 = vpow2.f32 %v2308_v24  ;;  %v4661_v60 = vpop.f32.mrf.mxu0 }
 0x5f9   :  { %3288 = vpow2.f32 %v2312_v61  ;;  %v2222_v55 = vmax.f32 %v2220_v21, %v2221_v15  ;;  %v2230_v34 = vrot.slane %v2229_v1, 2  ;;  %v2234_v40 = vmax.f32 %v4657_v19, %v4661_v60 }
 0x5fa   :  { %3290 = vpow2.f32 %v2316_v48  ;;  %v4665_v36 = vpop.f32.mrf.mxu0 }
 0x5fb   :  { %v2223_v57 = vrot.slane %v2222_v55, 1  ;;  %v2231_v58 = vmax.f32 %v2229_v1, %v2230_v34  ;;  %v2243_v0 = vmax.f32 %v4659_v53, %v4665_v36 }
 0x5fc   :  { %v4669_v63 = vpop.f32.mrf.mxu0 }
 0x5fd   :  { %v2224_v49 = vmax.f32 %v2222_v55, %v2223_v57  ;;  %v2232_v18 = vrot.slane %v2231_v58, 1  ;;  %v2235_v32 = vmax.f32 %v2234_v40, %v4669_v63 }
 0x5fe   :  { %v4672_v22 = vpop.f32.mrf.mxu0 }
 0x5ff   :  { %v2278_v6 = vsub.f32 %v4636_v28, %v2224_v49  ;;  %v2280_v2 = vsub.f32 %v4640_v4, %v2224_v49  ;;  %v2282_v13 = vsub.f32 %v4648_v25, %v2224_v49  ;;  %v2284_v14 = vsub.f32 %v1721_v20, %v2224_v49 }
 0x600   :  { %v4677_v42 = vpop.eup %3276  ;;  %v2233_v7 = vmax.f32 %v2231_v58, %v2232_v18  ;;  %v2244_v23 = vmax.f32 %v2243_v0, %v4672_v22  ;;  %v4680_v17 = vpop.f32.mrf.mxu0 }
 0x601   :  { %5641 = vst [vmem:[#allocation30_spill] sm:$0xff] %v4677_v42  ;;  %v4682_v11 = vpop.eup %3278  ;;  %v2318_v29 = vmul.f32 1.442695, %v2278_v6  ;;  %v2322_v5 = vmul.f32 1.442695, %v2280_v2  ;;  %v2236_v30 = vmax.f32 %v2235_v32, %v4680_v17 }
 0x602   :  { %5642 = vst [vmem:[#allocation29_spill] sm:$0xff] %v4682_v11  ;;  %v2326_v37 = vmul.f32 1.442695, %v2282_v13  ;;  %v4685_v28 = vpop.eup %3280  ;;  %v2330_v4 = vmul.f32 1.442695, %v2284_v14  ;;  %v2279_v25 = vsub.f32 %v4638_v56, %v2233_v7  ;;  %v2281_v33 = vsub.f32 %v4644_v9, %v2233_v7  ;;  %v4690_v31 = vpop.f32.mrf.mxu0 }
 0x603   :  { %5643 = vst [vmem:[#allocation25_spill] sm:$0xff] %v4685_v28  ;;  %v2283_v51 = vsub.f32 %v4651_v39, %v2233_v7  ;;  %v4692_v47 = vpop.eup %3282  ;;  %3292 = vpow2.f32 %v2318_v29  ;;  %v2285_v50 = vsub.f32 %v4654_v59, %v2233_v7  ;;  %v2237_v20 = vrot.slane %v2236_v30, 4 }
 0x604   :  { %5644 = vst [vmem:[#allocation26_spill] sm:$0xff] %v4692_v47  ;;  %v2245_v43 = vmax.f32 %v2244_v23, %v4690_v31  ;;  %v4696_v26 = vpop.eup %3284  ;;  %3294 = vpow2.f32 %v2322_v5  ;;  %v2320_v8 = vmul.f32 1.442695, %v2279_v25  ;;  %v2324_v35 = vmul.f32 1.442695, %v2281_v33  ;;  %v4698_v38 = vpop.f32.mrf.mxu0 }
 0x605   :  { %5645 = vst [vmem:[#allocation24_spill] sm:$0xff] %v4696_v26  ;;  %v2328_v56 = vmul.f32 1.442695, %v2283_v51  ;;  %v4700_v9 = vpop.eup %3286  ;;  %3296 = vpow2.f32 %v2326_v37  ;;  %v2332_v39 = vmul.f32 1.442695, %v2285_v50  ;;  %v2238_v54 = vmax.f32 %v2236_v30, %v2237_v20 }
 0x606   :  { %5646 = vst [vmem:[#allocation23_spill] sm:$0xff] %v4700_v9  ;;  %v2246_v12 = vrot.slane %v2245_v43, 4  ;;  %v4702_v27 = vpop.eup %3288  ;;  %3298 = vpow2.f32 %v2330_v4  ;;  %v4704_v59 = vpop.f32.mrf.mxu0 }
 0x607   :  { %5647 = vst [vmem:[#allocation28_spill] sm:$0xff] %v4702_v27  ;;  %v4712_v41 = vpop.eup %3290  ;;  %3300 = vpow2.f32 %v2320_v8  ;;  %v2239_v24 = vrot.slane %v2238_v54, 2 }
 0x608   :  { %5648 = vst [vmem:[#allocation27_spill] sm:$0xff] %v4712_v41  ;;  %v2247_v61 = vmax.f32 %v2245_v43, %v2246_v12  ;;  %3302 = vpow2.f32 %v2324_v35  ;;  %v4714_v21 = vpop.f32.mrf.mxu0 }
 0x609   :  { %3304 = vpow2.f32 %v2328_v56  ;;  %v2240_v48 = vmax.f32 %v2238_v54, %v2239_v24  ;;  %v2252_v1 = vmax.f32 %v4698_v38, %v4714_v21 }
 0x60a   :  { %v2248_v15 = vrot.slane %v2247_v61, 2  ;;  %3306 = vpow2.f32 %v2332_v39  ;;  %v4720_v55 = vpop.f32.mrf.mxu0 }
 0x60b   :  { %v2241_v34 = vrot.slane %v2240_v48, 1  ;;  %v2261_v57 = vmax.f32 %v4704_v59, %v4720_v55 }
 0x60c   :  { %v2249_v40 = vmax.f32 %v2247_v61, %v2248_v15  ;;  %v4724_v58 = vpop.f32.mrf.mxu0 }
 0x60d   :  { %v2242_v0 = vmax.f32 %v2240_v48, %v2241_v34  ;;  %v2253_v18 = vmax.f32 %v2252_v1, %v4724_v58 }
 0x60e   :  { %v2250_v49 = vrot.slane %v2249_v40, 1  ;;  %v4727_v32 = vpop.f32.mrf.mxu0 }
 0x60f   :  { %v2286_v6 = vsub.f32 %v4657_v19, %v2242_v0  ;;  %v2288_v2 = vsub.f32 %v4661_v60, %v2242_v0  ;;  %v2290_v13 = vsub.f32 %v4669_v63, %v2242_v0  ;;  %v2292_v14 = vsub.f32 %v4680_v17, %v2242_v0 }
 0x610   :  { %v4733_v7 = vpop.eup %3292  ;;  %v2251_v23 = vmax.f32 %v2249_v40, %v2250_v49  ;;  %v2262_v29 = vmax.f32 %v2261_v57, %v4727_v32  ;;  %v4736_v5 = vpop.f32.mrf.mxu0 }
 0x611   :  { %5649 = vst [vmem:[#allocation22_spill] sm:$0xff] %v4733_v7  ;;  %v4738_v37 = vpop.eup %3294  ;;  %v2334_v30 = vmul.f32 1.442695, %v2286_v6  ;;  %v2338_v4 = vmul.f32 1.442695, %v2288_v2  ;;  %v2254_v19 = vmax.f32 %v2253_v18, %v4736_v5 }
 0x612   :  { %5650 = vst [vmem:[#allocation21_spill] sm:$0xff] %v4738_v37  ;;  %v2342_v25 = vmul.f32 1.442695, %v2290_v13  ;;  %v4741_v33 = vpop.eup %3296  ;;  %v2346_v60 = vmul.f32 1.442695, %v2292_v14  ;;  %v2287_v63 = vsub.f32 %v4659_v53, %v2251_v23  ;;  %v2289_v17 = vsub.f32 %v4665_v36, %v2251_v23  ;;  %v4746_v50 = vpop.f32.mrf.mxu0 }
 0x613   :  { %5651 = vst [vmem:[#allocation17_spill] sm:$0xff] %v4741_v33  ;;  %v2291_v51 = vsub.f32 %v4672_v22, %v2251_v23  ;;  %v4748_v20 = vpop.eup %3298  ;;  %3308 = vpow2.f32 %v2334_v30  ;;  %v2293_v43 = vsub.f32 %v4690_v31, %v2251_v23  ;;  %v2255_v8 = vrot.slane %v2254_v19, 4 }
 0x614   :  { %5652 = vst [vmem:[#allocation18_spill] sm:$0xff] %v4748_v20  ;;  %v2263_v35 = vmax.f32 %v2262_v29, %v4746_v50  ;;  %v4752_v56 = vpop.eup %3300  ;;  %3310 = vpow2.f32 %v2338_v4  ;;  %v2336_v39 = vmul.f32 1.442695, %v2287_v63  ;;  %v2340_v54 = vmul.f32 1.442695, %v2289_v17  ;;  %v4754_v12 = vpop.f32.mrf.mxu0 }
 0x615   :  { %5653 = vst [vmem:[#allocation16_spill] sm:$0xff] %v4752_v56  ;;  %v2344_v53 = vmul.f32 1.442695, %v2291_v51  ;;  %v4756_v36 = vpop.eup %3302  ;;  %3312 = vpow2.f32 %v2342_v25  ;;  %v2348_v22 = vmul.f32 1.442695, %v2293_v43  ;;  %v2256_v24 = vmax.f32 %v2254_v19, %v2255_v8 }
 0x616   :  { %5654 = vst [vmem:[#allocation15_spill] sm:$0xff] %v4756_v36  ;;  %v2264_v61 = vrot.slane %v2263_v35, 4  ;;  %v4758_v48 = vpop.eup %3304  ;;  %3314 = vpow2.f32 %v2346_v60  ;;  %v4760_v31 = vpop.f32.mrf.mxu0 }
 0x617   :  { %5655 = vst [vmem:[#allocation20_spill] sm:$0xff] %v4758_v48  ;;  %v4768_v40 = vpop.eup %3306  ;;  %3316 = vpow2.f32 %v2336_v39  ;;  %v2257_v57 = vrot.slane %v2256_v24, 2  ;;  %v1942_v49 = vmax.f32 %v4754_v12, %v4760_v31 }
 0x618   :  { %5656 = vst [vmem:[#allocation19_spill] sm:$0xff] %v4768_v40  ;;  %v2265_v0 = vmax.f32 %v2263_v35, %v2264_v61  ;;  %3318 = vpow2.f32 %v2340_v54  ;;  %v4772_v18 = vpop.f32.mrf.mxu0 }
 0x619   :  { %3320 = vpow2.f32 %v2344_v53  ;;  %v2258_v2 = vmax.f32 %v2256_v24, %v2257_v57  ;;  %1943 = vmax.xlane.f32.xlu0 %v1942_v49 }
 0x61a   :  { %v2266_v13 = vrot.slane %v2265_v0, 2  ;;  %3322 = vpow2.f32 %v2348_v22  ;;  %v4776_v14 = vpop.f32.mrf.mxu0 }
 0x61b   :  { %v2259_v23 = vrot.slane %v2258_v2, 1  ;;  %v1945_v30 = vmax.f32 %v4772_v18, %v4776_v14 }
 0x61c   :  { %v2267_v29 = vmax.f32 %v2265_v0, %v2266_v13  ;;  %v4780_v4 = vpop.f32.mrf.mxu0 }
 0x61d   :  { %v2260_v25 = vmax.f32 %v2258_v2, %v2259_v23  ;;  %1946 = vmax.xlane.f32.xlu1 %v1945_v30 }
 0x61e   :  { %v2268_v19 = vrot.slane %v2267_v29, 1  ;;  %v4782_v60 = vpop.f32.mrf.mxu0 }
 0x61f   :  { %v2294_v63 = vsub.f32 %v4698_v38, %v2260_v25  ;;  %v2296_v17 = vsub.f32 %v4714_v21, %v2260_v25  ;;  %v2298_v51 = vsub.f32 %v4724_v58, %v2260_v25  ;;  %v2300_v43 = vsub.f32 %v4736_v5, %v2260_v25 }
 0x620   :  { %v4788_v8 = vpop.eup %3308  ;;  %v2269_v35 = vmax.f32 %v2267_v29, %v2268_v19  ;;  %v4790_v39 = vpop.f32.mrf.mxu0  ;;  %v1948_v54 = vmax.f32 %v4780_v4, %v4782_v60 }
 0x621   :  { %5657 = vst [vmem:[#allocation14_spill] sm:$0xff] %v4788_v8  ;;  %v4794_v53 = vpop.eup %3310  ;;  %v2350_v22 = vmul.f32 1.442695, %v2294_v63  ;;  %v2354_v24 = vmul.f32 1.442695, %v2296_v17 }
 0x622   :  { %5658 = vst [vmem:[#allocation13_spill] sm:$0xff] %v4794_v53  ;;  %v2358_v61 = vmul.f32 1.442695, %v2298_v51  ;;  %v4796_v38 = vpop.eup %3312  ;;  %v2362_v21 = vmul.f32 1.442695, %v2300_v43  ;;  %v2295_v58 = vsub.f32 %v4704_v59, %v2269_v35  ;;  %v2297_v5 = vsub.f32 %v4720_v55, %v2269_v35  ;;  %1949 = vmax.xlane.f32.xlu0 %v1948_v54  ;;  %v4801_v0 = vpop.f32.mrf.mxu0 }
 0x623   :  { %5659 = vst [vmem:[#allocation9_spill] sm:$0xff] %v4796_v38  ;;  %v2299_v57 = vsub.f32 %v4727_v32, %v2269_v35  ;;  %v4803_v49 = vpop.eup %3314  ;;  %3324 = vpow2.f32 %v2350_v22  ;;  %v2301_v2 = vsub.f32 %v4746_v50, %v2269_v35  ;;  %v1951_v13 = vmax.f32 %v4790_v39, %v4801_v0 }
 0x624   :  { %5660 = vst [vmem:[#allocation10_spill] sm:$0xff] %v4803_v49  ;;  %v4810_v29 = vpop.eup %3316  ;;  %3326 = vpow2.f32 %v2354_v24  ;;  %v2352_v59 = vmul.f32 1.442695, %v2295_v58  ;;  %v2356_v55 = vmul.f32 1.442695, %v2297_v5  ;;  %v4812_v32 = vpop.f32.mrf.mxu0 }
 0x625   :  { %5661 = vst [vmem:[#allocation8_spill] sm:$0xff] %v4810_v29  ;;  %v4814_v30 = vpop.eup %3318  ;;  %3328 = vpow2.f32 %v2358_v61  ;;  %v2360_v25 = vmul.f32 1.442695, %v2299_v57  ;;  %1952 = vmax.xlane.f32.xlu1 %v1951_v13  ;;  %v2364_v63 = vmul.f32 1.442695, %v2301_v2 }
 0x626   :  { %5662 = vst [vmem:[#allocation7_spill] sm:$0xff] %v4814_v30  ;;  %v4818_v19 = vpop.eup %3320  ;;  %3330 = vpow2.f32 %v2362_v21  ;;  %v4820_v17 = vpop.f32.mrf.mxu0 }
 0x627   :  { %5663 = vst [vmem:[#allocation12_spill] sm:$0xff] %v4818_v19  ;;  %v4824_v43 = vpop.eup %3322  ;;  %3332 = vpow2.f32 %v2352_v59  ;;  %v1954_v35 = vmax.f32 %v4812_v32, %v4820_v17 }
 0x628   :  { %5664 = vst [vmem:[#allocation11_spill] sm:$0xff] %v4824_v43  ;;  %3334 = vpow2.f32 %v2356_v55  ;;  %v4828_v54 = vpop.f32.mrf.mxu0 }
 0x629   :  { %3336 = vpow2.f32 %v2360_v25  ;;  %1955 = vmax.xlane.f32.xlu0 %v1954_v35 }
 0x62a   :  { %3338 = vpow2.f32 %v2364_v63  ;;  %v4832_v24 = vpop.f32.mrf.mxu0 }
 0x62b   :  { %v1957_v61 = vmax.f32 %v4828_v54, %v4832_v24 }
 0x62c   :  { %v4836_v21 = vpop.f32.mrf.mxu0 }
 0x62d   :  { %1958 = vmax.xlane.f32.xlu1 %v1957_v61 }
 0x62e   :  { %v4838_v58 = vpop.f32.mrf.mxu0 }
 0x62f   :  { %v1960_v5 = vmax.f32 %v4836_v21, %v4838_v58 }
 0x630   :  { %v4842_v57 = vpop.eup %3324  ;;  %v4844_v2 = vpop.f32.mrf.mxu0 }
 0x631   :  { %5665 = vst [vmem:[#allocation6_spill] sm:$0xff] %v4842_v57  ;;  %v4846_v13 = vpop.eup %3326  ;;  %1961 = vmax.xlane.f32.xlu0 %v1960_v5 }
 0x632   :  { %5666 = vst [vmem:[#allocation5_spill] sm:$0xff] %v4846_v13  ;;  %v4848_v59 = vpop.eup %3328  ;;  %v4850_v55 = vpop.f32.mrf.mxu0 }
 0x633   :  { %5667 = vst [vmem:[#allocation41_spill] sm:$0xff] %v4848_v59  ;;  %v4854_v63 = vpop.eup %3330  ;;  %v1963_v35 = vmax.f32 %v4844_v2, %v4850_v55 }
 0x634   :  { %5668 = vst [vmem:[#allocation42_spill] sm:$0xff] %v4854_v63  ;;  %v4858_v61 = vpop.eup %3332  ;;  %v4860_v3 = vpop.f32.mrf.mxu0 }
 0x635   :  { %5669 = vst [vmem:[#allocation43_spill] sm:$0xff] %v4858_v61  ;;  %v4864_v5 = vpop.eup %3334  ;;  %1964 = vmax.xlane.f32.xlu1 %v1963_v35 }
 0x636   :  { %5670 = vst [vmem:[#allocation44_spill] sm:$0xff] %v4864_v5  ;;  %v4866_v16 = vpop.eup %3336  ;;  %v4868_v62 = vpop.f32.mrf.mxu0 }
 0x637   :  { %5671 = vst [vmem:[#allocation45_spill] sm:$0xff] %v4866_v16  ;;  %v4872_v1 = vpop.eup %3338  ;;  %v1966_v15 = vmax.f32 %v4860_v3, %v4868_v62 }
 0x638   :  { %5672 = vst [vmem:[#allocation46_spill] sm:$0xff] %v4872_v1  ;;  %v4876_v6 = vpop.f32.mrf.mxu0 }
 0x639   :  { %1967 = vmax.xlane.f32.xlu0 %v1966_v15 }
 0x63a   :  { %v4880_v51 = vpop.f32.mrf.mxu0 }
 0x63b   :  { %v1969_v35 = vmax.f32 %v4876_v6, %v4880_v51 }
 0x63c   :  { %v4884_v50 = vpop.f32.mrf.mxu0 }
 0x63d   :  { %1970 = vmax.xlane.f32.xlu1 %v1969_v35 }
 0x63e   :  { %v4886_v22 = vpop.f32.mrf.mxu0 }
 0x63f   :  { %v1972_v25 = vmax.f32 %v4884_v50, %v4886_v22 }
 0x640   :  { %v4890_v34 = vpop.f32.mrf.mxu0 }
 0x641   :  { %5673 = vst [vmem:[#allocation47_spill] sm:$0xff] %v4890_v34  ;;  %1973 = vmax.xlane.f32.xlu0 %v1972_v25 }
 0x642   :  { %v4892_v46 = vpop.f32.mrf.mxu0 }
 0x643   :  { %5674 = vst [vmem:[#allocation48_spill] sm:$0xff] %v4892_v46  ;;  %v1975_v15 = vmax.f32 %v4890_v34, %v4892_v46 }
 0x644   :  { %v4896_v23 = vpop.f32.mrf.mxu0 }
 0x645   :  { %5675 = vst [vmem:[#allocation49_spill] sm:$0xff] %v4896_v23  ;;  %1976 = vmax.xlane.f32.xlu1 %v1975_v15 }
 0x646   :  { %v4898_v52 = vpop.f32.mrf.mxu0 }
 0x647   :  { %5676 = vst [vmem:[#allocation50_spill] sm:$0xff] %v4898_v52  ;;  %v1978_v35 = vmax.f32 %v4896_v23, %v4898_v52 }
 0x648   :  { %v4902_v44 = vpop.f32.mrf.mxu0 }
 0x649   :  { %5677 = vst [vmem:[#allocation51_spill] sm:$0xff] %v4902_v44  ;;  %1979 = vmax.xlane.f32.xlu0 %v1978_v35 }
 0x64a   :  { %v4904_v45 = vpop.f32.mrf.mxu0 }
 0x64b   :  { %5678 = vst [vmem:[#allocation52_spill] sm:$0xff] %v4904_v45  ;;  %v1981_v25 = vmax.f32 %v4902_v44, %v4904_v45 }
 0x64c   :  { %v4908_v10 = vpop.f32.mrf.mxu0 }
 0x64d   :  { %5679 = vst [vmem:[#allocation53_spill] sm:$0xff] %v4908_v10  ;;  %1982 = vmax.xlane.f32.xlu1 %v1981_v25 }
 0x64e   :  { %v4910_v42 = vpop.f32.mrf.mxu0 }
 0x64f   :  { %5680 = vst [vmem:[#allocation54_spill] sm:$0xff] %v4910_v42  ;;  %v1984_v15 = vmax.f32 %v4908_v10, %v4910_v42 }
 0x650   :  { %v4914_v11 = vpop.f32.mrf.mxu0 }
 0x651   :  { %5681 = vst [vmem:[#allocation55_spill] sm:$0xff] %v4914_v11  ;;  %1985 = vmax.xlane.f32.xlu0 %v1984_v15 }
 0x652   :  { %v4916_v26 = vpop.f32.mrf.mxu0 }
 0x653   :  { %5682 = vst [vmem:[#allocation56_spill] sm:$0xff] %v4916_v26  ;;  %v1987_v35 = vmax.f32 %v4914_v11, %v4916_v26 }
 0x654   :  { %v4920_v9 = vpop.f32.mrf.mxu0 }
 0x655   :  { %5683 = vst [vmem:[#allocation57_spill] sm:$0xff] %v4920_v9  ;;  %1988 = vmax.xlane.f32.xlu1 %v1987_v35 }
 0x656   :  { %v4922_v28 = vpop.f32.mrf.mxu0 }
 0x658   :  { %v4924_v47 = vpop.f32.mrf.mxu0 }
 0x659   :  { %5684 = vst [vmem:[#allocation58_spill] sm:$0xff] %v4924_v47 }
 0x65a   :  { %v4928_v27 = vpop.f32.mrf.mxu0 }
 0x65c   :  { %v4932_v41 = vpop.f32.mrf.mxu0 }
 0x65e   :  { %v4934_v7 = vpop.f32.mrf.mxu0 }
 0x660   :  { %v4936_v37 = vpop.f32.mrf.mxu0 }
 0x662   :  { %v4940_v56 = vpop.f32.mrf.mxu0 }
 0x664   :  { %v4944_v25 = vpop.f32.mrf.mxu0 }
 0x666   :  { %v4946_v33 = vpop.f32.mrf.mxu0 }
 0x668   :  { %v4948_v20 = vpop.f32.mrf.mxu0 }
 0x66a   :  { %v4952_v48 = vpop.f32.mrf.mxu0 }
 0x66c   :  { %v4956_v35 = vpop.f32.mrf.mxu0 }
 0x66e   :  { %v1879_v8 = vpop.f32.mrf.mxu0 }
 0x670   :  { %v4958_v53 = vpop.f32.mrf.mxu0 }
 0x672   :  { %v1883_v29 = vpop.f32.mrf.mxu0 }
 0x674   :  { %v1887_v30 = vpop.f32.mrf.mxu0 }
 0x676   :  { %v1889_v38 = vpop.f32.mrf.mxu0 }
 0x678   :  { %v1891_v49 = vpop.f32.mrf.mxu0 }
 0x67a   :  { %v1893_v19 = vpop.f32.mrf.mxu0 }
 0x67b   :  { %v1935_v1 = vpack.c.bf16 %v1893_v19, %v1889_v38 }
 0x67c   :  { %v1897_v43 = vpop.f32.mrf.mxu0 }
 0x67e   :  { %v1899_v15 = vpop.f32.mrf.mxu0 }
 0x680   :  { %v1901_v57 = vpop.f32.mrf.mxu0 }
 0x681   :  { %v1936_v23 = vpack.c.bf16 %v1901_v57, %v1897_v43 }
 0x682   :  { %v1903_v13 = vpop.f32.mrf.mxu0 }
 0x683   :  { %v1937_v52 = vpack.c.bf16 %v1903_v13, %v1899_v15 }
 0x684   :  { %v1907_v61 = vpop.f32.mrf.mxu0 }
 0x686   :  { %v1909_v5 = vpop.f32.mrf.mxu0 }
 0x688   :  { %v1911_v40 = vpop.f32.mrf.mxu0 }
 0x689   :  { %v1938_v44 = vpack.c.bf16 %v1911_v40, %v1907_v61 }
 0x68a   :  { %v1913_v59 = vpop.f32.mrf.mxu0 }
 0x68b   :  { %v1939_v45 = vpack.c.bf16 %v1913_v59, %v1909_v5  ;;  %v5687_v5 = vpack.c.bf16 %v4948_v20, %v4944_v25 }
 0x68c   :  { %v1917_v63 = vpop.f32.mrf.mxu0 }
 0x68e   :  { %v1919_v26 = vpop.f32.mrf.mxu0 }
 0x690   :  { %v1921_v11 = vpop.f32.mrf.mxu0 }
 0x691   :  { %v1940_v42 = vpack.c.bf16 %v1921_v11, %v1917_v63 }
 0x692   :  { %v1923_v10 = vpop.f32.mrf.mxu0 }
 0x693   :  { %v1941_v36 = vpack.c.bf16 %v1923_v10, %v1919_v26  ;;  %v1933_v26 = vpack.c.bf16 %v1883_v29, %v1879_v8 }
 0x695   :  { %2382 = vmatprep.subr.bf16.mxu1 %v1941_v36 }
 0x696   :  { %2383 = vmatpush1.bf16.xpose.msra.mxu1 %v1940_v42  ;;  %v1934_v42 = vpack.c.bf16 %v1891_v49, %v1887_v30  ;;  %v5686_v30 = vpack.c.bf16 %v4952_v48, %v4946_v33 }
 0x697   :  { %2384 = vmatprep.subr.bf16.mxu1 %v1939_v45 }
 0x69e   :  { %2385 = vmatpush1.bf16.xpose.msra.mxu1 %v1938_v44 }
 0x69f   :  { %2386 = vmatprep.subr.bf16.mxu1 %v1937_v52 }
 0x6a2   :  { %v1944_v16 = vpop.xlane.xlu0 %1943 }
 0x6a3   :  { %v1990_v46 = vsub.f32 %v4754_v12, %v1944_v16  ;;  %v1991_v34 = vsub.f32 %v4760_v31, %v1944_v16 }
 0x6a5   :  { %v2022_v9 = vmul.f32 1.442695, %v1990_v46  ;;  %v2024_v47 = vmul.f32 1.442695, %v1991_v34 }
 0x6a6   :  { %v1947_v11 = vpop.xlane.xlu1 %1946  ;;  %2387 = vmatpush1.bf16.xpose.msra.mxu1 %v1936_v23 }
 0x6a7   :  { %3340 = vpow2.f32 %v2022_v9  ;;  %v1992_v10 = vsub.f32 %v4772_v18, %v1947_v11  ;;  %v1993_v45 = vsub.f32 %v4776_v14, %v1947_v11  ;;  %2388 = vmatprep.subr.bf16.mxu1 %v1935_v1 }
 0x6a8   :  { %3342 = vpow2.f32 %v2024_v47 }
 0x6a9   :  { %v2026_v44 = vmul.f32 1.442695, %v1992_v10  ;;  %v2028_v52 = vmul.f32 1.442695, %v1993_v45 }
 0x6ab   :  { %3344 = vpow2.f32 %v2026_v44  ;;  %v1950_v36 = vpop.xlane.xlu0 %1949 }
 0x6ac   :  { %3346 = vpow2.f32 %v2028_v52  ;;  %v1994_v16 = vsub.f32 %v4780_v4, %v1950_v36  ;;  %v1995_v46 = vsub.f32 %v4782_v60, %v1950_v36  ;;  %v5689_v36 = vpack.c.bf16 %v4936_v37, %v4932_v41 }
 0x6ae   :  { %v2030_v12 = vmul.f32 1.442695, %v1994_v16  ;;  %v2032_v31 = vmul.f32 1.442695, %v1995_v46  ;;  %v1953_v9 = vpop.xlane.xlu1 %1952  ;;  %2389 = vmatpush1.bf16.xpose.msra.mxu1 %v1934_v42  ;;  %v5690_v46 = vpack.c.bf16 %v4928_v27, %v4922_v28 }
 0x6af   :  { %v1996_v34 = vsub.f32 %v4790_v39, %v1953_v9  ;;  %v1997_v1 = vsub.f32 %v4801_v0, %v1953_v9  ;;  %2390 = vmatprep.subr.bf16.mxu1 %v1933_v26  ;;  %v5685_v0 = vpack.c.bf16 %v4958_v53, %v4956_v35  ;;  %v5688_v35 = vpack.c.bf16 %v4940_v56, %v4934_v7 }
 0x6b0   :  { %3348 = vpow2.f32 %v2030_v12 }
 0x6b1   :  { %3350 = vpow2.f32 %v2032_v31  ;;  %v2034_v47 = vmul.f32 1.442695, %v1996_v34  ;;  %v2036_v40 = vmul.f32 1.442695, %v1997_v1 }
 0x6b2   :  { %v1956_v18 = vpop.xlane.xlu0 %1955 }
 0x6b3   :  { %3352 = vpow2.f32 %v2034_v47  ;;  %v1998_v14 = vsub.f32 %v4812_v32, %v1956_v18  ;;  %v1999_v4 = vsub.f32 %v4820_v17, %v1956_v18  ;;  %v5691_v18 = vld [vmem:[#allocation58_spill] sm:$0xff] }
 0x6b4   :  { %v4972_v60 = vpop.eup %3340  ;;  %3354 = vpow2.f32 %v2036_v40 }
 0x6b5   :  { %v4974_v8 = vpop.eup %3342  ;;  %v2038_v38 = vmul.f32 1.442695, %v1998_v14  ;;  %v2040_v39 = vmul.f32 1.442695, %v1999_v4  ;;  %v5692_v14 = vld [vmem:[#allocation57_spill] sm:$0xff] }
 0x6b6   :  { %v1959_v49 = vpop.xlane.xlu1 %1958  ;;  %2391 = vmatpush1.bf16.xpose.msra.mxu1 %v5685_v0  ;;  %v2086_v23 = vadd.f32 %v4974_v8, %v4972_v60  ;;  %v5693_v4 = vpack.c.bf16 %v5691_v18, %v5692_v14  ;;  %v5696_v0 = vld [vmem:[#allocation46_spill] sm:$0xff] }
 0x6b7   :  { %3356 = vpow2.f32 %v2038_v38  ;;  %v2000_v29 = vsub.f32 %v4828_v54, %v1959_v49  ;;  %v2001_v32 = vsub.f32 %v4832_v24, %v1959_v49  ;;  %2392 = vmatprep.subr.bf16.mxu1 %v5686_v30 }
 0x6b8   :  { %v4986_v19 = vpop.eup %3344  ;;  %3358 = vpow2.f32 %v2040_v39  ;;  %2087 = vadd.xlane.f32.xlu0 %v2086_v23  ;;  %v5697_v23 = vld [vmem:[#allocation45_spill] sm:$0xff] }
 0x6b9   :  { %v4988_v17 = vpop.eup %3346  ;;  %v2042_v53 = vmul.f32 1.442695, %v2000_v29  ;;  %v2044_v43 = vmul.f32 1.442695, %v2001_v32  ;;  %v5698_v29 = vpack.c.bf16 %v5696_v0, %v5697_v23 }
 0x6ba   :  { %v1962_v57 = vpop.xlane.xlu0 %1961  ;;  %v2089_v13 = vadd.f32 %v4988_v17, %v4986_v19 }
 0x6bb   :  { %3360 = vpow2.f32 %v2042_v53  ;;  %v2002_v54 = vsub.f32 %v4836_v21, %v1962_v57  ;;  %v2003_v24 = vsub.f32 %v4838_v58, %v1962_v57 }
 0x6bc   :  { %3362 = vpow2.f32 %v2044_v43  ;;  %2090 = vadd.xlane.f32.xlu1 %v2089_v13 }
 0x6bd   :  { %v4994_v33 = vpop.eup %3348  ;;  %v2046_v48 = vmul.f32 1.442695, %v2002_v54  ;;  %v2048_v59 = vmul.f32 1.442695, %v2003_v24  ;;  %v5699_v54 = vld [vmem:[#allocation49_spill] sm:$0xff] }
 0x6be   :  { %v4996_v63 = vpop.eup %3350  ;;  %v1965_v61 = vpop.xlane.xlu1 %1964  ;;  %2393 = vmatpush1.bf16.xpose.msra.mxu1 %v5687_v5 }
 0x6bf   :  { %3364 = vpow2.f32 %v2046_v48  ;;  %v2004_v15 = vsub.f32 %v4844_v2, %v1965_v61  ;;  %v2005_v21 = vsub.f32 %v4850_v55, %v1965_v61  ;;  %v2092_v58 = vadd.f32 %v4996_v63, %v4994_v33  ;;  %2394 = vmatprep.subr.bf16.mxu1 %v5688_v35  ;;  %v5700_v48 = vld [vmem:[#allocation50_spill] sm:$0xff] }
 0x6c0   :  { %v5008_v11 = vpop.eup %3352  ;;  %3366 = vpow2.f32 %v2048_v59 }
 0x6c1   :  { %v5010_v10 = vpop.eup %3354  ;;  %v2050_v45 = vmul.f32 1.442695, %v2004_v15  ;;  %v2052_v20 = vmul.f32 1.442695, %v2005_v21  ;;  %2093 = vadd.xlane.f32.xlu0 %v2092_v58 }
 0x6c2   :  { %v1968_v25 = vpop.xlane.xlu0 %1967  ;;  %v2095_v2 = vadd.f32 %v5010_v10, %v5008_v11 }
 0x6c3   :  { %3368 = vpow2.f32 %v2050_v45  ;;  %v2006_v55 = vsub.f32 %v4860_v3, %v1968_v25  ;;  %v2007_v44 = vsub.f32 %v4868_v62, %v1968_v25  ;;  %v5701_v45 = vld [vmem:[#allocation51_spill] sm:$0xff]  ;;  %v5702_v25 = vld [vmem:[#allocation52_spill] sm:$0xff] }
 0x6c4   :  { %v5016_v52 = vpop.eup %3356  ;;  %3370 = vpow2.f32 %v2052_v20  ;;  %2096 = vadd.xlane.f32.xlu1 %v2095_v2 }
 0x6c5   :  { %v5018_v7 = vpop.eup %3358  ;;  %v2054_v56 = vmul.f32 1.442695, %v2006_v55  ;;  %v2056_v42 = vmul.f32 1.442695, %v2007_v44 }
 0x6c6   :  { %v1971_v26 = vpop.xlane.xlu1 %1970  ;;  %2395 = vmatpush1.bf16.xpose.msra.mxu1 %v5689_v36  ;;  %v2098_v16 = vadd.f32 %v5018_v7, %v5016_v52 }
 0x6c7   :  { %3372 = vpow2.f32 %v2054_v56  ;;  %v2008_v3 = vsub.f32 %v4876_v6, %v1971_v26  ;;  %v2009_v62 = vsub.f32 %v4880_v51, %v1971_v26  ;;  %2396 = vmatprep.subr.bf16.mxu1 %v5690_v46 }
 0x6c8   :  { %v5030_v12 = vpop.eup %3360  ;;  %3374 = vpow2.f32 %v2056_v42  ;;  %2099 = vadd.xlane.f32.xlu0 %v2098_v16  ;;  %v5703_v16 = vld [vmem:[#allocation53_spill] sm:$0xff] }
 0x6c9   :  { %v5032_v31 = vpop.eup %3362  ;;  %v2058_v41 = vmul.f32 1.442695, %v2008_v3  ;;  %v2060_v37 = vmul.f32 1.442695, %v2009_v62  ;;  %v5704_v62 = vld [vmem:[#allocation54_spill] sm:$0xff] }
 0x6ca   :  { %v1974_v9 = vpop.xlane.xlu0 %1973  ;;  %v2101_v34 = vadd.f32 %v5032_v31, %v5030_v12 }
 0x6cb   :  { %3376 = vpow2.f32 %v2058_v41  ;;  %v2010_v6 = vsub.f32 %v4884_v50, %v1974_v9  ;;  %v2011_v51 = vsub.f32 %v4886_v22, %v1974_v9  ;;  %v5694_v50 = vld [vmem:[#allocation47_spill] sm:$0xff]  ;;  %v5695_v22 = vld [vmem:[#allocation48_spill] sm:$0xff] }
 0x6cc   :  { %v5038_v1 = vpop.eup %3364  ;;  %3378 = vpow2.f32 %v2060_v37  ;;  %2102 = vadd.xlane.f32.xlu1 %v2101_v34 }
 0x6cd   :  { %v5040_v28 = vpop.eup %3366  ;;  %v2062_v27 = vmul.f32 1.442695, %v2010_v6  ;;  %v2064_v47 = vmul.f32 1.442695, %v2011_v51 }
 0x6ce   :  { %v1977_v40 = vpop.xlane.xlu1 %1976  ;;  %2397 = vmatpush1.bf16.xpose.msra.mxu1 %v5693_v4  ;;  %v2104_v38 = vadd.f32 %v5040_v28, %v5038_v1 }
 0x6cf   :  { %3380 = vpow2.f32 %v2062_v27  ;;  %v2012_v39 = vsub.f32 %v5694_v50, %v1977_v40  ;;  %v2013_v49 = vsub.f32 %v5695_v22, %v1977_v40  ;;  %2519 = vmatprep.subr.bf16.mxu1 %v5698_v29  ;;  %v5705_v27 = vld [vmem:[#allocation55_spill] sm:$0xff]  ;;  %v5706_v40 = vld [vmem:[#allocation56_spill] sm:$0xff] }
 0x6d0   :  { %v5052_v32 = vpop.eup %3368  ;;  %3382 = vpow2.f32 %v2064_v47  ;;  %2105 = vadd.xlane.f32.xlu0 %v2104_v38 }
 0x6d1   :  { %v5054_v30 = vpop.eup %3370  ;;  %v2066_v53 = vmul.f32 1.442695, %v2012_v39  ;;  %v2068_v43 = vmul.f32 1.442695, %v2013_v49 }
 0x6d2   :  { %v1980_v57 = vpop.xlane.xlu0 %1979  ;;  %v2107_v13 = vadd.f32 %v5054_v30, %v5052_v32 }
 0x6d3   :  { %3384 = vpow2.f32 %v2066_v53  ;;  %v2014_v24 = vsub.f32 %v5699_v54, %v1980_v57  ;;  %v2015_v59 = vsub.f32 %v5700_v48, %v1980_v57 }
 0x6d4   :  { %v5060_v61 = vpop.eup %3372  ;;  %3386 = vpow2.f32 %v2068_v43  ;;  %2108 = vadd.xlane.f32.xlu1 %v2107_v13 }
 0x6d5   :  { %v5062_v5 = vpop.eup %3374  ;;  %v2070_v15 = vmul.f32 1.442695, %v2014_v24  ;;  %v2072_v21 = vmul.f32 1.442695, %v2015_v59  ;;  %v80_v59 = vld [vmem:[%s5443_s3] sm:$0xf] }
 0x6d6   :  { %v1983_v58 = vpop.xlane.xlu1 %1982  ;;  %v2110_v35 = vadd.f32 %v5062_v5, %v5060_v61 }
 0x6d7   :  { %3388 = vpow2.f32 %v2070_v15  ;;  %v2016_v20 = vsub.f32 %v5701_v45, %v1983_v58  ;;  %v2017_v2 = vsub.f32 %v5702_v25, %v1983_v58 }
 0x6d8   :  { %v5068_v55 = vpop.eup %3376  ;;  %3390 = vpow2.f32 %v2072_v21  ;;  %2111 = vadd.xlane.f32.xlu0 %v2110_v35 }
 0x6d9   :  { %v5070_v44 = vpop.eup %3378  ;;  %v2074_v56 = vmul.f32 1.442695, %v2016_v20  ;;  %v2076_v42 = vmul.f32 1.442695, %v2017_v2 }
 0x6da   :  { %v1986_v26 = vpop.xlane.xlu0 %1985  ;;  %v2113_v36 = vadd.f32 %v5070_v44, %v5068_v55 }
 0x6db   :  { %3392 = vpow2.f32 %v2074_v56  ;;  %v2018_v3 = vsub.f32 %v5703_v16, %v1986_v26  ;;  %v2019_v46 = vsub.f32 %v5704_v62, %v1986_v26 }
 0x6dc   :  { %v5076_v41 = vpop.eup %3380  ;;  %3394 = vpow2.f32 %v2076_v42  ;;  %2114 = vadd.xlane.f32.xlu1 %v2113_v36 }
 0x6dd   :  { %v5078_v37 = vpop.eup %3382  ;;  %v2078_v9 = vmul.f32 1.442695, %v2018_v3  ;;  %v2080_v34 = vmul.f32 1.442695, %v2019_v46 }
 0x6de   :  { %v1989_v6 = vpop.xlane.xlu1 %1988  ;;  %v2116_v51 = vadd.f32 %v5078_v37, %v5076_v41 }
 0x6df   :  { %3396 = vpow2.f32 %v2078_v9  ;;  %v2020_v47 = vsub.f32 %v5705_v27, %v1989_v6  ;;  %v2021_v18 = vsub.f32 %v5706_v40, %v1989_v6  ;;  %v5707_v9 = vld [vmem:[#allocation42_spill] sm:$0xff]  ;;  %v5711_v27 = vld [vmem:[#allocation43_spill] sm:$0xff] }
 0x6e0   :  { %v5084_v14 = vpop.eup %3384  ;;  %3398 = vpow2.f32 %v2080_v34  ;;  %2117 = vadd.xlane.f32.xlu0 %v2116_v51  ;;  %v5708_v34 = vld [vmem:[#allocation41_spill] sm:$0xff] }
 0x6e1   :  { %v5086_v4 = vpop.eup %3386  ;;  %v2082_v38 = vmul.f32 1.442695, %v2020_v47  ;;  %v2084_v50 = vmul.f32 1.442695, %v2021_v18  ;;  %v5709_v6 = vpack.c.bf16 %v5707_v9, %v5708_v34  ;;  %v5729_v9 = vld [vmem:[#allocation20_spill] sm:$0xff] }
 0x6e2   :  { %v2119_v39 = vadd.f32 %v5086_v4, %v5084_v14 }
 0x6e3   :  { %3400 = vpow2.f32 %v2082_v38  ;;  %v5713_v38 = vld [vmem:[#allocation5_spill] sm:$0xff] }
 0x6e4   :  { %v5090_v22 = vpop.eup %3388  ;;  %3402 = vpow2.f32 %v2084_v50  ;;  %2120 = vadd.xlane.f32.xlu1 %v2119_v39  ;;  %v5714_v50 = vld [vmem:[#allocation6_spill] sm:$0xff] }
 0x6e5   :  { %v5092_v49 = vpop.eup %3390  ;;  %v5715_v39 = vpack.c.bf16 %v5713_v38, %v5714_v50  ;;  %v5737_v38 = vld [vmem:[#allocation21_spill] sm:$0xff]  ;;  %v5738_v50 = vld [vmem:[#allocation22_spill] sm:$0xff] }
 0x6e6   :  { %v2122_v0 = vadd.f32 %v5092_v49, %v5090_v22 }
 0x6e8   :  { %v5096_v23 = vpop.eup %3392  ;;  %2123 = vadd.xlane.f32.xlu0 %v2122_v0 }
 0x6e9   :  { %v5098_v29 = vpop.eup %3394 }
 0x6ea   :  { %v2125_v53 = vadd.f32 %v5098_v29, %v5096_v23 }
 0x6ec   :  { %v5102_v43 = vpop.eup %3396  ;;  %2126 = vadd.xlane.f32.xlu1 %v2125_v53 }
 0x6ed   :  { %v5104_v57 = vpop.eup %3398 }
 0x6ee   :  { %v2128_v13 = vadd.f32 %v5104_v57, %v5102_v43 }
 0x6f0   :  { %v5108_v54 = vpop.eup %3400  ;;  %2129 = vadd.xlane.f32.xlu0 %v2128_v13  ;;  %v5716_v13 = vld [vmem:[#allocation11_spill] sm:$0xff] }
 0x6f1   :  { %v5110_v24 = vpop.eup %3402 }
 0x6f2   :  { %v2131_v48 = vadd.f32 %v5110_v24, %v5108_v54 }
 0x6f4   :  { %2132 = vadd.xlane.f32.xlu1 %v2131_v48  ;;  %v5717_v48 = vld [vmem:[#allocation12_spill] sm:$0xff] }
 0x705   :  { %1530 = vperm.xlu1 %3018, %v80_v59   ;;  %v5718_v59 = vpack.c.bf16 %v5716_v13, %v5717_v48  ;;  %v5740_v13 = vld [vmem:[#allocation27_spill] sm:$0xff]  ;;  %v5741_v48 = vld [vmem:[#allocation28_spill] sm:$0xff] }
 0x741   :  { %v2088_v15 = vpop.xlane.xlu0 %2087 }
 0x742   :  { %3404 = vrcp.f32 %v2088_v15 }
 0x745   :  { %v2091_v21 = vpop.xlane.xlu1 %2090 }
 0x746   :  { %3406 = vrcp.f32 %v2091_v21 }
 0x74a   :  { %v2094_v58 = vpop.xlane.xlu0 %2093 }
 0x74b   :  { %3408 = vrcp.f32 %v2094_v58  ;;  %v5722_v58 = vld [vmem:[#allocation7_spill] sm:$0xff] }
 0x74d   :  { %v2097_v35 = vpop.xlane.xlu1 %2096 }
 0x74e   :  { %3410 = vrcp.f32 %v2097_v35  ;;  %v5723_v35 = vld [vmem:[#allocation8_spill] sm:$0xff] }
 0x74f   :  { %v3405_v45 = vpop.eup %3404 }
 0x750   :  { %v2151_v2 = vmul.f32 %v3405_v45, %v4974_v8  ;;  %v2150_v42 = vmul.f32 %v3405_v45, %v4972_v60  ;;  %v5710_v8 = vld [vmem:[#allocation44_spill] sm:$0xff]  ;;  %v5724_v45 = vpack.c.bf16 %v5722_v58, %v5723_v35 }
 0x751   :  { %v2100_v20 = vpop.xlane.xlu0 %2099 }
 0x752   :  { %3412 = vrcp.f32 %v2100_v20 }
 0x753   :  { %v3407_v25 = vpop.eup %3406 }
 0x754   :  { %v2153_v56 = vmul.f32 %v3407_v25, %v4988_v17  ;;  %v2152_v26 = vmul.f32 %v3407_v25, %v4986_v19  ;;  %v5712_v17 = vpack.c.bf16 %v5710_v8, %v5711_v27  ;;  %v5734_v8 = vld [vmem:[#allocation15_spill] sm:$0xff]  ;;  %v5735_v27 = vld [vmem:[#allocation16_spill] sm:$0xff] }
 0x755   :  { %v2103_v36 = vpop.xlane.xlu1 %2102 }
 0x756   :  { %3414 = vrcp.f32 %v2103_v36  ;;  %v2183_v16 = vpack.c.bf16 %v2153_v56, %v2151_v2  ;;  %v2182_v3 = vpack.c.bf16 %v2152_v26, %v2150_v42  ;;  %v5725_v26 = vld [vmem:[#allocation13_spill] sm:$0xff]  ;;  %v5726_v36 = vld [vmem:[#allocation14_spill] sm:$0xff] }
 0x758   :  { %v3409_v62 = vpop.eup %3408  ;;  %2414 = vmatprep.mubr.bf16.mxu1 %v2183_v16  ;;  %v5727_v16 = vpack.c.bf16 %v5725_v26, %v5726_v36 }
 0x759   :  { %v2106_v46 = vpop.xlane.xlu0 %2105  ;;  %2415 = vmatmul.mubr.bf16.vlgmr.msra.gmra.mxu1 %v2182_v3  ;;  %v2155_v60 = vmul.f32 %v3409_v62, %v4996_v63  ;;  %v2154_v47 = vmul.f32 %v3409_v62, %v4994_v33  ;;  %v5720_v33 = vld [vmem:[#allocation9_spill] sm:$0xff] }
 0x75a   :  { %2520 = vmatpush1.bf16.msra.mxu1 %v5709_v6  ;;  %3416 = vrcp.f32 %v2106_v46  ;;  %v5728_v46 = vld [vmem:[#allocation19_spill] sm:$0xff] }
 0x75b   :  { %v3411_v51 = vpop.eup %3410  ;;  %2521 = vmatprep.subr.bf16.mxu1 %v5712_v17  ;;  %v5730_v34 = vpack.c.bf16 %v5728_v46, %v5729_v9  ;;  %v5736_v17 = vpack.c.bf16 %v5734_v8, %v5735_v27 }
 0x75c   :  { %v2157_v19 = vmul.f32 %v3411_v51, %v5010_v10  ;;  %v2156_v40 = vmul.f32 %v3411_v51, %v5008_v11  ;;  %v5719_v10 = vld [vmem:[#allocation10_spill] sm:$0xff] }
 0x75d   :  { %v2109_v18 = vpop.xlane.xlu1 %2108  ;;  %v5721_v21 = vpack.c.bf16 %v5719_v10, %v5720_v33  ;;  %v5746_v10 = vld [vmem:[#allocation23_spill] sm:$0xff]  ;;  %v5747_v33 = vld [vmem:[#allocation24_spill] sm:$0xff] }
 0x75e   :  { %3418 = vrcp.f32 %v2109_v18  ;;  %2522 = vmatpush1.bf16.msra.mxu1 %v5715_v39  ;;  %v2185_v0 = vpack.c.bf16 %v2157_v19, %v2155_v60  ;;  %v2184_v53 = vpack.c.bf16 %v2156_v40, %v2154_v47  ;;  %v5739_v39 = vpack.c.bf16 %v5737_v38, %v5738_v50 }
 0x75f   :  { %2523 = vmatprep.subr.bf16.mxu1 %v5718_v59  ;;  %v3413_v63 = vpop.eup %3412  ;;  %v5742_v59 = vpack.c.bf16 %v5740_v13, %v5741_v48 }
 0x760   :  { %2422 = vmatprep.mubr.bf16.mxu1 %v2185_v0  ;;  %v2159_v20 = vmul.f32 %v3413_v63, %v5018_v7  ;;  %v2158_v2 = vmul.f32 %v3413_v63, %v5016_v52  ;;  %v5732_v52 = vld [vmem:[#allocation17_spill] sm:$0xff] }
 0x761   :  { %v2112_v15 = vpop.xlane.xlu0 %2111  ;;  %2423 = vmatmul.mubr.bf16.gmra.mxu1 %v2184_v53 }
 0x762   :  { %2524 = vmatpush1.bf16.msra.mxu1 %v5721_v21  ;;  %3420 = vrcp.f32 %v2112_v15  ;;  %v5748_v21 = vpack.c.bf16 %v5746_v10, %v5747_v33 }
 0x763   :  { %v3415_v11 = vpop.eup %3414  ;;  %2525 = vmatprep.subr.bf16.mxu1 %v5724_v45 }
 0x764   :  { %v2161_v25 = vmul.f32 %v3415_v11, %v5032_v31  ;;  %v2160_v56 = vmul.f32 %v3415_v11, %v5030_v12  ;;  %v5731_v31 = vld [vmem:[#allocation18_spill] sm:$0xff] }
 0x765   :  { %v2115_v42 = vpop.xlane.xlu1 %2114  ;;  %v5733_v51 = vpack.c.bf16 %v5731_v31, %v5732_v52 }
 0x766   :  { %3422 = vrcp.f32 %v2115_v42  ;;  %2526 = vmatpush1.bf16.msra.mxu1 %v5727_v16  ;;  %v2187_v3 = vpack.c.bf16 %v2161_v25, %v2159_v20  ;;  %v2186_v62 = vpack.c.bf16 %v2160_v56, %v2158_v2  ;;  %v5749_v25 = vld [vmem:[#allocation29_spill] sm:$0xff]  ;;  %v5750_v2 = vld [vmem:[#allocation30_spill] sm:$0xff] }
 0x767   :  { %2527 = vmatprep.subr.bf16.mxu1 %v5730_v34  ;;  %v3417_v7 = vpop.eup %3416  ;;  %v5751_v56 = vpack.c.bf16 %v5749_v25, %v5750_v2 }
 0x768   :  { %2430 = vmatprep.mubr.bf16.mxu1 %v2187_v3  ;;  %v2163_v60 = vmul.f32 %v3417_v7, %v5040_v28  ;;  %v2162_v47 = vmul.f32 %v3417_v7, %v5038_v1  ;;  %v5744_v1 = vld [vmem:[#allocation25_spill] sm:$0xff] }
 0x769   :  { %v2118_v6 = vpop.xlane.xlu0 %2117  ;;  %2431 = vmatmul.mubr.bf16.gmra.mxu1 %v2186_v62 }
 0x76a   :  { %2528 = vmatpush1.bf16.msra.mxu1 %v5733_v51  ;;  %3424 = vrcp.f32 %v2118_v6  ;;  %v5752_v6 = vld [vmem:[#allocation34_spill] sm:$0xff] }
 0x76b   :  { %v3419_v12 = vpop.eup %3418  ;;  %2529 = vmatprep.subr.bf16.mxu1 %v5736_v17 }
 0x76c   :  { %v2165_v19 = vmul.f32 %v3419_v12, %v5054_v30  ;;  %v2164_v40 = vmul.f32 %v3419_v12, %v5052_v32  ;;  %v5743_v30 = vld [vmem:[#allocation26_spill] sm:$0xff] }
 0x76d   :  { %v2121_v18 = vpop.xlane.xlu1 %2120  ;;  %v5745_v15 = vpack.c.bf16 %v5743_v30, %v5744_v1  ;;  %v3529_v30 = vld [vmem:[%s5446_s6 + $0x8] sm:$0xff] }
 0x76e   :  { %3426 = vrcp.f32 %v2121_v18  ;;  %2530 = vmatpush1.bf16.msra.mxu1 %v5739_v39  ;;  %v2189_v0 = vpack.c.bf16 %v2165_v19, %v2163_v60  ;;  %v2188_v53 = vpack.c.bf16 %v2164_v40, %v2162_v47 }
 0x76f   :  { %2531 = vmatprep.subr.bf16.mxu1 %v5742_v59  ;;  %v3421_v28 = vpop.eup %3420 }
 0x770   :  { %2438 = vmatprep.mubr.bf16.mxu1 %v2189_v0  ;;  %v2167_v11 = vmul.f32 %v3421_v28, %v5062_v5  ;;  %v2166_v35 = vmul.f32 %v3421_v28, %v5060_v61 }
 0x771   :  { %v2124_v63 = vpop.xlane.xlu0 %2123  ;;  %2439 = vmatmul.mubr.bf16.gmra.mxu1 %v2188_v53 }
 0x772   :  { %2532 = vmatpush1.bf16.msra.mxu1 %v5745_v15  ;;  %3428 = vrcp.f32 %v2124_v63 }
 0x773   :  { %v3423_v32 = vpop.eup %3422  ;;  %2533 = vmatprep.subr.bf16.mxu1 %v5748_v21 }
 0x774   :  { %v2169_v58 = vmul.f32 %v3423_v32, %v5070_v44  ;;  %v2168_v45 = vmul.f32 %v3423_v32, %v5068_v55 }
 0x775   :  { %v2127_v20 = vpop.xlane.xlu1 %2126 }
 0x776   :  { %3430 = vrcp.f32 %v2127_v20  ;;  %2534 = vmatpush1.bf16.msra.mxu1 %v5751_v56  ;;  %v2191_v42 = vpack.c.bf16 %v2169_v58, %v2167_v11  ;;  %v2190_v26 = vpack.c.bf16 %v2168_v45, %v2166_v35  ;;  %v3530_v11 = vld [vmem:[%s5446_s6 + $0x10] sm:$0xff]  ;;  %v3531_v35 = vld [vmem:[%s5446_s6 + $0x18] sm:$0xff] }
 0x777   :  { %v3425_v36 = vpop.eup %3424 }
 0x778   :  { %2446 = vmatprep.mubr.bf16.mxu1 %v2191_v42  ;;  %v2171_v5 = vmul.f32 %v3425_v36, %v5078_v37  ;;  %v2170_v55 = vmul.f32 %v3425_v36, %v5076_v41 }
 0x779   :  { %v2130_v16 = vpop.xlane.xlu0 %2129  ;;  %2447 = vmatmul.mubr.bf16.gmra.mxu1 %v2190_v26  ;;  %v3532_v26 = vld [vmem:[%s5446_s6 + $0x20] sm:$0xff] }
 0x77a   :  { %3432 = vrcp.f32 %v2130_v16  ;;  %v3533_v16 = vld [vmem:[%s5446_s6 + $0x28] sm:$0xff] }
 0x77b   :  { %v3427_v3 = vpop.eup %3426 }
 0x77c   :  { %v2173_v61 = vmul.f32 %v3427_v3, %v5086_v4  ;;  %v2172_v44 = vmul.f32 %v3427_v3, %v5084_v14  ;;  %v5753_v4 = vld [vmem:[#allocation33_spill] sm:$0xff] }
 0x77d   :  { %v2133_v62 = vpop.xlane.xlu1 %2132 }
 0x77e   :  { %3434 = vrcp.f32 %v2133_v62  ;;  %v2193_v46 = vpack.c.bf16 %v2173_v61, %v2171_v5  ;;  %v2192_v9 = vpack.c.bf16 %v2172_v44, %v2170_v55 }
 0x77f   :  { %v3429_v34 = vpop.eup %3428 }
 0x780   :  { %2454 = vmatprep.mubr.bf16.mxu1 %v2193_v46  ;;  %v2175_v14 = vmul.f32 %v3429_v34, %v5092_v49  ;;  %v2174_v52 = vmul.f32 %v3429_v34, %v5090_v22  ;;  %v3534_v46 = vld [vmem:[%s5446_s6 + $0x30] sm:$0xff]  ;;  %v3535_v34 = vld [vmem:[%s5446_s6 + $0x38] sm:$0xff] }
 0x781   :  { %v5186_v7 = vpop.permute.xlu1 %1530  ;;  %2455 = vmatmul.mubr.bf16.gmra.mxu1 %v2192_v9 }
 0x782   :  { %v5190_v37 = vadd.f32 %v5752_v6, %v5186_v7  ;;  %v5194_v31 = vadd.f32 %v5753_v4, %v5186_v7 }
 0x783   :  { %v3431_v41 = vpop.eup %3430 }
 0x784   :  { %v1575_v51 = vsel %vm1574_vm2, %v5190_v37, 0.0  ;;  %v1576_v12 = vsel %vm1574_vm2, %v5194_v31, 0.0  ;;  %v2177_v8 = vmul.f32 %v3431_v41, %v5098_v29  ;;  %v2176_v27 = vmul.f32 %v3431_v41, %v5096_v23 }
 0x785   :  { %v1577_v17 = vadd.f32 %v1576_v12, %v1575_v51  ;;  %v5754_v23 = vmov 0   ;;  %v3536_v12 = vld [vmem:[%s5446_s6 + $0x40] sm:$0xff] }
 0x786   :  { %v2195_v60 = vpack.c.bf16 %v2177_v8, %v2175_v14  ;;  %v2194_v19 = vpack.c.bf16 %v2176_v27, %v2174_v52  ;;  %v3537_v27 = vld [vmem:[%s5446_s6 + $0x48] sm:$0xff] }
 0x787   :  { %1578 = vadd.xlane.f32.xlu1 %v1577_v17  ;;  %v3433_v47 = vpop.eup %3432 }
 0x788   :  { %2462 = vmatprep.mubr.bf16.mxu1 %v2195_v60  ;;  %v2179_v22 = vmul.f32 %v3433_v47, %v5104_v57  ;;  %v2178_v18 = vmul.f32 %v3433_v47, %v5102_v43  ;;  %v3528_v43 = vld [vmem:[%s5446_s6] sm:$0xff] }
 0x789   :  { %2463 = vmatmul.mubr.bf16.gmra.mxu1 %v2194_v19 }
 0x78b   :  { %v3435_v49 = vpop.eup %3434 }
 0x78c   :  { %v2181_v40 = vmul.f32 %v3435_v49, %v5110_v24  ;;  %v2180_v38 = vmul.f32 %v3435_v49, %v5108_v54 }
 0x78e   :  { %v2197_v50 = vpack.c.bf16 %v2181_v40, %v2179_v22  ;;  %v2196_v29 = vpack.c.bf16 %v2180_v38, %v2178_v18  ;;  %v3538_v40 = vld [vmem:[%s5446_s6 + $0x50] sm:$0xff]  ;;  %v3539_v38 = vld [vmem:[%s5446_s6 + $0x58] sm:$0xff] }
 0x790   :  { %2470 = vmatprep.mubr.bf16.mxu1 %v2197_v50 }
 0x791   :  { %2471 = vmatmul.mubr.bf16.gmra.mxu1 %v2196_v29 }
 0x792   :  { %2551 = vmatprep.mubr.bf16.mxu1 %v5754_v23 }
 0x810   :  { %v1579_v39 = vpop.xlane.xlu1 %1578 }
 0x811   :  { %v1580_v0 = vrot.slane %v1579_v39, 4 }
 0x813   :  { %v1581_v53 = vadd.f32 %v1580_v0, %v1579_v39 }
 0x815   :  { %v1582_v13 = vrot.slane %v1581_v53, 2 }
 0x817   :  { %v1583_v48 = vadd.f32 %v1582_v13, %v1581_v53 }
 0x819   :  { %v2416_v59 = vpop.f32.mrf.mxu1  ;;  %v1584_v28 = vrot.slane %v1583_v48, 1 }
 0x81a   :  { %v2479_v54 = vmul.f32 %v3528_v43, %v2416_v59 }
 0x81b   :  { %v2418_v57 = vpop.f32.mrf.mxu1  ;;  %v1585_v63 = vadd.f32 %v1584_v28, %v1583_v48  ;;  %v3540_v48 = vld [vmem:[%s5446_s6 + $0x60] sm:$0xff]  ;;  %v3541_v28 = vld [vmem:[%s5446_s6 + $0x68] sm:$0xff] }
 0x81d   :  { %3002 = vpush %v1585_v63  ;;  %v2419_v24 = vpop.f32.mrf.mxu1 }
 0x81e   :  { %v2480_v1 = vmul.f32 %v3529_v30, %v2419_v24 }
 0x81f   :  { %v2421_v15 = vpop.f32.mrf.mxu1 }
 0x820   :  { %v2495_v32 = vpack.c.bf16 %v2480_v1, %v2479_v54 }
 0x821   :  { %v2424_v10 = vpop.f32.mrf.mxu1 }
 0x822   :  { %2503 = vxpose.xlu0.c.b16.start [1/8] %v2495_v32, 128  ;;  %v2481_v58 = vmul.f32 %v3530_v11, %v2424_v10 }
 0x823   :  { %v2426_v33 = vpop.f32.mrf.mxu1 }
 0x825   :  { %v2427_v21 = vpop.f32.mrf.mxu1 }
 0x826   :  { %v2482_v45 = vmul.f32 %v3531_v35, %v2427_v21  ;;  %v3542_v21 = vld [vmem:[%s5446_s6 + $0x70] sm:$0xff] }
 0x827   :  { %v2429_v20 = vpop.f32.mrf.mxu1 }
 0x828   :  { %v2496_v25 = vpack.c.bf16 %v2482_v45, %v2481_v58 }
 0x829   :  { %v2432_v2 = vpop.f32.mrf.mxu1 }
 0x82a   :  { %2504 = vxpose.xlu0.c.b16.cont [2/8] %v2496_v25, 128  ;;  %v2483_v36 = vmul.f32 %v3532_v26, %v2432_v2 }
 0x82b   :  { %v2434_v56 = vpop.f32.mrf.mxu1 }
 0x82d   :  { %v2435_v42 = vpop.f32.mrf.mxu1 }
 0x82e   :  { %v2484_v3 = vmul.f32 %v3533_v16, %v2435_v42 }
 0x82f   :  { %v2437_v5 = vpop.f32.mrf.mxu1 }
 0x830   :  { %v2497_v61 = vpack.c.bf16 %v2484_v3, %v2483_v36 }
 0x831   :  { %v2440_v55 = vpop.f32.mrf.mxu1 }
 0x832   :  { %2505 = vxpose.xlu0.c.b16.cont [3/8] %v2497_v61, 128  ;;  %v2485_v9 = vmul.f32 %v3534_v46, %v2440_v55  ;;  %v5755_v61 = vld [vmem:[#allocation35_spill] sm:$0xff] }
 0x833   :  { %v2442_v44 = vpop.f32.mrf.mxu1 }
 0x835   :  { %v2443_v62 = vpop.f32.mrf.mxu1 }
 0x836   :  { %v2486_v6 = vmul.f32 %v3535_v34, %v2443_v62 }
 0x837   :  { %v2445_v4 = vpop.f32.mrf.mxu1 }
 0x838   :  { %v2498_v41 = vpack.c.bf16 %v2486_v6, %v2485_v9  ;;  %v5756_v9 = vld [vmem:[#allocation36_spill] sm:$0xff] }
 0x839   :  { %v2448_v14 = vpop.f32.mrf.mxu1 }
 0x83a   :  { %2506 = vxpose.xlu0.c.b16.cont [4/8] %v2498_v41, 128  ;;  %v2487_v8 = vmul.f32 %v3536_v12, %v2448_v14  ;;  %v5757_v41 = vld [vmem:[#allocation37_spill] sm:$0xff]  ;;  %v5758_v14 = vld [vmem:[#allocation38_spill] sm:$0xff]  ;;  %v5761_v12 = vld [vmem:[#allocation32_spill] sm:$0xff] }
 0x83b   :  { %v2450_v52 = vpop.f32.mrf.mxu1 }
 0x83c   :  { %v5759_v52 = vld [vmem:[#allocation39_spill] sm:$0xff] }
 0x83d   :  { %v2451_v51 = vpop.f32.mrf.mxu1 }
 0x83e   :  { %v2488_v17 = vmul.f32 %v3537_v27, %v2451_v51  ;;  %v5760_v51 = vld [vmem:[#allocation40_spill] sm:$0xff] }
 0x83f   :  { %v2453_v60 = vpop.f32.mrf.mxu1 }
 0x840   :  { %v2499_v19 = vpack.c.bf16 %v2488_v17, %v2487_v8  ;;  %v5762_v8 = vld [vmem:[#allocation31_spill] sm:$0xff] }
 0x841   :  { %v2456_v47 = vpop.f32.mrf.mxu1 }
 0x842   :  { %2507 = vxpose.xlu0.c.b16.cont [5/8] %v2499_v19, 128  ;;  %v2489_v18 = vmul.f32 %v3538_v40, %v2456_v47 }
 0x843   :  { %v2458_v49 = vpop.f32.mrf.mxu1 }
 0x845   :  { %v2459_v22 = vpop.f32.mrf.mxu1 }
 0x846   :  { %v2490_v50 = vmul.f32 %v3539_v38, %v2459_v22 }
 0x847   :  { %v2461_v29 = vpop.f32.mrf.mxu1 }
 0x848   :  { %v2500_v39 = vpack.c.bf16 %v2490_v50, %v2489_v18 }
 0x849   :  { %v2464_v0 = vpop.f32.mrf.mxu1 }
 0x84a   :  { %2508 = vxpose.xlu0.c.b16.cont [6/8] %v2500_v39, 128  ;;  %v2491_v59 = vmul.f32 %v3540_v48, %v2464_v0 }
 0x84b   :  { %v2466_v53 = vpop.f32.mrf.mxu1 }
 0x84d   :  { %v2467_v13 = vpop.f32.mrf.mxu1 }
 0x84e   :  { %v2492_v57 = vmul.f32 %v3541_v28, %v2467_v13  ;;  %s3003_s18 = spop %3002 }
 0x84f   :  { %s1589_s19 = smul.f32 0.0009765625, %s3003_s18  ;;  %v2469_v63 = vpop.f32.mrf.mxu1 }
 0x850   :  { %v2501_v24 = vpack.c.bf16 %v2492_v57, %v2491_v59 }
 0x851   :  { %v1590_v43 = vstv %s1589_s19  ;;  %v2472_v54 = vpop.f32.mrf.mxu1 }
 0x852   :  { %v5252_v30 = vsub.f32 %v5190_v37, %v1590_v43  ;;  %v5255_v1 = vsub.f32 %v5194_v31, %v1590_v43  ;;  %2509 = vxpose.xlu0.c.b16.cont [7/8] %v2501_v24, 128  ;;  %v2493_v11 = vmul.f32 %v3542_v21, %v2472_v54  ;;  %v3543_v37 = vld [vmem:[%s5446_s6 + $0x78] sm:$0xff] }
 0x853   :  { %v2474_v15 = vpop.f32.mrf.mxu1 }
 0x854   :  { %v1593_v32 = vmul.f32 %v5252_v30, %v5252_v30  ;;  %v1594_v10 = vmul.f32 %v5255_v1, %v5255_v1 }
 0x855   :  { %v2475_v33 = vpop.f32.mrf.mxu1 }
 0x856   :  { %v2494_v31 = vmul.f32 %v3543_v37, %v2475_v33  ;;  %v1595_v58 = vsel %vm1574_vm2, %v1593_v32, 0.0  ;;  %v1596_v35 = vsel %vm1574_vm2, %v1594_v10, 0.0 }
 0x857   :  { %v2477_v45 = vpop.f32.mrf.mxu1  ;;  %v1597_v20 = vadd.f32 %v1596_v35, %v1595_v58 }
 0x858   :  { %v2502_v25 = vpack.c.bf16 %v2494_v31, %v2493_v11 }
 0x859   :  { %1598 = vadd.xlane.f32.xlu1 %v1597_v20 }
 0x85a   :  { %2510 = vxpose.xlu0.c.b16.end [8/8] %v2502_v25, 128 }
 0x863   :  { %3019 = vset.pattern.permute.xlu0 %v5754_v23 }
 0x8a0   :  { %v2511_v2 = vpop.trf.xlu0 }
 0x8a1   :  { %2552 = vmatmul.mubr.bf16.vlgmr.msra.gmra.mxu1 %v2511_v2 }
 0x8a2   :  { %2561 = vmatprep.mubr.bf16.mxu1 %v5754_v23 }
 0x8a4   :  { %v2512_v56 = vpop.trf.xlu0 }
 0x8a8   :  { %v2513_v42 = vpop.trf.xlu0 }
 0x8a9   :  { %2562 = vmatmul.mubr.bf16.gmra.mxu1 %v2512_v56 }
 0x8aa   :  { %2571 = vmatprep.mubr.bf16.mxu1 %v5754_v23 }
 0x8ac   :  { %v2514_v26 = vpop.trf.xlu0 }
 0x8b0   :  { %v2515_v36 = vpop.trf.xlu0 }
 0x8b1   :  { %2572 = vmatmul.mubr.bf16.gmra.mxu1 %v2513_v42 }
 0x8b2   :  { %2581 = vmatprep.mubr.bf16.mxu1 %v5754_v23 }
 0x8b4   :  { %v2516_v16 = vpop.trf.xlu0 }
 0x8b8   :  { %v2517_v3 = vpop.trf.xlu0 }
 0x8b9   :  { %2582 = vmatmul.mubr.bf16.gmra.mxu1 %v2514_v26 }
 0x8ba   :  { %2591 = vmatprep.mubr.bf16.mxu1 %v5754_v23 }
 0x8bc   :  { %v2518_v5 = vpop.trf.xlu0 }
 0x8c1   :  { %2592 = vmatmul.mubr.bf16.gmra.mxu1 %v2515_v36 }
 0x8c2   :  { %2601 = vmatprep.mubr.bf16.mxu1 %v5754_v23 }
 0x8c9   :  { %2602 = vmatmul.mubr.bf16.gmra.mxu1 %v2516_v16 }
 0x8ca   :  { %2611 = vmatprep.mubr.bf16.mxu1 %v5754_v23 }
 0x8d1   :  { %2612 = vmatmul.mubr.bf16.gmra.mxu1 %v2517_v3 }
 0x8d2   :  { %2621 = vmatprep.mubr.bf16.mxu1 %v5754_v23 }
 0x8d9   :  { %2622 = vmatmul.mubr.bf16.gmra.mxu1 %v2518_v5 }
 0x8da   :  { %2631 = vmatprep.mubr.bf16.mxu1 %v5754_v23 }
 0x8e1   :  { %2632 = vmatmul.mubr.bf16.gmra.mxu1 %v5755_v61 }
 0x8e2   :  { %v1599_v55 = vpop.xlane.xlu1 %1598  ;;  %2641 = vmatprep.mubr.bf16.mxu1 %v5754_v23 }
 0x8e3   :  { %v1600_v44 = vrot.slane %v1599_v55, 4 }
 0x8e5   :  { %v1601_v62 = vadd.f32 %v1600_v44, %v1599_v55 }
 0x8e7   :  { %v1602_v46 = vrot.slane %v1601_v62, 2 }
 0x8e9   :  { %2642 = vmatmul.mubr.bf16.gmra.mxu1 %v5756_v9  ;;  %v1603_v34 = vadd.f32 %v1602_v46, %v1601_v62 }
 0x8ea   :  { %2651 = vmatprep.mubr.bf16.mxu1 %v5754_v23 }
 0x8eb   :  { %v1604_v6 = vrot.slane %v1603_v34, 1 }
 0x8ed   :  { %v1605_v4 = vadd.f32 %v1604_v6, %v1603_v34 }
 0x8ef   :  { %3004 = vpush %v1605_v4 }
 0x8f1   :  { %2652 = vmatmul.mubr.bf16.gmra.mxu1 %v5757_v41 }
 0x8f2   :  { %2661 = vmatprep.mubr.bf16.mxu1 %v5754_v23 }
 0x8f9   :  { %2662 = vmatmul.mubr.bf16.gmra.mxu1 %v5758_v14 }
 0x8fa   :  { %2671 = vmatprep.mubr.bf16.mxu1 %v5754_v23 }
 0x901   :  { %2672 = vmatmul.mubr.bf16.gmra.mxu1 %v5759_v52 }
 0x902   :  { %2681 = vmatprep.mubr.bf16.mxu1 %v5754_v23 }
 0x909   :  { %2682 = vmatmul.mubr.bf16.gmra.mxu1 %v5760_v51 }
 0x90a   :  { %2691 = vmatprep.mubr.bf16.mxu1 %v5754_v23 }
 0x911   :  { %2692 = vmatmul.mubr.bf16.gmra.mxu1 %v5761_v12 }
 0x912   :  { %2701 = vmatprep.mubr.bf16.mxu1 %v5754_v23 }
 0x919   :  { %2702 = vmatmul.mubr.bf16.gmra.mxu1 %v5762_v8 }
 0x91a   :  { %2824 = vmatprep.mubr.bf16.mxu1 %v5754_v23 }
 0x920   :  { %s3005_s6 = spop %3004 }
 0x921   :  { %s1609_s24 = smul.f32 0.0009765625, %s3005_s6 }
 0x923   :  { %s1610_s25 = sadd.f32 1e-05, %s1609_s24 }
 0x925   :  { %v1611_v27 = vstv %s1610_s25 }
 0x926   :  { %3436 = vrsqrt.f32 %v1611_v27 }
 0x933   :  { %v3437_v17 = vpop.eup %3436 }
 0x934   :  { %3006 = vpush %v3437_v17 }
 0x961   :  { %v2553_v60 = vpop.f32.mrf.mxu1 }
 0x963   :  { %v2555_v19 = vpop.f32.mrf.mxu1 }
 0x965   :  { %v2557_v47 = vpop.f32.mrf.mxu1 }
 0x967   :  { %v2559_v49 = vpop.f32.mrf.mxu1 }
 0x969   :  { %v5294_v22 = vpop.f32.mrf.mxu1 }
 0x96b   :  { %v5296_v40 = vpop.f32.mrf.mxu1 }
 0x96d   :  { %v2567_v18 = vpop.f32.mrf.mxu1 }
 0x96f   :  { %v5298_v38 = vpop.f32.mrf.mxu1 }
 0x971   :  { %v5300_v50 = vpop.f32.mrf.mxu1 }
 0x973   :  { %v5302_v23 = vpop.f32.mrf.mxu1 }
 0x975   :  { %v5304_v29 = vpop.f32.mrf.mxu1 }
 0x977   :  { %v5306_v39 = vpop.f32.mrf.mxu1 }
 0x979   :  { %v5308_v0 = vpop.f32.mrf.mxu1 }
 0x97b   :  { %v5310_v53 = vpop.f32.mrf.mxu1 }
 0x97d   :  { %v5312_v13 = vpop.f32.mrf.mxu1 }
 0x97f   :  { %v5314_v48 = vpop.f32.mrf.mxu1 }
 0x981   :  { %v5316_v59 = vpop.f32.mrf.mxu1 }
 0x983   :  { %v5318_v28 = vpop.f32.mrf.mxu1 }
 0x985   :  { %v5320_v57 = vpop.f32.mrf.mxu1 }
 0x987   :  { %v5322_v63 = vpop.f32.mrf.mxu1 }
 0x989   :  { %v5324_v24 = vpop.f32.mrf.mxu1 }
 0x98b   :  { %v5326_v43 = vpop.f32.mrf.mxu1 }
 0x98d   :  { %v5328_v54 = vpop.f32.mrf.mxu1 }
 0x98f   :  { %v5330_v15 = vpop.f32.mrf.mxu1 }
 0x991   :  { %v5332_v32 = vpop.f32.mrf.mxu1 }
 0x993   :  { %v5334_v10 = vpop.f32.mrf.mxu1 }
 0x995   :  { %v5336_v33 = vpop.f32.mrf.mxu1 }
 0x997   :  { %v5338_v21 = vpop.f32.mrf.mxu1 }
 0x999   :  { %v5340_v11 = vpop.f32.mrf.mxu1 }
 0x99b   :  { %v5342_v37 = vpop.f32.mrf.mxu1 }
 0x99d   :  { %v5344_v31 = vpop.f32.mrf.mxu1 }
 0x99f   :  { %v5346_v58 = vpop.f32.mrf.mxu1 }
 0x9a1   :  { %v2633_v35 = vpop.f32.mrf.mxu1 }
 0x9a2   :  { %3438 = vrcp.f32 %v2633_v35 }
 0x9a3   :  { %v2635_v45 = vpop.f32.mrf.mxu1 }
 0x9a4   :  { %3440 = vrcp.f32 %v2635_v45 }
 0x9a5   :  { %v2637_v20 = vpop.f32.mrf.mxu1 }
 0x9a6   :  { %3442 = vrcp.f32 %v2637_v20 }
 0x9a7   :  { %v2639_v25 = vpop.f32.mrf.mxu1 }
 0x9a8   :  { %3444 = vrcp.f32 %v2639_v25 }
 0x9a9   :  { %v2643_v2 = vpop.f32.mrf.mxu1 }
 0x9aa   :  { %3446 = vrcp.f32 %v2643_v2 }
 0x9ab   :  { %v2645_v56 = vpop.f32.mrf.mxu1 }
 0x9ac   :  { %3448 = vrcp.f32 %v2645_v56 }
 0x9ad   :  { %v2647_v42 = vpop.f32.mrf.mxu1 }
 0x9ae   :  { %3450 = vrcp.f32 %v2647_v42 }
 0x9af   :  { %v2649_v26 = vpop.f32.mrf.mxu1  ;;  %v3439_v36 = vpop.eup %3438 }
 0x9b0   :  { %3452 = vrcp.f32 %v2649_v26  ;;  %v5352_v55 = vmul.f32 %v3439_v36, %v2553_v60 }
 0x9b1   :  { %v5348_v16 = vpop.f32.mrf.mxu1  ;;  %v3441_v3 = vpop.eup %3440 }
 0x9b2   :  { %v5358_v9 = vmul.f32 %v3441_v3, %v2555_v19 }
 0x9b3   :  { %v3443_v5 = vpop.eup %3442  ;;  %v5350_v61 = vpop.f32.mrf.mxu1 }
 0x9b4   :  { %v5354_v44 = vmul.f32 %v3443_v5, %v2557_v47 }
 0x9b5   :  { %v3445_v62 = vpop.eup %3444  ;;  %v5356_v46 = vpop.f32.mrf.mxu1 }
 0x9b6   :  { %v5360_v34 = vmul.f32 %v3445_v62, %v2559_v49 }
 0x9b7   :  { %v2659_v4 = vpop.f32.mrf.mxu1  ;;  %v3447_v14 = vpop.eup %3446 }
 0x9b8   :  { %v2777_v41 = vpack.c.bf16 %v5360_v34, %v5358_v9  ;;  %v5367_v27 = vmul.f32 %v3447_v14, %v5294_v22 }
 0x9b9   :  { %v2663_v52 = vpop.f32.mrf.mxu1  ;;  %v3449_v51 = vpop.eup %3448 }
 0x9ba   :  { %v5372_v47 = vmul.f32 %v3449_v51, %v5296_v40 }
 0x9bb   :  { %v3451_v12 = vpop.eup %3450  ;;  %v2665_v8 = vpop.f32.mrf.mxu1 }
 0x9bc   :  { %v5369_v17 = vmul.f32 %v3451_v12, %v2567_v18 }
 0x9bd   :  { %v3453_v60 = vpop.eup %3452  ;;  %v2667_v19 = vpop.f32.mrf.mxu1 }
 0x9be   :  { %v5375_v49 = vmul.f32 %v3453_v60, %v5298_v38  ;;  %v2778_v35 = vpack.c.bf16 %v5369_v17, %v5367_v27 }
 0x9bf   :  { %v2669_v45 = vpop.f32.mrf.mxu1 }
 0x9c0   :  { %v2779_v20 = vpack.c.bf16 %v5375_v49, %v5372_v47 }
 0x9c1   :  { %v2673_v25 = vpop.f32.mrf.mxu1 }
 0x9c3   :  { %v2675_v22 = vpop.f32.mrf.mxu1 }
 0x9c5   :  { %v2677_v2 = vpop.f32.mrf.mxu1 }
 0x9c7   :  { %v2679_v18 = vpop.f32.mrf.mxu1 }
 0x9c9   :  { %v2683_v56 = vpop.f32.mrf.mxu1 }
 0x9cb   :  { %v2685_v42 = vpop.f32.mrf.mxu1 }
 0x9cd   :  { %v2687_v26 = vpop.f32.mrf.mxu1 }
 0x9cf   :  { %v2689_v36 = vpop.f32.mrf.mxu1 }
 0x9d1   :  { %v2693_v40 = vpop.f32.mrf.mxu1 }
 0x9d3   :  { %v2695_v3 = vpop.f32.mrf.mxu1 }
 0x9d4   :  { %3454 = vrcp.f32 %v2695_v3 }
 0x9d5   :  { %v2697_v5 = vpop.f32.mrf.mxu1 }
 0x9d7   :  { %v2699_v38 = vpop.f32.mrf.mxu1 }
 0x9d8   :  { %3456 = vrcp.f32 %v2699_v38 }
 0x9d9   :  { %v2703_v62 = vpop.f32.mrf.mxu1 }
 0x9db   :  { %v2705_v14 = vpop.f32.mrf.mxu1 }
 0x9dc   :  { %3458 = vrcp.f32 %v2705_v14 }
 0x9dd   :  { %v2707_v51 = vpop.f32.mrf.mxu1 }
 0x9de   :  { %3460 = vrcp.f32 %v2707_v51 }
 0x9df   :  { %3462 = vrcp.f32 %v2703_v62  ;;  %v2709_v12 = vpop.f32.mrf.mxu1 }
 0x9e0   :  { %3464 = vrcp.f32 %v2709_v12 }
 0x9e1   :  { %3466 = vrcp.f32 %v2697_v5  ;;  %v3455_v60 = vpop.eup %3454 }
 0x9e2   :  { %3468 = vrcp.f32 %v2689_v36 }
 0x9e3   :  { %3470 = vrcp.f32 %v2693_v40 }
 0x9e4   :  { %3472 = vrcp.f32 %v2685_v42 }
 0x9e5   :  { %3474 = vrcp.f32 %v2687_v26  ;;  %v3457_v6 = vpop.eup %3456 }
 0x9e6   :  { %3476 = vrcp.f32 %v2679_v18 }
 0x9e7   :  { %3478 = vrcp.f32 %v2683_v56 }
 0x9e8   :  { %3480 = vrcp.f32 %v2675_v22  ;;  %v2771_v22 = vmul.f32 %v3457_v6, %v5338_v21 }
 0x9e9   :  { %3482 = vrcp.f32 %v2677_v2  ;;  %v3459_v3 = vpop.eup %3458 }
 0x9ea   :  { %3484 = vrcp.f32 %v2669_v45  ;;  %v2773_v42 = vmul.f32 %v3459_v3, %v5342_v37 }
 0x9eb   :  { %v3461_v38 = vpop.eup %3460  ;;  %3486 = vrcp.f32 %v2673_v25 }
 0x9ec   :  { %v3463_v14 = vpop.eup %3462  ;;  %3488 = vrcp.f32 %v2665_v8  ;;  %v2774_v5 = vmul.f32 %v3461_v38, %v5344_v31 }
 0x9ed   :  { %v3465_v62 = vpop.eup %3464  ;;  %3490 = vrcp.f32 %v2667_v19  ;;  %v2772_v45 = vmul.f32 %v3463_v14, %v5340_v11  ;;  %v2769_v19 = vmul.f32 %v3455_v60, %v5334_v10 }
 0x9ee   :  { %v3467_v36 = vpop.eup %3466  ;;  %3492 = vrcp.f32 %v2659_v4  ;;  %v2775_v18 = vmul.f32 %v3465_v62, %v5346_v58 }
 0x9ef   :  { %v3469_v56 = vpop.eup %3468  ;;  %3494 = vrcp.f32 %v2663_v52  ;;  %v2790_v31 = vpack.c.bf16 %v2774_v5, %v2772_v45  ;;  %v2770_v37 = vmul.f32 %v3467_v36, %v5336_v33  ;;  %v2789_v58 = vpack.c.bf16 %v2771_v22, %v2769_v19 }
 0x9f0   :  { %v3471_v2 = vpop.eup %3470  ;;  %3496 = vrcp.f32 %v5350_v61  ;;  %v2791_v8 = vpack.c.bf16 %v2775_v18, %v2773_v42  ;;  %v2767_v21 = vmul.f32 %v3469_v56, %v5330_v15 }
 0x9f1   :  { %v3473_v25 = vpop.eup %3472  ;;  %3498 = vrcp.f32 %v5356_v46  ;;  %v2768_v11 = vmul.f32 %v3471_v2, %v5332_v32 }
 0x9f2   :  { %v3475_v4 = vpop.eup %3474  ;;  %2792 = vmatprep.subr.bf16.mxu1 %v2791_v8  ;;  %3500 = vrcp.f32 %v5348_v16  ;;  %v2765_v10 = vmul.f32 %v3473_v25, %v5326_v43 }
 0x9f3   :  { %v3477_v6 = vpop.eup %3476  ;;  %2793 = vmatpush1.bf16.msra.mxu1 %v2790_v31  ;;  %v2788_v46 = vpack.c.bf16 %v2770_v37, %v2768_v11  ;;  %v2766_v26 = vmul.f32 %v3475_v4, %v5328_v54 }
 0x9f4   :  { %v3479_v61 = vpop.eup %3478  ;;  %2794 = vmatprep.subr.bf16.mxu1 %v2789_v58  ;;  %v2787_v40 = vpack.c.bf16 %v2767_v21, %v2765_v10  ;;  %v2763_v51 = vmul.f32 %v3477_v6, %v5322_v63  ;;  %v81_v10 = vld [vmem:[%s5444_s4] sm:$0xf] }
 0x9f5   :  { %v3481_v52 = vpop.eup %3480  ;;  %v2764_v15 = vmul.f32 %v3479_v61, %v5324_v24 }
 0x9f6   :  { %v3483_v33 = vpop.eup %3482  ;;  %v2761_v32 = vmul.f32 %v3481_v52, %v5318_v28 }
 0x9f7   :  { %v3485_v12 = vpop.eup %3484  ;;  %2795 = vmatpush1.bf16.msra.mxu1 %v2788_v46  ;;  %v2786_v3 = vpack.c.bf16 %v2766_v26, %v2764_v15  ;;  %v2762_v43 = vmul.f32 %v3483_v33, %v5320_v57 }
 0x9f8   :  { %v3487_v16 = vpop.eup %3486  ;;  %2796 = vmatprep.subr.bf16.mxu1 %v2787_v40  ;;  %v2785_v14 = vpack.c.bf16 %v2763_v51, %v2761_v32  ;;  %v2759_v54 = vmul.f32 %v3485_v12, %v5314_v48 }
 0x9f9   :  { %v3489_v60 = vpop.eup %3488  ;;  %v2760_v63 = vmul.f32 %v3487_v16, %v5316_v59 }
 0x9fa   :  { %v3491_v38 = vpop.eup %3490  ;;  %v2757_v24 = vmul.f32 %v3489_v60, %v5310_v53 }
 0x9fb   :  { %v3493_v62 = vpop.eup %3492  ;;  %2797 = vmatpush1.bf16.msra.mxu1 %v2786_v3  ;;  %v2784_v42 = vpack.c.bf16 %v2762_v43, %v2760_v63  ;;  %v2758_v28 = vmul.f32 %v3491_v38, %v5312_v13 }
 0x9fc   :  { %v3495_v5 = vpop.eup %3494  ;;  %2798 = vmatprep.subr.bf16.mxu1 %v2785_v14  ;;  %v2783_v22 = vpack.c.bf16 %v2759_v54, %v2757_v24  ;;  %v2755_v57 = vmul.f32 %v3493_v62, %v5306_v39 }
 0x9fd   :  { %v3497_v36 = vpop.eup %3496  ;;  %v2756_v56 = vmul.f32 %v3495_v5, %v5308_v0 }
 0x9fe   :  { %v3499_v18 = vpop.eup %3498  ;;  %v2753_v45 = vmul.f32 %v3497_v36, %v5302_v23  ;;  %v5763_v23 = vpack.c.bf16 %v5354_v44, %v5352_v55  ;;  %v82_v55 = vld [vmem:[%s5445_s5] sm:$0xf] }
 0x9ff   :  { %2799 = vmatpush1.bf16.msra.mxu1 %v2784_v42  ;;  %v3501_v48 = vpop.eup %3500  ;;  %v2782_v59 = vpack.c.bf16 %v2758_v28, %v2756_v56  ;;  %v2754_v2 = vmul.f32 %v3499_v18, %v5304_v29  ;;  %1626 = vperm.xlu0 %3019, %v82_v55  }
 0xa00   :  { %2800 = vmatprep.subr.bf16.mxu1 %v2783_v22  ;;  %v2781_v8 = vpack.c.bf16 %v2755_v57, %v2753_v45  ;;  %v2752_v53 = vmul.f32 %v3501_v48, %v5300_v50  ;;  %v3544_v50 = vld [vmem:[%s5442_s2] sm:$0x3]  ;;  %s3007_s2 = spop %3006 }
 0xa01   :  { %v1614_v52 = vstv %s3007_s2 }
 0xa02   :  { %v2780_v13 = vpack.c.bf16 %v2754_v2, %v2752_v53  ;;  %v1615_v33 = vmul.f32 %v1614_v52, %v5252_v30  ;;  %v1616_v40 = vmul.f32 %v1614_v52, %v5255_v1 }
 0xa03   :  { %2801 = vmatpush1.bf16.msra.mxu1 %v2782_v59 }
 0xa04   :  { %2802 = vmatprep.subr.bf16.mxu1 %v2781_v8 }
 0xa07   :  { %2803 = vmatpush1.bf16.msra.mxu1 %v2780_v13 }
 0xa08   :  { %2804 = vmatprep.subr.bf16.mxu1 %v2779_v20 }
 0xa0b   :  { %2805 = vmatpush1.bf16.msra.mxu1 %v2778_v35 }
 0xa0c   :  { %2806 = vmatprep.subr.bf16.mxu1 %v2777_v41 }
 0xa0f   :  { %2807 = vmatpush1.bf16.msra.mxu1 %v5763_v23 }
 0xa12   :  { %2825 = vmatmul.mubr.bf16.vlgmr.msra.gmra.mxu1 %v3544_v50 }
 0xa7a   :  { %v1627_v15 = vpop.permute.xlu0 %1626 }
 0xad2   :  { %v2826_v29 = vpop.f32.mrf.mxu1 }
 0xad3   :  { %v2827_v39 = vadd.f32 %v2826_v29, %v5186_v7 }
 0xad4   :  { %v2828_v0 = vpop.f32.mrf.mxu1 }
 0xad5   :  { %v2829_v27 = vadd.f32 %v2828_v0, %v5186_v7  ;;  %v2833_v47 = vsel %vm1574_vm2, %v2827_v39, 0.0 }
 0xad6   :  { %v2830_v17 = vpop.f32.mrf.mxu1 }
 0xad7   :  { %v2834_v9 = vsel %vm1574_vm2, %v2829_v27, 0.0 }
 0xad8   :  { %v2835_v34 = vadd.f32 %v2834_v9, %v2833_v47  ;;  %v2831_v41 = vpop.f32.mrf.mxu1 }
 0xada   :  { %2836 = vadd.xlane.f32.xlu1 %v2835_v34 }
 0xb63   :  { %v2837_v44 = vpop.xlane.xlu1 %2836 }
 0xb64   :  { %v2838_v49 = vrot.slane %v2837_v44, 4 }
 0xb66   :  { %v2839_v35 = vadd.f32 %v2838_v49, %v2837_v44 }
 0xb68   :  { %v2840_v20 = vrot.slane %v2839_v35, 2 }
 0xb6a   :  { %v2841_v19 = vadd.f32 %v2840_v20, %v2839_v35 }
 0xb6c   :  { %v2842_v25 = vrot.slane %v2841_v19, 1 }
 0xb6e   :  { %v2843_v7 = vadd.f32 %v2842_v25, %v2841_v19 }
 0xb70   :  { %3008 = vpush %v2843_v7 }
 0xba1   :  { %s3009_s30 = spop %3008 }
 0xba2   :  { %s2847_s7 = smul.f32 0.0009765625, %s3009_s30 }
 0xba4   :  { %v2848_v31 = vstv %s2847_s7 }
 0xba5   :  { %v2849_v37 = vsub.f32 %v2827_v39, %v2848_v31  ;;  %v2850_v4 = vsub.f32 %v2829_v27, %v2848_v31 }
 0xba7   :  { %v2851_v58 = vmul.f32 %v2849_v37, %v2849_v37  ;;  %v2852_v21 = vmul.f32 %v2850_v4, %v2850_v4 }
 0xba9   :  { %v2853_v6 = vsel %vm1574_vm2, %v2851_v58, 0.0  ;;  %v2854_v11 = vsel %vm1574_vm2, %v2852_v21, 0.0 }
 0xbaa   :  { %v2855_v61 = vadd.f32 %v2854_v11, %v2853_v6 }
 0xbac   :  { %2856 = vadd.xlane.f32.xlu1 %v2855_v61 }
 0xbbd   :  { %1619 = vperm.xlu1 %3018, %v81_v10  }
 0xc35   :  { %v2857_v46 = vpop.xlane.xlu1 %2856 }
 0xc36   :  { %v2858_v26 = vrot.slane %v2857_v46, 4 }
 0xc38   :  { %v2859_v51 = vadd.f32 %v2858_v26, %v2857_v46 }
 0xc39   :  { %v1620_v12 = vpop.permute.xlu1 %1619 }
 0xc3a   :  { %v2860_v16 = vrot.slane %v2859_v51, 2  ;;  %v1622_v32 = vmul.f32 %v1620_v12, %v1615_v33  ;;  %v1623_v60 = vmul.f32 %v1620_v12, %v1616_v40 }
 0xc3c   :  { %v1629_v3 = vadd.f32 %v1627_v15, %v1622_v32  ;;  %v1630_v43 = vadd.f32 %v1627_v15, %v1623_v60  ;;  %v2861_v38 = vadd.f32 %v2860_v16, %v2859_v51 }
 0xc3e   :  { %v1633_v14 = vcombine.low %v1629_v3, %v1630_v43  ;;  %v2862_v54 = vrot.slane %v2861_v38, 1 }
 0xc40   :  { %1635 = vst [vmem:[#allocation2] sm:$0xff] %v1633_v14  ;;  %v2863_v62 = vadd.f32 %v2862_v54, %v2861_v38 }
 0xc42   :  { %3010 = vpush %v2863_v62 }
 0xc73   :  { %s3011_s4 = spop %3010 }
 0xc74   :  { %s2867_s10 = smul.f32 0.0009765625, %s3011_s4 }
 0xc76   :  { %s2868_s11 = sadd.f32 1e-05, %s2867_s10 }
 0xc78   :  { %v2869_v30 = vstv %s2868_s11 }
 0xc79   :  { %3502 = vrsqrt.f32 %v2869_v30 }
 0xc86   :  { %v3503_v1 = vpop.eup %3502 }
 0xc87   :  { %3012 = vpush %v3503_v1 }
 0xcb8   :  { %s3013_s12 = spop %3012 }
 0xcb9   :  { %v2872_v63 = vstv %s3013_s12 }
 0xcba   :  { %v2873_v5 = vmul.f32 %v2872_v63, %v2849_v37  ;;  %v2874_v24 = vmul.f32 %v2872_v63, %v2850_v4 }
 0xcbc   :  { %v2875_v36 = vmul.f32 %v2873_v5, %v1620_v12  ;;  %v2876_v42 = vmul.f32 %v2874_v24, %v1620_v12 }
 0xcbe   :  { %v2877_v28 = vadd.f32 %v2875_v36, %v1627_v15  ;;  %v2878_v18 = vadd.f32 %v2876_v42, %v1627_v15 }
 0xcc0   :  { %v2881_v22 = vcombine.low %v2877_v28, %v2878_v18 }
 0xcc2   :  { %2884 = vst [vmem:[#allocation2 + $0x8] sm:$0xff] %v2881_v22 }
 0xcc3   :  { %3556 = shalt.err (!%p3553_p4)
}
 0xcc4   :  { %s3569_s16 = smov 128   ;;  %s3570_s1 = smov 8  }
 0xcc5   :  { %2896 = dma.vmem_to_hbm [thread:$0]  %s2891_s14, 256, %s5448_s8, [#allocation3], %s3569_s16, %s3569_s16, %s3570_s1  }
 0xcc6   :  { %3565 = dma.done.wait [#allocation3], 256  }
 0xcc7   :  { %3566 = vsyncadd [#allocation3], 4294967040 }
 0xcc8   :  { %2900 = vsyncpa [#allocation3], 1 }

</bundles_post_ra>
